<compile_context>
chip_gen: v7x
topology: tpu7x:2x2x1
jax: 0.10.0
libtpu: 0.0.40
codegen_flags: <defaults>
</compile_context>

<pallas_src>
import numpy as np
import jax
import jax.numpy as jnp
from jax import lax
from jax.experimental import pallas as pl
from jax.experimental.pallas import tpu as pltpu


def _vmem_limit_bytes():
    """~3/4 of physical VMEM (~96 MiB on v5e/v6e 128 MiB parts, ~48 MiB on v7x)."""
    try:
        cap = int(pltpu.get_tpu_info().vmem_capacity_bytes)
    except Exception:
        cap = 64 * 1024 * 1024
    return max(32 * 1024 * 1024, min((cap * 3) // 4, 112 * 1024 * 1024))


def _pick_block(n, candidates=(512, 256, 128, 64, 32, 16, 8)):
    for cand in candidates:
        if cand <= n and n % cand == 0:
            return cand
    return n


# --------------------- fused 1x1 conv + 3x3 depthwise conv ------------------

def _make_fused_pw_dw_kernel(H, W):
    HW = H * W

    def kernel(x_ref, pw_ref, dw_ref, m_ref, o_ref):
        # x_ref:  (HW, Cin)   one batch element, tokens on sublanes
        # pw_ref: (Cin, Cout) bf16 1x1-conv weight (in -> out)
        # dw_ref: (9, Cout)   bf16 depthwise taps, tap index = (ky+1)*3 + (kx+1)
        # m_ref:  (HW, 9)     f32 border-validity mask per tap (precomputed)
        # o_ref:  (HW, Cout)  bf16 activation consumed by the attention kernel
        # 1x1 conv == matmul: bf16 MXU operands, f32 accumulation.
        y = jnp.dot(x_ref[...].astype(jnp.bfloat16), pw_ref[...],
                    preferred_element_type=jnp.float32)             # (HW, Cout) f32
        dw = dw_ref[...]
        masks = m_ref[...]
        # 3x3 depthwise conv (padding=1) on the flattened token axis:
        # a (ky,kx) tap = static sublane roll (XLU) * border mask; no padded
        # scratch, no zero-fill, no unaligned sublane slices.
        acc = y * dw[4:5, :]                                        # centre tap
        for ky in (-1, 0, 1):
            for kx in (-1, 0, 1):
                if ky == 0 and kx == 0:
                    continue
                tap = (ky + 1) * 3 + (kx + 1)
                d = ky * W + kx                                     # flat token offset
                shifted = pltpu.roll(y, shift=(-d) % HW, axis=0)    # shifted[i] = y[i+d]
                acc = acc + (shifted * masks[:, tap:tap + 1]) * dw[tap:tap + 1, :]
        o_ref[...] = acc.astype(o_ref.dtype)

    return kernel


def fused_pw_dw_conv(x_btc, w_io_bf16, dw_taps_bf16, tap_masks, H, W):
    """Fused (1x1 conv -> 3x3 depthwise conv), both bias-free.

    x_btc:        (B, H*W, Cin)   channels on the lane axis
    w_io_bf16:    (Cin, Cout)     bf16 (already transposed from torch (out,in))
    dw_taps_bf16: (9, Cout)       bf16 depthwise taps
    tap_masks:    (H*W, 9)        f32 border masks
    returns       (B, H*W, Cout)  bf16
    """
    B, HW, Cin = x_btc.shape
    Cout = w_io_bf16.shape[1]
    # TODO(synk): for large H*W, tile over row strips (1-row halo) so per-step
    # blocks stay inside v7x's 64 MiB VMEM and each TensorCore gets >1 step.
    return pl.pallas_call(
        _make_fused_pw_dw_kernel(H, W),
        out_shape=jax.ShapeDtypeStruct((B, HW, Cout), jnp.bfloat16),
        grid=(B,),
        in_specs=[
            pl.BlockSpec((None, HW, Cin), lambda b: (b, 0, 0)),
            pl.BlockSpec((Cin, Cout), lambda b: (0, 0)),      # resident weight
            pl.BlockSpec((9, Cout), lambda b: (0, 0)),        # resident taps
            pl.BlockSpec((HW, 9), lambda b: (0, 0)),          # resident masks
        ],
        out_specs=pl.BlockSpec((None, HW, Cout), lambda b: (b, 0, 0)),
        compiler_params=pltpu.CompilerParams(
            dimension_semantics=("parallel",),
            vmem_limit_bytes=_vmem_limit_bytes()),
    )(x_btc, w_io_bf16, dw_taps_bf16, tap_masks)


# --------------------- attention core (+ fused projection) ------------------

def _make_attn_proj_kernel(num_heads, dim):
    c = dim // num_heads

    def kernel(t_ref, q_ref, kv_ref, pw_ref, o_ref):
        # t_ref:  (num_heads,) f32 in SMEM (temperature)
        # q_ref:  (Tq, dim)    bf16, 'tokens x (head c)' query row tile
        # kv_ref: (HW, 2*dim)  bf16, [k | v] channel-concatenated (full length)
        # pw_ref: (dim, dim)   bf16 output-projection weight (in -> out), resident
        # o_ref:  (Tq, dim)    projected output
        eps2 = 1e-24  # (1e-12)^2 -> matches F.normalize clamp max(||x||, 1e-12)
        acc = jnp.zeros(o_ref.shape, jnp.float32)
        for h in range(num_heads):
            q = q_ref[:, h * c:(h + 1) * c].astype(jnp.float32)
            k = kv_ref[:, h * c:(h + 1) * c].astype(jnp.float32)
            v = kv_ref[:, dim + h * c: dim + (h + 1) * c]           # bf16
            # L2 normalization via rsqrt (EUP slot), elementwise math in f32.
            qn = q * lax.rsqrt(jnp.maximum(jnp.sum(q * q, -1, keepdims=True), eps2))
            kn = k * lax.rsqrt(jnp.maximum(jnp.sum(k * k, -1, keepdims=True), eps2))
            # q @ k^T without an explicit transpose: contract last axes of both.
            logits = lax.dot_general(
                qn.astype(jnp.bfloat16), kn.astype(jnp.bfloat16),
                dimension_numbers=(((1,), (1,)), ((), ())),
                preferred_element_type=jnp.float32) * t_ref[h]
            logits = logits - jnp.max(logits, axis=-1, keepdims=True)
            p = jnp.exp(logits)
            p = p * pl.reciprocal(jnp.sum(p, axis=-1, keepdims=True), approx=True)
            # attn_drop_prob == 0.0 -> nn.Identity(); nothing to apply.
            o_h = lax.dot_general(
                p.astype(jnp.bfloat16), v,
                dimension_numbers=(((1,), (0,)), ((), ())),
                preferred_element_type=jnp.float32)                 # (Tq, c) f32
            # Fused output projection: accumulate this head's contribution of the
            # final 1x1 conv (no head concat, no extra HBM round trip).
            acc = acc + jnp.dot(o_h.astype(jnp.bfloat16),
                                pw_ref[h * c:(h + 1) * c, :],
                                preferred_element_type=jnp.float32)
        o_ref[...] = acc.astype(o_ref.dtype)

    return kernel


def attention_project(q_btc, kv_btc, proj_io_bf16, temperature, num_heads, out_dtype):
    """q: (B, HW, dim) bf16, kv: (B, HW, 2*dim) bf16 -> projected (B, HW, dim)."""
    B, HW, dim = q_btc.shape
    bq = _pick_block(HW)
    # TODO(synk): for very large HW also tile K/V with an online softmax so the
    # (bq, HW) logits + full K|V block stay inside VMEM on v7x.
    return pl.pallas_call(
        _make_attn_proj_kernel(num_heads, dim),
        out_shape=jax.ShapeDtypeStruct((B, HW, dim), out_dtype),
        grid=(B, HW // bq),
        in_specs=[
            pl.BlockSpec(memory_space=pltpu.MemorySpace.SMEM),           # temperature
            pl.BlockSpec((None, bq, dim), lambda b, i: (b, i, 0)),       # q row tile
            pl.BlockSpec((None, HW, 2 * dim), lambda b, i: (b, 0, 0)),   # full K|V
            pl.BlockSpec((dim, dim), lambda b, i: (0, 0)),               # resident proj
        ],
        out_specs=pl.BlockSpec((None, bq, dim), lambda b, i: (b, i, 0)),
        compiler_params=pltpu.CompilerParams(
            dimension_semantics=("parallel", "parallel"),
            vmem_limit_bytes=_vmem_limit_bytes()),
    )(temperature, q_btc, kv_btc, proj_io_bf16)


# ------------------------------ module wrapper ------------------------------

def init_params(key, dim, dim2, num_heads):
    ks = jax.random.split(key, 5)
    s = 0.1
    return {
        "q_w":      s * jax.random.normal(ks[0], (dim, dim), jnp.float32),      # (out,in)
        "q_dw_w":   s * jax.random.normal(ks[1], (3, 3, dim), jnp.float32),
        "kv_w":     s * jax.random.normal(ks[2], (2 * dim, dim2), jnp.float32),
        "kv_dw_w":  s * jax.random.normal(ks[3], (3, 3, 2 * dim), jnp.float32),
        "proj_w":   s * jax.random.normal(ks[4], (dim, dim), jnp.float32),
        "temperature": jnp.ones((num_heads,), jnp.float32),  # torch: (heads,1,1)
    }


def _tap_masks(H, W):
    """(H*W, 9) f32: column (ky+1)*3+(kx+1) is 1 where the (ky,kx) neighbour is in-bounds."""
    hh, ww = np.meshgrid(np.arange(H), np.arange(W), indexing="ij")
    cols = []
    for ky in (-1, 0, 1):
        for kx in (-1, 0, 1):
            ok = (hh + ky >= 0) & (hh + ky < H) & (ww + kx >= 0) & (ww + kx < W)
            cols.append(ok.reshape(-1))
    return jnp.asarray(np.stack(cols, axis=1).astype(np.float32))


def cross_attention_forward(tgt_nchw, mem_nchw, params, num_heads):
    B, dim, H, W = tgt_nchw.shape
    dim2 = mem_nchw.shape[1]
    HW = H * W

    # NCHW -> (B, HW, C): channels on the 128-lane axis, tokens on sublanes.
    # TODO(synk): fold these XLA transposes into the conv kernels (accept (C,HW)
    # blocks) for bandwidth-bound production sizes.
    x = jnp.transpose(tgt_nchw, (0, 2, 3, 1)).reshape(B, HW, dim)
    m = jnp.transpose(mem_nchw, (0, 2, 3, 1)).reshape(B, HW, dim2)

    # Pre-cast all weights to bf16 once, outside the kernels.
    q_w    = params["q_w"].T.astype(jnp.bfloat16)                  # (Cin, Cout)
    kv_w   = params["kv_w"].T.astype(jnp.bfloat16)
    q_dw   = params["q_dw_w"].reshape(9, dim).astype(jnp.bfloat16)
    kv_dw  = params["kv_dw_w"].reshape(9, 2 * dim).astype(jnp.bfloat16)
    proj_w = params["proj_w"].T.astype(jnp.bfloat16)
    masks  = _tap_masks(H, W)

    q = fused_pw_dw_conv(x, q_w, q_dw, masks, H, W)       # (B,HW,dim)   bf16
    kv = fused_pw_dw_conv(m, kv_w, kv_dw, masks, H, W)    # (B,HW,2*dim) bf16

    o = attention_project(q, kv, proj_w, params["temperature"], num_heads,
                          out_dtype=tgt_nchw.dtype)       # (B,HW,dim)

    o = o.reshape(B, H, W, dim)
    return jnp.transpose(o, (0, 3, 1, 2))                 # NCHW


# ------------------------------ pure-JAX reference ---------------------------

def ref_forward(tgt_nchw, mem_nchw, params, num_heads):
    B, dim, H, W = tgt_nchw.shape
    c = dim // num_heads
    x = jnp.transpose(tgt_nchw, (0, 2, 3, 1))
    m = jnp.transpose(mem_nchw, (0, 2, 3, 1))

    def pw(t, w_oi):
        return jnp.einsum("bhwc,oc->bhwo", t, w_oi, precision="highest")

    def dw(t, w33c):
        Hh, Ww = t.shape[1:3]
        tp = jnp.pad(t, ((0, 0), (1, 1), (1, 1), (0, 0)))
        out = jnp.zeros_like(t)
        for ky in range(3):
            for kx in range(3):
                out = out + tp[:, ky:ky + Hh, kx:kx + Ww, :] * w33c[ky, kx]
        return out

    q = dw(pw(x, params["q_w"]), params["q_dw_w"])
    kv = dw(pw(m, params["kv_w"]), params["kv_dw_w"])
    k, v = kv[..., :dim], kv[..., dim:]

    def to_heads(t):
        t = t.reshape(B, H * W, num_heads, c)
        return jnp.transpose(t, (0, 2, 1, 3))

    qh, kh, vh = to_heads(q.reshape(B, H * W, dim)), \
                 to_heads(k.reshape(B, H * W, dim)), \
                 to_heads(v.reshape(B, H * W, dim))
    eps = 1e-12
    qh = qh / jnp.maximum(jnp.linalg.norm(qh, axis=-1, keepdims=True), eps)
    kh = kh / jnp.maximum(jnp.linalg.norm(kh, axis=-1, keepdims=True), eps)
    attn = jnp.einsum("bhqc,bhkc->bhqk", qh, kh, precision="highest")
    attn = attn * params["temperature"][None, :, None, None]
    attn = jax.nn.softmax(attn, axis=-1)
    oh = jnp.einsum("bhqk,bhkc->bhqc", attn, vh, precision="highest")
    o = jnp.transpose(oh, (0, 2, 1, 3)).reshape(B, H * W, dim)
    o = jnp.einsum("bnc,oc->bno", o, params["proj_w"], precision="highest")
    o = o.reshape(B, H, W, dim)
    return jnp.transpose(o, (0, 3, 1, 2))


# ----------------------------------- main -----------------------------------

if __name__ == "__main__":
    B, dim, dim2, num_heads, H, W = 2, 16, 8, 2, 8, 8

    key = jax.random.PRNGKey(0)
    k_tgt, k_mem, k_par = jax.random.split(key, 3)
    tgt = jax.random.normal(k_tgt, (B, dim, H, W), jnp.float32)
    mem = jax.random.normal(k_mem, (B, dim2, H, W), jnp.float32)
    params = init_params(k_par, dim, dim2, num_heads)

    fwd = jax.jit(lambda t, m: cross_attention_forward(t, m, params, num_heads))
    out = jax.block_until_ready(fwd(tgt, mem))

    ref = jax.block_until_ready(ref_forward(tgt, mem, params, num_heads))
    assert out.shape == (B, dim, H, W)
    max_err = float(jnp.max(jnp.abs(out - ref)))
    assert jnp.allclose(out, ref, rtol=1e-2, atol=1e-2), f"mismatch vs reference ({max_err})"

    print("KERNEL_OK")
</pallas_src>

<mosaic_0001>
module attributes {stable_mosaic.version = 11 : i64} {
  func.func @kernel(%arg0: i32, %arg1: memref<1x64x8xf32, #tpu.memory_space<vmem>>, %arg2: memref<8x32xbf16, #tpu.memory_space<vmem>>, %arg3: memref<9x32xbf16, #tpu.memory_space<vmem>>, %arg4: memref<64x9xf32, #tpu.memory_space<vmem>>, %arg5: memref<1x64x32xbf16, #tpu.memory_space<vmem>>) attributes {dimension_semantics = [#tpu.dimension_semantics<parallel>], iteration_bounds = array<i64: 2>, scalar_prefetch = 0 : i64, scratch_operands = 0 : i64, tpu.core_type = #tpu.core_type<tc>, window_params = [{transform_indices = @transform_0, window_bounds = array<i64: 1, 64, 8>}, {pipeline_mode = #tpu.pipeline_mode<synchronous>, transform_indices = @transform_1, window_bounds = array<i64: 8, 32>}, {pipeline_mode = #tpu.pipeline_mode<synchronous>, transform_indices = @transform_2, window_bounds = array<i64: 9, 32>}, {pipeline_mode = #tpu.pipeline_mode<synchronous>, transform_indices = @transform_3, window_bounds = array<i64: 64, 9>}, {transform_indices = @transform_4, window_bounds = array<i64: 1, 64, 32>}]} {
    %c0 = arith.constant 0 : index
    %c0_0 = arith.constant 0 : index
    %c0_1 = arith.constant 0 : index
    %0 = vector.load %arg1[%c0, %c0_0, %c0_1] : memref<1x64x8xf32, #tpu.memory_space<vmem>>, vector<1x64x8xf32>
    %1 = vector.shape_cast %0 : vector<1x64x8xf32> to vector<64x8xf32>
    %2 = arith.truncf %1 : vector<64x8xf32> to vector<64x8xbf16>
    %c0_2 = arith.constant 0 : index
    %c0_3 = arith.constant 0 : index
    %3 = vector.load %arg2[%c0_2, %c0_3] : memref<8x32xbf16, #tpu.memory_space<vmem>>, vector<8x32xbf16>
    %cst = arith.constant dense<0.000000e+00> : vector<64x32xf32>
    %4 = tpu.matmul %2, %3, %cst {dimension_numbers = #tpu.dot_dimension_numbers<[1], [0], [0], [1], [0, 0, 1, 1], [], []>} : vector<64x8xbf16>, vector<8x32xbf16>, vector<64x32xf32> -> vector<64x32xf32>
    %c0_4 = arith.constant 0 : index
    %c0_5 = arith.constant 0 : index
    %5 = vector.load %arg3[%c0_4, %c0_5] : memref<9x32xbf16, #tpu.memory_space<vmem>>, vector<9x32xbf16>
    %c0_6 = arith.constant 0 : index
    %c0_7 = arith.constant 0 : index
    %6 = vector.load %arg4[%c0_6, %c0_7] : memref<64x9xf32, #tpu.memory_space<vmem>>, vector<64x9xf32>
    %7 = vector.extract_strided_slice %5 {offsets = [4, 0], sizes = [1, 32], strides = [1, 1]} : vector<9x32xbf16> to vector<1x32xbf16>
    %8 = arith.extf %7 : vector<1x32xbf16> to vector<1x32xf32>
    %9 = vector.broadcast %8 : vector<1x32xf32> to vector<64x32xf32>
    %10 = arith.mulf %4, %9 : vector<64x32xf32>
    %c9_i32 = arith.constant 9 : i32
    %11 = tpu.dynamic_rotate %4 by %c9_i32 dim 0 : vector<64x32xf32>, i32 -> vector<64x32xf32>
    %12 = vector.extract_strided_slice %6 {offsets = [0, 0], sizes = [64, 1], strides = [1, 1]} : vector<64x9xf32> to vector<64x1xf32>
    %13 = vector.broadcast %12 : vector<64x1xf32> to vector<64x32xf32>
    %14 = arith.mulf %11, %13 : vector<64x32xf32>
    %15 = vector.extract_strided_slice %5 {offsets = [0, 0], sizes = [1, 32], strides = [1, 1]} : vector<9x32xbf16> to vector<1x32xbf16>
    %16 = arith.extf %15 : vector<1x32xbf16> to vector<1x32xf32>
    %17 = vector.broadcast %16 : vector<1x32xf32> to vector<64x32xf32>
    %18 = arith.mulf %14, %17 : vector<64x32xf32>
    %19 = arith.addf %10, %18 : vector<64x32xf32>
    %c8_i32 = arith.constant 8 : i32
    %20 = tpu.dynamic_rotate %4 by %c8_i32 dim 0 : vector<64x32xf32>, i32 -> vector<64x32xf32>
    %21 = vector.extract_strided_slice %6 {offsets = [0, 1], sizes = [64, 1], strides = [1, 1]} : vector<64x9xf32> to vector<64x1xf32>
    %22 = vector.broadcast %21 : vector<64x1xf32> to vector<64x32xf32>
    %23 = arith.mulf %20, %22 : vector<64x32xf32>
    %24 = vector.extract_strided_slice %5 {offsets = [1, 0], sizes = [1, 32], strides = [1, 1]} : vector<9x32xbf16> to vector<1x32xbf16>
    %25 = arith.extf %24 : vector<1x32xbf16> to vector<1x32xf32>
    %26 = vector.broadcast %25 : vector<1x32xf32> to vector<64x32xf32>
    %27 = arith.mulf %23, %26 : vector<64x32xf32>
    %28 = arith.addf %19, %27 : vector<64x32xf32>
    %c7_i32 = arith.constant 7 : i32
    %29 = tpu.dynamic_rotate %4 by %c7_i32 dim 0 : vector<64x32xf32>, i32 -> vector<64x32xf32>
    %30 = vector.extract_strided_slice %6 {offsets = [0, 2], sizes = [64, 1], strides = [1, 1]} : vector<64x9xf32> to vector<64x1xf32>
    %31 = vector.broadcast %30 : vector<64x1xf32> to vector<64x32xf32>
    %32 = arith.mulf %29, %31 : vector<64x32xf32>
    %33 = vector.extract_strided_slice %5 {offsets = [2, 0], sizes = [1, 32], strides = [1, 1]} : vector<9x32xbf16> to vector<1x32xbf16>
    %34 = arith.extf %33 : vector<1x32xbf16> to vector<1x32xf32>
    %35 = vector.broadcast %34 : vector<1x32xf32> to vector<64x32xf32>
    %36 = arith.mulf %32, %35 : vector<64x32xf32>
    %37 = arith.addf %28, %36 : vector<64x32xf32>
    %c1_i32 = arith.constant 1 : i32
    %38 = tpu.dynamic_rotate %4 by %c1_i32 dim 0 : vector<64x32xf32>, i32 -> vector<64x32xf32>
    %39 = vector.extract_strided_slice %6 {offsets = [0, 3], sizes = [64, 1], strides = [1, 1]} : vector<64x9xf32> to vector<64x1xf32>
    %40 = vector.broadcast %39 : vector<64x1xf32> to vector<64x32xf32>
    %41 = arith.mulf %38, %40 : vector<64x32xf32>
    %42 = vector.extract_strided_slice %5 {offsets = [3, 0], sizes = [1, 32], strides = [1, 1]} : vector<9x32xbf16> to vector<1x32xbf16>
    %43 = arith.extf %42 : vector<1x32xbf16> to vector<1x32xf32>
    %44 = vector.broadcast %43 : vector<1x32xf32> to vector<64x32xf32>
    %45 = arith.mulf %41, %44 : vector<64x32xf32>
    %46 = arith.addf %37, %45 : vector<64x32xf32>
    %c63_i32 = arith.constant 63 : i32
    %47 = tpu.dynamic_rotate %4 by %c63_i32 dim 0 : vector<64x32xf32>, i32 -> vector<64x32xf32>
    %48 = vector.extract_strided_slice %6 {offsets = [0, 5], sizes = [64, 1], strides = [1, 1]} : vector<64x9xf32> to vector<64x1xf32>
    %49 = vector.broadcast %48 : vector<64x1xf32> to vector<64x32xf32>
    %50 = arith.mulf %47, %49 : vector<64x32xf32>
    %51 = vector.extract_strided_slice %5 {offsets = [5, 0], sizes = [1, 32], strides = [1, 1]} : vector<9x32xbf16> to vector<1x32xbf16>
    %52 = arith.extf %51 : vector<1x32xbf16> to vector<1x32xf32>
    %53 = vector.broadcast %52 : vector<1x32xf32> to vector<64x32xf32>
    %54 = arith.mulf %50, %53 : vector<64x32xf32>
    %55 = arith.addf %46, %54 : vector<64x32xf32>
    %c57_i32 = arith.constant 57 : i32
    %56 = tpu.dynamic_rotate %4 by %c57_i32 dim 0 : vector<64x32xf32>, i32 -> vector<64x32xf32>
    %57 = vector.extract_strided_slice %6 {offsets = [0, 6], sizes = [64, 1], strides = [1, 1]} : vector<64x9xf32> to vector<64x1xf32>
    %58 = vector.broadcast %57 : vector<64x1xf32> to vector<64x32xf32>
    %59 = arith.mulf %56, %58 : vector<64x32xf32>
    %60 = vector.extract_strided_slice %5 {offsets = [6, 0], sizes = [1, 32], strides = [1, 1]} : vector<9x32xbf16> to vector<1x32xbf16>
    %61 = arith.extf %60 : vector<1x32xbf16> to vector<1x32xf32>
    %62 = vector.broadcast %61 : vector<1x32xf32> to vector<64x32xf32>
    %63 = arith.mulf %59, %62 : vector<64x32xf32>
    %64 = arith.addf %55, %63 : vector<64x32xf32>
    %c56_i32 = arith.constant 56 : i32
    %65 = tpu.dynamic_rotate %4 by %c56_i32 dim 0 : vector<64x32xf32>, i32 -> vector<64x32xf32>
    %66 = vector.extract_strided_slice %6 {offsets = [0, 7], sizes = [64, 1], strides = [1, 1]} : vector<64x9xf32> to vector<64x1xf32>
    %67 = vector.broadcast %66 : vector<64x1xf32> to vector<64x32xf32>
    %68 = arith.mulf %65, %67 : vector<64x32xf32>
    %69 = vector.extract_strided_slice %5 {offsets = [7, 0], sizes = [1, 32], strides = [1, 1]} : vector<9x32xbf16> to vector<1x32xbf16>
    %70 = arith.extf %69 : vector<1x32xbf16> to vector<1x32xf32>
    %71 = vector.broadcast %70 : vector<1x32xf32> to vector<64x32xf32>
    %72 = arith.mulf %68, %71 : vector<64x32xf32>
    %73 = arith.addf %64, %72 : vector<64x32xf32>
    %c55_i32 = arith.constant 55 : i32
    %74 = tpu.dynamic_rotate %4 by %c55_i32 dim 0 : vector<64x32xf32>, i32 -> vector<64x32xf32>
    %75 = vector.extract_strided_slice %6 {offsets = [0, 8], sizes = [64, 1], strides = [1, 1]} : vector<64x9xf32> to vector<64x1xf32>
    %76 = vector.broadcast %75 : vector<64x1xf32> to vector<64x32xf32>
    %77 = arith.mulf %74, %76 : vector<64x32xf32>
    %78 = vector.extract_strided_slice %5 {offsets = [8, 0], sizes = [1, 32], strides = [1, 1]} : vector<9x32xbf16> to vector<1x32xbf16>
    %79 = arith.extf %78 : vector<1x32xbf16> to vector<1x32xf32>
    %80 = vector.broadcast %79 : vector<1x32xf32> to vector<64x32xf32>
    %81 = arith.mulf %77, %80 : vector<64x32xf32>
    %82 = arith.addf %73, %81 : vector<64x32xf32>
    %83 = arith.truncf %82 : vector<64x32xf32> to vector<64x32xbf16>
    %c0_8 = arith.constant 0 : index
    %c0_9 = arith.constant 0 : index
    %c0_10 = arith.constant 0 : index
    %84 = vector.load %arg5[%c0_8, %c0_9, %c0_10] : memref<1x64x32xbf16, #tpu.memory_space<vmem>>, vector<1x64x32xbf16>
    %85 = vector.shape_cast %84 : vector<1x64x32xbf16> to vector<64x32xbf16>
    %86 = vector.shape_cast %83 : vector<64x32xbf16> to vector<1x64x32xbf16>
    tpu.vector_store %arg5[%c0_8, %c0_9, %c0_10], %86 {strides = array<i32>} : memref<1x64x32xbf16, #tpu.memory_space<vmem>>, vector<1x64x32xbf16>,
    return
  }
  func.func @transform_0(%arg0: i32) -> (i32, i32, i32) {
    %c0_i32 = arith.constant 0 : i32
    %c0_i32_0 = arith.constant 0 : i32
    %c0_i32_1 = arith.constant 0 : i32
    return %arg0, %c0_i32, %c0_i32_0 : i32, i32, i32
  }
  func.func @transform_1(%arg0: i32) -> (i32, i32) {
    %c0_i32 = arith.constant 0 : i32
    %c0_i32_0 = arith.constant 0 : i32
    %c0_i32_1 = arith.constant 0 : i32
    return %c0_i32, %c0_i32_0 : i32, i32
  }
  func.func @transform_2(%arg0: i32) -> (i32, i32) {
    %c0_i32 = arith.constant 0 : i32
    %c0_i32_0 = arith.constant 0 : i32
    %c0_i32_1 = arith.constant 0 : i32
    return %c0_i32, %c0_i32_0 : i32, i32
  }
  func.func @transform_3(%arg0: i32) -> (i32, i32) {
    %c0_i32 = arith.constant 0 : i32
    %c0_i32_0 = arith.constant 0 : i32
    %c0_i32_1 = arith.constant 0 : i32
    return %c0_i32, %c0_i32_0 : i32, i32
  }
  func.func @transform_4(%arg0: i32) -> (i32, i32, i32) {
    %c0_i32 = arith.constant 0 : i32
    %c0_i32_0 = arith.constant 0 : i32
    %c0_i32_1 = arith.constant 0 : i32
    return %arg0, %c0_i32, %c0_i32_0 : i32, i32, i32
  }
}

module attributes {stable_mosaic.version = 11 : i64} {
  func.func @kernel(%arg0: i32, %arg1: memref<1x64x16xf32, #tpu.memory_space<vmem>>, %arg2: memref<16x16xbf16, #tpu.memory_space<vmem>>, %arg3: memref<9x16xbf16, #tpu.memory_space<vmem>>, %arg4: memref<64x9xf32, #tpu.memory_space<vmem>>, %arg5: memref<1x64x16xbf16, #tpu.memory_space<vmem>>) attributes {dimension_semantics = [#tpu.dimension_semantics<parallel>], iteration_bounds = array<i64: 2>, scalar_prefetch = 0 : i64, scratch_operands = 0 : i64, tpu.core_type = #tpu.core_type<tc>, window_params = [{transform_indices = @transform_0, window_bounds = array<i64: 1, 64, 16>}, {pipeline_mode = #tpu.pipeline_mode<synchronous>, transform_indices = @transform_1, window_bounds = array<i64: 16, 16>}, {pipeline_mode = #tpu.pipeline_mode<synchronous>, transform_indices = @transform_2, window_bounds = array<i64: 9, 16>}, {pipeline_mode = #tpu.pipeline_mode<synchronous>, transform_indices = @transform_3, window_bounds = array<i64: 64, 9>}, {transform_indices = @transform_4, window_bounds = array<i64: 1, 64, 16>}]} {
    %c0 = arith.constant 0 : index
    %c0_0 = arith.constant 0 : index
    %c0_1 = arith.constant 0 : index
    %0 = vector.load %arg1[%c0, %c0_0, %c0_1] : memref<1x64x16xf32, #tpu.memory_space<vmem>>, vector<1x64x16xf32>
    %1 = vector.shape_cast %0 : vector<1x64x16xf32> to vector<64x16xf32>
    %2 = arith.truncf %1 : vector<64x16xf32> to vector<64x16xbf16>
    %c0_2 = arith.constant 0 : index
    %c0_3 = arith.constant 0 : index
    %3 = vector.load %arg2[%c0_2, %c0_3] : memref<16x16xbf16, #tpu.memory_space<vmem>>, vector<16x16xbf16>
    %cst = arith.constant dense<0.000000e+00> : vector<64x16xf32>
    %4 = tpu.matmul %2, %3, %cst {dimension_numbers = #tpu.dot_dimension_numbers<[1], [0], [0], [1], [0, 0, 1, 1], [], []>} : vector<64x16xbf16>, vector<16x16xbf16>, vector<64x16xf32> -> vector<64x16xf32>
    %c0_4 = arith.constant 0 : index
    %c0_5 = arith.constant 0 : index
    %5 = vector.load %arg3[%c0_4, %c0_5] : memref<9x16xbf16, #tpu.memory_space<vmem>>, vector<9x16xbf16>
    %c0_6 = arith.constant 0 : index
    %c0_7 = arith.constant 0 : index
    %6 = vector.load %arg4[%c0_6, %c0_7] : memref<64x9xf32, #tpu.memory_space<vmem>>, vector<64x9xf32>
    %7 = vector.extract_strided_slice %5 {offsets = [4, 0], sizes = [1, 16], strides = [1, 1]} : vector<9x16xbf16> to vector<1x16xbf16>
    %8 = arith.extf %7 : vector<1x16xbf16> to vector<1x16xf32>
    %9 = vector.broadcast %8 : vector<1x16xf32> to vector<64x16xf32>
    %10 = arith.mulf %4, %9 : vector<64x16xf32>
    %c9_i32 = arith.constant 9 : i32
    %11 = tpu.dynamic_rotate %4 by %c9_i32 dim 0 : vector<64x16xf32>, i32 -> vector<64x16xf32>
    %12 = vector.extract_strided_slice %6 {offsets = [0, 0], sizes = [64, 1], strides = [1, 1]} : vector<64x9xf32> to vector<64x1xf32>
    %13 = vector.broadcast %12 : vector<64x1xf32> to vector<64x16xf32>
    %14 = arith.mulf %11, %13 : vector<64x16xf32>
    %15 = vector.extract_strided_slice %5 {offsets = [0, 0], sizes = [1, 16], strides = [1, 1]} : vector<9x16xbf16> to vector<1x16xbf16>
    %16 = arith.extf %15 : vector<1x16xbf16> to vector<1x16xf32>
    %17 = vector.broadcast %16 : vector<1x16xf32> to vector<64x16xf32>
    %18 = arith.mulf %14, %17 : vector<64x16xf32>
    %19 = arith.addf %10, %18 : vector<64x16xf32>
    %c8_i32 = arith.constant 8 : i32
    %20 = tpu.dynamic_rotate %4 by %c8_i32 dim 0 : vector<64x16xf32>, i32 -> vector<64x16xf32>
    %21 = vector.extract_strided_slice %6 {offsets = [0, 1], sizes = [64, 1], strides = [1, 1]} : vector<64x9xf32> to vector<64x1xf32>
    %22 = vector.broadcast %21 : vector<64x1xf32> to vector<64x16xf32>
    %23 = arith.mulf %20, %22 : vector<64x16xf32>
    %24 = vector.extract_strided_slice %5 {offsets = [1, 0], sizes = [1, 16], strides = [1, 1]} : vector<9x16xbf16> to vector<1x16xbf16>
    %25 = arith.extf %24 : vector<1x16xbf16> to vector<1x16xf32>
    %26 = vector.broadcast %25 : vector<1x16xf32> to vector<64x16xf32>
    %27 = arith.mulf %23, %26 : vector<64x16xf32>
    %28 = arith.addf %19, %27 : vector<64x16xf32>
    %c7_i32 = arith.constant 7 : i32
    %29 = tpu.dynamic_rotate %4 by %c7_i32 dim 0 : vector<64x16xf32>, i32 -> vector<64x16xf32>
    %30 = vector.extract_strided_slice %6 {offsets = [0, 2], sizes = [64, 1], strides = [1, 1]} : vector<64x9xf32> to vector<64x1xf32>
    %31 = vector.broadcast %30 : vector<64x1xf32> to vector<64x16xf32>
    %32 = arith.mulf %29, %31 : vector<64x16xf32>
    %33 = vector.extract_strided_slice %5 {offsets = [2, 0], sizes = [1, 16], strides = [1, 1]} : vector<9x16xbf16> to vector<1x16xbf16>
    %34 = arith.extf %33 : vector<1x16xbf16> to vector<1x16xf32>
    %35 = vector.broadcast %34 : vector<1x16xf32> to vector<64x16xf32>
    %36 = arith.mulf %32, %35 : vector<64x16xf32>
    %37 = arith.addf %28, %36 : vector<64x16xf32>
    %c1_i32 = arith.constant 1 : i32
    %38 = tpu.dynamic_rotate %4 by %c1_i32 dim 0 : vector<64x16xf32>, i32 -> vector<64x16xf32>
    %39 = vector.extract_strided_slice %6 {offsets = [0, 3], sizes = [64, 1], strides = [1, 1]} : vector<64x9xf32> to vector<64x1xf32>
    %40 = vector.broadcast %39 : vector<64x1xf32> to vector<64x16xf32>
    %41 = arith.mulf %38, %40 : vector<64x16xf32>
    %42 = vector.extract_strided_slice %5 {offsets = [3, 0], sizes = [1, 16], strides = [1, 1]} : vector<9x16xbf16> to vector<1x16xbf16>
    %43 = arith.extf %42 : vector<1x16xbf16> to vector<1x16xf32>
    %44 = vector.broadcast %43 : vector<1x16xf32> to vector<64x16xf32>
    %45 = arith.mulf %41, %44 : vector<64x16xf32>
    %46 = arith.addf %37, %45 : vector<64x16xf32>
    %c63_i32 = arith.constant 63 : i32
    %47 = tpu.dynamic_rotate %4 by %c63_i32 dim 0 : vector<64x16xf32>, i32 -> vector<64x16xf32>
    %48 = vector.extract_strided_slice %6 {offsets = [0, 5], sizes = [64, 1], strides = [1, 1]} : vector<64x9xf32> to vector<64x1xf32>
    %49 = vector.broadcast %48 : vector<64x1xf32> to vector<64x16xf32>
    %50 = arith.mulf %47, %49 : vector<64x16xf32>
    %51 = vector.extract_strided_slice %5 {offsets = [5, 0], sizes = [1, 16], strides = [1, 1]} : vector<9x16xbf16> to vector<1x16xbf16>
    %52 = arith.extf %51 : vector<1x16xbf16> to vector<1x16xf32>
    %53 = vector.broadcast %52 : vector<1x16xf32> to vector<64x16xf32>
    %54 = arith.mulf %50, %53 : vector<64x16xf32>
    %55 = arith.addf %46, %54 : vector<64x16xf32>
    %c57_i32 = arith.constant 57 : i32
    %56 = tpu.dynamic_rotate %4 by %c57_i32 dim 0 : vector<64x16xf32>, i32 -> vector<64x16xf32>
    %57 = vector.extract_strided_slice %6 {offsets = [0, 6], sizes = [64, 1], strides = [1, 1]} : vector<64x9xf32> to vector<64x1xf32>
    %58 = vector.broadcast %57 : vector<64x1xf32> to vector<64x16xf32>
    %59 = arith.mulf %56, %58 : vector<64x16xf32>
    %60 = vector.extract_strided_slice %5 {offsets = [6, 0], sizes = [1, 16], strides = [1, 1]} : vector<9x16xbf16> to vector<1x16xbf16>
    %61 = arith.extf %60 : vector<1x16xbf16> to vector<1x16xf32>
    %62 = vector.broadcast %61 : vector<1x16xf32> to vector<64x16xf32>
    %63 = arith.mulf %59, %62 : vector<64x16xf32>
    %64 = arith.addf %55, %63 : vector<64x16xf32>
    %c56_i32 = arith.constant 56 : i32
    %65 = tpu.dynamic_rotate %4 by %c56_i32 dim 0 : vector<64x16xf32>, i32 -> vector<64x16xf32>
    %66 = vector.extract_strided_slice %6 {offsets = [0, 7], sizes = [64, 1], strides = [1, 1]} : vector<64x9xf32> to vector<64x1xf32>
    %67 = vector.broadcast %66 : vector<64x1xf32> to vector<64x16xf32>
    %68 = arith.mulf %65, %67 : vector<64x16xf32>
    %69 = vector.extract_strided_slice %5 {offsets = [7, 0], sizes = [1, 16], strides = [1, 1]} : vector<9x16xbf16> to vector<1x16xbf16>
    %70 = arith.extf %69 : vector<1x16xbf16> to vector<1x16xf32>
    %71 = vector.broadcast %70 : vector<1x16xf32> to vector<64x16xf32>
    %72 = arith.mulf %68, %71 : vector<64x16xf32>
    %73 = arith.addf %64, %72 : vector<64x16xf32>
    %c55_i32 = arith.constant 55 : i32
    %74 = tpu.dynamic_rotate %4 by %c55_i32 dim 0 : vector<64x16xf32>, i32 -> vector<64x16xf32>
    %75 = vector.extract_strided_slice %6 {offsets = [0, 8], sizes = [64, 1], strides = [1, 1]} : vector<64x9xf32> to vector<64x1xf32>
    %76 = vector.broadcast %75 : vector<64x1xf32> to vector<64x16xf32>
    %77 = arith.mulf %74, %76 : vector<64x16xf32>
    %78 = vector.extract_strided_slice %5 {offsets = [8, 0], sizes = [1, 16], strides = [1, 1]} : vector<9x16xbf16> to vector<1x16xbf16>
    %79 = arith.extf %78 : vector<1x16xbf16> to vector<1x16xf32>
    %80 = vector.broadcast %79 : vector<1x16xf32> to vector<64x16xf32>
    %81 = arith.mulf %77, %80 : vector<64x16xf32>
    %82 = arith.addf %73, %81 : vector<64x16xf32>
    %83 = arith.truncf %82 : vector<64x16xf32> to vector<64x16xbf16>
    %c0_8 = arith.constant 0 : index
    %c0_9 = arith.constant 0 : index
    %c0_10 = arith.constant 0 : index
    %84 = vector.load %arg5[%c0_8, %c0_9, %c0_10] : memref<1x64x16xbf16, #tpu.memory_space<vmem>>, vector<1x64x16xbf16>
    %85 = vector.shape_cast %84 : vector<1x64x16xbf16> to vector<64x16xbf16>
    %86 = vector.shape_cast %83 : vector<64x16xbf16> to vector<1x64x16xbf16>
    tpu.vector_store %arg5[%c0_8, %c0_9, %c0_10], %86 {strides = array<i32>} : memref<1x64x16xbf16, #tpu.memory_space<vmem>>, vector<1x64x16xbf16>,
    return
  }
  func.func @transform_0(%arg0: i32) -> (i32, i32, i32) {
    %c0_i32 = arith.constant 0 : i32
    %c0_i32_0 = arith.constant 0 : i32
    %c0_i32_1 = arith.constant 0 : i32
    return %arg0, %c0_i32, %c0_i32_0 : i32, i32, i32
  }
  func.func @transform_1(%arg0: i32) -> (i32, i32) {
    %c0_i32 = arith.constant 0 : i32
    %c0_i32_0 = arith.constant 0 : i32
    %c0_i32_1 = arith.constant 0 : i32
    return %c0_i32, %c0_i32_0 : i32, i32
  }
  func.func @transform_2(%arg0: i32) -> (i32, i32) {
    %c0_i32 = arith.constant 0 : i32
    %c0_i32_0 = arith.constant 0 : i32
    %c0_i32_1 = arith.constant 0 : i32
    return %c0_i32, %c0_i32_0 : i32, i32
  }
  func.func @transform_3(%arg0: i32) -> (i32, i32) {
    %c0_i32 = arith.constant 0 : i32
    %c0_i32_0 = arith.constant 0 : i32
    %c0_i32_1 = arith.constant 0 : i32
    return %c0_i32, %c0_i32_0 : i32, i32
  }
  func.func @transform_4(%arg0: i32) -> (i32, i32, i32) {
    %c0_i32 = arith.constant 0 : i32
    %c0_i32_0 = arith.constant 0 : i32
    %c0_i32_1 = arith.constant 0 : i32
    return %arg0, %c0_i32, %c0_i32_0 : i32, i32, i32
  }
}

module attributes {stable_mosaic.version = 11 : i64} {
  func.func @kernel(%arg0: i32, %arg1: i32, %arg2: memref<2xf32, #tpu.memory_space<smem>>, %arg3: memref<1x64x16xbf16, #tpu.memory_space<vmem>>, %arg4: memref<1x64x32xbf16, #tpu.memory_space<vmem>>, %arg5: memref<16x16xbf16, #tpu.memory_space<vmem>>, %arg6: memref<1x64x16xf32, #tpu.memory_space<vmem>>) attributes {dimension_semantics = [#tpu.dimension_semantics<parallel>, #tpu.dimension_semantics<parallel>], iteration_bounds = array<i64: 2, 1>, scalar_prefetch = 0 : i64, scratch_operands = 0 : i64, tpu.core_type = #tpu.core_type<tc>, window_params = [{transform_indices = @transform_0, window_bounds = array<i64: 2>}, {transform_indices = @transform_1, window_bounds = array<i64: 1, 64, 16>}, {transform_indices = @transform_2, window_bounds = array<i64: 1, 64, 32>}, {pipeline_mode = #tpu.pipeline_mode<synchronous>, transform_indices = @transform_3, window_bounds = array<i64: 16, 16>}, {transform_indices = @transform_4, window_bounds = array<i64: 1, 64, 16>}]} {
    %cst = arith.constant 0.000000e+00 : f32
    %0 = vector.broadcast %cst : f32 to vector<64x16xf32>
    %c0 = arith.constant 0 : index
    %c0_0 = arith.constant 0 : index
    %c0_1 = arith.constant 0 : index
    %1 = vector.load %arg3[%c0, %c0_0, %c0_1] : memref<1x64x16xbf16, #tpu.memory_space<vmem>>, vector<1x64x8xbf16>
    %2 = vector.shape_cast %1 : vector<1x64x8xbf16> to vector<64x8xbf16>
    %3 = arith.extf %2 : vector<64x8xbf16> to vector<64x8xf32>
    %c0_2 = arith.constant 0 : index
    %c0_3 = arith.constant 0 : index
    %c0_4 = arith.constant 0 : index
    %4 = vector.load %arg4[%c0_2, %c0_3, %c0_4] : memref<1x64x32xbf16, #tpu.memory_space<vmem>>, vector<1x64x8xbf16>
    %5 = vector.shape_cast %4 : vector<1x64x8xbf16> to vector<64x8xbf16>
    %6 = arith.extf %5 : vector<64x8xbf16> to vector<64x8xf32>
    %c0_5 = arith.constant 0 : index
    %c0_6 = arith.constant 0 : index
    %c16 = arith.constant 16 : index
    %7 = vector.load %arg4[%c0_5, %c0_6, %c16] : memref<1x64x32xbf16, #tpu.memory_space<vmem>>, vector<1x64x8xbf16>
    %8 = vector.shape_cast %7 : vector<1x64x8xbf16> to vector<64x8xbf16>
    %9 = arith.mulf %3, %3 : vector<64x8xf32>
    %cst_7 = arith.constant dense<0.000000e+00> : vector<64xf32>
    %10 = vector.multi_reduction <add>, %9, %cst_7 [1] : vector<64x8xf32> to vector<64xf32>
    %11 = vector.shape_cast %10 : vector<64xf32> to vector<64x1xf32>
    %cst_8 = arith.constant 1.000000e-24 : f32
    %12 = vector.broadcast %cst_8 : f32 to vector<64x1xf32>
    %13 = arith.maximumf %11, %12 : vector<64x1xf32>
    %14 = math.rsqrt %13 : vector<64x1xf32>
    %15 = vector.broadcast %14 : vector<64x1xf32> to vector<64x8xf32>
    %16 = arith.mulf %3, %15 : vector<64x8xf32>
    %17 = arith.mulf %6, %6 : vector<64x8xf32>
    %cst_9 = arith.constant dense<0.000000e+00> : vector<64xf32>
    %18 = vector.multi_reduction <add>, %17, %cst_9 [1] : vector<64x8xf32> to vector<64xf32>
    %19 = vector.shape_cast %18 : vector<64xf32> to vector<64x1xf32>
    %cst_10 = arith.constant 1.000000e-24 : f32
    %20 = vector.broadcast %cst_10 : f32 to vector<64x1xf32>
    %21 = arith.maximumf %19, %20 : vector<64x1xf32>
    %22 = math.rsqrt %21 : vector<64x1xf32>
    %23 = vector.broadcast %22 : vector<64x1xf32> to vector<64x8xf32>
    %24 = arith.mulf %6, %23 : vector<64x8xf32>
    %25 = arith.truncf %16 : vector<64x8xf32> to vector<64x8xbf16>
    %26 = arith.truncf %24 : vector<64x8xf32> to vector<64x8xbf16>
    %cst_11 = arith.constant dense<0.000000e+00> : vector<64x64xf32>
    %27 = tpu.matmul %25, %26, %cst_11 {dimension_numbers = #tpu.dot_dimension_numbers<[1], [1], [0], [0], [0, 0, 1, 0], [], []>} : vector<64x8xbf16>, vector<64x8xbf16>, vector<64x64xf32> -> vector<64x64xf32>
    %c0_12 = arith.constant 0 : index
    %28 = memref.load %arg2[%c0_12] : memref<2xf32, #tpu.memory_space<smem>>
    %29 = vector.broadcast %28 : f32 to vector<64x64xf32>
    %30 = arith.mulf %27, %29 : vector<64x64xf32>
    %cst_13 = arith.constant dense<0xFF800000> : vector<64xf32>
    %31 = vector.multi_reduction <maximumf>, %30, %cst_13 [1] : vector<64x64xf32> to vector<64xf32>
    %32 = vector.shape_cast %31 : vector<64xf32> to vector<64x1xf32>
    %33 = vector.broadcast %32 : vector<64x1xf32> to vector<64x64xf32>
    %34 = arith.subf %30, %33 : vector<64x64xf32>
    %35 = math.exp %34 : vector<64x64xf32>
    %cst_14 = arith.constant dense<0.000000e+00> : vector<64xf32>
    %36 = vector.multi_reduction <add>, %35, %cst_14 [1] : vector<64x64xf32> to vector<64xf32>
    %37 = vector.shape_cast %36 : vector<64xf32> to vector<64x1xf32>
    %38 = tpu.reciprocal %37 {approx = true} : vector<64x1xf32> -> vector<64x1xf32>
    %39 = vector.broadcast %38 : vector<64x1xf32> to vector<64x64xf32>
    %40 = arith.mulf %35, %39 : vector<64x64xf32>
    %41 = arith.truncf %40 : vector<64x64xf32> to vector<64x64xbf16>
    %cst_15 = arith.constant dense<0.000000e+00> : vector<64x8xf32>
    %42 = tpu.matmul %41, %8, %cst_15 {dimension_numbers = #tpu.dot_dimension_numbers<[1], [0], [0], [1], [0, 0, 1, 1], [], []>} : vector<64x64xbf16>, vector<64x8xbf16>, vector<64x8xf32> -> vector<64x8xf32>
    %43 = arith.truncf %42 : vector<64x8xf32> to vector<64x8xbf16>
    %c0_16 = arith.constant 0 : index
    %c0_17 = arith.constant 0 : index
    %44 = vector.load %arg5[%c0_16, %c0_17] : memref<16x16xbf16, #tpu.memory_space<vmem>>, vector<8x16xbf16>
    %cst_18 = arith.constant dense<0.000000e+00> : vector<64x16xf32>
    %45 = tpu.matmul %43, %44, %cst_18 {dimension_numbers = #tpu.dot_dimension_numbers<[1], [0], [0], [1], [0, 0, 1, 1], [], []>} : vector<64x8xbf16>, vector<8x16xbf16>, vector<64x16xf32> -> vector<64x16xf32>
    %46 = arith.addf %0, %45 : vector<64x16xf32>
    %c0_19 = arith.constant 0 : index
    %c0_20 = arith.constant 0 : index
    %c8 = arith.constant 8 : index
    %47 = vector.load %arg3[%c0_19, %c0_20, %c8] : memref<1x64x16xbf16, #tpu.memory_space<vmem>>, vector<1x64x8xbf16>
    %48 = vector.shape_cast %47 : vector<1x64x8xbf16> to vector<64x8xbf16>
    %49 = arith.extf %48 : vector<64x8xbf16> to vector<64x8xf32>
    %c0_21 = arith.constant 0 : index
    %c0_22 = arith.constant 0 : index
    %c8_23 = arith.constant 8 : index
    %50 = vector.load %arg4[%c0_21, %c0_22, %c8_23] : memref<1x64x32xbf16, #tpu.memory_space<vmem>>, vector<1x64x8xbf16>
    %51 = vector.shape_cast %50 : vector<1x64x8xbf16> to vector<64x8xbf16>
    %52 = arith.extf %51 : vector<64x8xbf16> to vector<64x8xf32>
    %c0_24 = arith.constant 0 : index
    %c0_25 = arith.constant 0 : index
    %c24 = arith.constant 24 : index
    %53 = vector.load %arg4[%c0_24, %c0_25, %c24] : memref<1x64x32xbf16, #tpu.memory_space<vmem>>, vector<1x64x8xbf16>
    %54 = vector.shape_cast %53 : vector<1x64x8xbf16> to vector<64x8xbf16>
    %55 = arith.mulf %49, %49 : vector<64x8xf32>
    %cst_26 = arith.constant dense<0.000000e+00> : vector<64xf32>
    %56 = vector.multi_reduction <add>, %55, %cst_26 [1] : vector<64x8xf32> to vector<64xf32>
    %57 = vector.shape_cast %56 : vector<64xf32> to vector<64x1xf32>
    %cst_27 = arith.constant 1.000000e-24 : f32
    %58 = vector.broadcast %cst_27 : f32 to vector<64x1xf32>
    %59 = arith.maximumf %57, %58 : vector<64x1xf32>
    %60 = math.rsqrt %59 : vector<64x1xf32>
    %61 = vector.broadcast %60 : vector<64x1xf32> to vector<64x8xf32>
    %62 = arith.mulf %49, %61 : vector<64x8xf32>
    %63 = arith.mulf %52, %52 : vector<64x8xf32>
    %cst_28 = arith.constant dense<0.000000e+00> : vector<64xf32>
    %64 = vector.multi_reduction <add>, %63, %cst_28 [1] : vector<64x8xf32> to vector<64xf32>
    %65 = vector.shape_cast %64 : vector<64xf32> to vector<64x1xf32>
    %cst_29 = arith.constant 1.000000e-24 : f32
    %66 = vector.broadcast %cst_29 : f32 to vector<64x1xf32>
    %67 = arith.maximumf %65, %66 : vector<64x1xf32>
    %68 = math.rsqrt %67 : vector<64x1xf32>
    %69 = vector.broadcast %68 : vector<64x1xf32> to vector<64x8xf32>
    %70 = arith.mulf %52, %69 : vector<64x8xf32>
    %71 = arith.truncf %62 : vector<64x8xf32> to vector<64x8xbf16>
    %72 = arith.truncf %70 : vector<64x8xf32> to vector<64x8xbf16>
    %cst_30 = arith.constant dense<0.000000e+00> : vector<64x64xf32>
    %73 = tpu.matmul %71, %72, %cst_30 {dimension_numbers = #tpu.dot_dimension_numbers<[1], [1], [0], [0], [0, 0, 1, 0], [], []>} : vector<64x8xbf16>, vector<64x8xbf16>, vector<64x64xf32> -> vector<64x64xf32>
    %c1 = arith.constant 1 : index
    %74 = memref.load %arg2[%c1] : memref<2xf32, #tpu.memory_space<smem>>
    %75 = vector.broadcast %74 : f32 to vector<64x64xf32>
    %76 = arith.mulf %73, %75 : vector<64x64xf32>
    %cst_31 = arith.constant dense<0xFF800000> : vector<64xf32>
    %77 = vector.multi_reduction <maximumf>, %76, %cst_31 [1] : vector<64x64xf32> to vector<64xf32>
    %78 = vector.shape_cast %77 : vector<64xf32> to vector<64x1xf32>
    %79 = vector.broadcast %78 : vector<64x1xf32> to vector<64x64xf32>
    %80 = arith.subf %76, %79 : vector<64x64xf32>
    %81 = math.exp %80 : vector<64x64xf32>
    %cst_32 = arith.constant dense<0.000000e+00> : vector<64xf32>
    %82 = vector.multi_reduction <add>, %81, %cst_32 [1] : vector<64x64xf32> to vector<64xf32>
    %83 = vector.shape_cast %82 : vector<64xf32> to vector<64x1xf32>
    %84 = tpu.reciprocal %83 {approx = true} : vector<64x1xf32> -> vector<64x1xf32>
    %85 = vector.broadcast %84 : vector<64x1xf32> to vector<64x64xf32>
    %86 = arith.mulf %81, %85 : vector<64x64xf32>
    %87 = arith.truncf %86 : vector<64x64xf32> to vector<64x64xbf16>
    %cst_33 = arith.constant dense<0.000000e+00> : vector<64x8xf32>
    %88 = tpu.matmul %87, %54, %cst_33 {dimension_numbers = #tpu.dot_dimension_numbers<[1], [0], [0], [1], [0, 0, 1, 1], [], []>} : vector<64x64xbf16>, vector<64x8xbf16>, vector<64x8xf32> -> vector<64x8xf32>
    %89 = arith.truncf %88 : vector<64x8xf32> to vector<64x8xbf16>
    %c8_34 = arith.constant 8 : index
    %c0_35 = arith.constant 0 : index
    %90 = vector.load %arg5[%c8_34, %c0_35] : memref<16x16xbf16, #tpu.memory_space<vmem>>, vector<8x16xbf16>
    %cst_36 = arith.constant dense<0.000000e+00> : vector<64x16xf32>
    %91 = tpu.matmul %89, %90, %cst_36 {dimension_numbers = #tpu.dot_dimension_numbers<[1], [0], [0], [1], [0, 0, 1, 1], [], []>} : vector<64x8xbf16>, vector<8x16xbf16>, vector<64x16xf32> -> vector<64x16xf32>
    %92 = arith.addf %46, %91 : vector<64x16xf32>
    %c0_37 = arith.constant 0 : index
    %c0_38 = arith.constant 0 : index
    %c0_39 = arith.constant 0 : index
    %93 = vector.load %arg6[%c0_37, %c0_38, %c0_39] : memref<1x64x16xf32, #tpu.memory_space<vmem>>, vector<1x64x16xf32>
    %94 = vector.shape_cast %93 : vector<1x64x16xf32> to vector<64x16xf32>
    %95 = vector.shape_cast %92 : vector<64x16xf32> to vector<1x64x16xf32>
    tpu.vector_store %arg6[%c0_37, %c0_38, %c0_39], %95 {strides = array<i32>} : memref<1x64x16xf32, #tpu.memory_space<vmem>>, vector<1x64x16xf32>,
    return
  }
  func.func @transform_0(%arg0: i32, %arg1: i32) -> i32 {
    %c0_i32 = arith.constant 0 : i32
    %c0_i32_0 = arith.constant 0 : i32
    return %c0_i32 : i32
  }
  func.func @transform_1(%arg0: i32, %arg1: i32) -> (i32, i32, i32) {
    %c0_i32 = arith.constant 0 : i32
    %c0_i32_0 = arith.constant 0 : i32
    return %arg0, %arg1, %c0_i32 : i32, i32, i32
  }
  func.func @transform_2(%arg0: i32, %arg1: i32) -> (i32, i32, i32) {
    %c0_i32 = arith.constant 0 : i32
    %c0_i32_0 = arith.constant 0 : i32
    %c0_i32_1 = arith.constant 0 : i32
    return %arg0, %c0_i32, %c0_i32_0 : i32, i32, i32
  }
  func.func @transform_3(%arg0: i32, %arg1: i32) -> (i32, i32) {
    %c0_i32 = arith.constant 0 : i32
    %c0_i32_0 = arith.constant 0 : i32
    %c0_i32_1 = arith.constant 0 : i32
    return %c0_i32, %c0_i32_0 : i32, i32
  }
  func.func @transform_4(%arg0: i32, %arg1: i32) -> (i32, i32, i32) {
    %c0_i32 = arith.constant 0 : i32
    %c0_i32_0 = arith.constant 0 : i32
    return %arg0, %arg1, %c0_i32 : i32, i32, i32
  }
}

</mosaic_0001>

<bundles_post_ra>
// kernel: _lambda_.4
= control target key start
LH: loop header
LB: loop body
LE: loop exit
PB: predicated region body
PF: predicated region fallthrough
CT: control target
= control target key end

     0   :  { %s1063_s15 = smov 0   ;;  %s1699_s0 = inlined_call_operand.vmem [shape: f32[2,64,8], index: 0, kind: input, shape index: {}]   ;;  %s1700_s1 = inlined_call_operand.vmem [shape: bf16[8,32], index: 1, kind: input, shape index: {}]   ;;  %s1701_s2 = inlined_call_operand.vmem [shape: bf16[9,32], index: 2, kind: input, shape index: {}]   ;;  %s1702_s3 = inlined_call_operand.vmem [shape: f32[64,9], index: 3, kind: input, shape index: {}]   ;;  %s1703_s4 = inlined_call_operand.vmem [shape: bf16[2,64,32], index: 4, kind: output, shape index: {}]  }
   0x1 LB: > { %s938_s16 = sadd.s32 4294967295, %s1028_s15   ;;  %p942_p0 = scmp.ge.s32.totalorder %s1028_s15, 1  ;;  %s1028_s15 = sphi %s1063_s15, %s14_s15  }
   0x2   : > { %p162_p1 = scmp.lt.s32.totalorder %s1028_s15, 3 }
   0x4   : > { %p163_p2 = pnand %p942_p0, %p162_p1 }
   0x6   : > { %166 = sbr.rel (%p163_p2) target bundleno = 307 (0x133), region = 36 }
   0xd   : > { %v1074_v0 = vld [vmem:[%s1702_s3 + $0x10] sm:$0xff]  ;;  %v211_v1 = vld [vmem:[%s1700_s1] sm:$0xf]  ;;  %vm225_vm0 = vcmask 1043456   ;;  %v1030_v2 = vmov 0   ;;  %p188_p3 = scmp.lt.s32.totalorder %s938_s16, 1 }
   0xe   : > { %1007 = vset.pattern.permute.xlu1 %v1030_v2  ;;  %1006 = vset.pattern.permute.xlu0 %v1030_v2  ;;  %v1082_v3 = vld [vmem:[%s1702_s3] sm:$0xff]  ;;  %v227_v4 = vsel %vm225_vm0, %v211_v1, 0  ;;  %v1088_v5 = vld [vmem:[%s1702_s3 + $0x18] sm:$0xff]  ;;  %v1096_v6 = vld [vmem:[%s1702_s3 + $0x8] sm:$0xff]  ;;  %vm212_vm1 = vcmask 64512   ;;  %v1031_v23 = vmov 1  }
   0xf   : > { %348 = vperm.xlu1 %1007, %v1074_v0   ;;  %988 = vmatprep.subr.msk.bf16.mxu0 %vm225_vm0, %v211_v1  ;;  %s1797_s16 = smov (!%p188_p3, %s938_s16), 1  ;;  %v1106_v7 = vld [vmem:[%s1702_s3 + $0x28] sm:$0xff]  ;;  %v1112_v19 = vld [vmem:[%s1702_s3 + $0x20] sm:$0xff]  ;;  %v1121_v21 = vld [vmem:[%s1702_s3 + $0x38] sm:$0xff]  ;;  %v1032_v24 = vmov 2   ;;  %v1033_v25 = vmov 3  }
  0x10   : > { %989 = vmatprep.subr.msk.bf16.mxu1 %vm225_vm0, %v211_v1  ;;  %338 = vperm.xlu0 %1006, %v1082_v3   ;;  %s961_s27 = sshll.u32 %s1797_s16, 6  ;;  %v1128_v22 = vld [vmem:[%s1702_s3 + $0x30] sm:$0xff]  ;;  %v1034_v26 = vmov 5   ;;  %v1035_v27 = vmov 6   ;;  %v1036_v28 = vmov 7   ;;  %v1037_v29 = vmov 8  }
  0x11   : > { %977 = vmatpush3.bf16.msra.mxu0 %v227_v4  ;;  %987 = vmatpush3.bf16.msra.mxu1 %v227_v4  ;;  %s192_s30 = scalar_lea.vmem %s1699_s0, %s961_s27  ;;  %vm874_vm4 = vcmask 257024   ;;  %s962_s19 = sshll.u32 %s1797_s16, 5 }
  0x12   : > { %v199_v8 = vld [vmem:[%s192_s30] sm:$0xff]  ;;  %v200_v9 = vld [vmem:[%s192_s30 + $0x8] sm:$0xff]  ;;  %v201_v13 = vld [vmem:[%s192_s30 + $0x10] sm:$0xff]  ;;  %s1640_s16 = scalar_lea.vmem %s1703_s4, %s962_s19 }
  0x13   : > { %353 = vperm.xlu1 %1007, %v1088_v5   ;;  %v203_v10 = vld [vmem:[%s192_s30 + $0x20] sm:$0xff]  ;;  %v207_v11 = vpack.c.bf16 %v200_v9, %v199_v8  ;;  %v204_v12 = vld [vmem:[%s192_s30 + $0x28] sm:$0xff]  ;;  %v202_v14 = vld [vmem:[%s192_s30 + $0x18] sm:$0xff] }
  0x14   : > { %343 = vperm.xlu0 %1006, %v1096_v6   ;;  %v209_v15 = vpack.c.bf16 %v204_v12, %v203_v10  ;;  %v208_v16 = vpack.c.bf16 %v202_v14, %v201_v13  ;;  %v205_v17 = vld [vmem:[%s192_s30 + $0x30] sm:$0xff]  ;;  %v206_v18 = vld [vmem:[%s192_s30 + $0x38] sm:$0xff]  ;;  %v294_v9 = vld [vmem:[%s1701_s2] sm:$0xf] }
  0x15   : > { %978 = vmatprep.mubr.msk.bf16.mxu0 %vm212_vm1, %v207_v11  ;;  %v210_v20 = vpack.c.bf16 %v206_v18, %v205_v17  ;;  %v304_v12 = vunpack.c.l.bf16 %v294_v9 }
  0x16   : > { %982 = vmatprep.mubr.msk.bf16.mxu1 %vm212_vm1, %v209_v15  ;;  %979 = vmatmul.mubr.msk.bf16.vlgmr.msra.gmra.mrb[0].mxu0 %vm212_vm1, %v208_v16  ;;  %v295_v15 = vld [vmem:[%s1701_s2 + $0x4] sm:$0x1] }
  0x17   : > { %363 = vperm.xlu1 %1007, %v1106_v7   ;;  %983 = vmatmul.mubr.msk.bf16.vlgmr.msra.gmra.mrb[0].mxu1 %vm212_vm1, %v210_v20 }
  0x18   : > { %358 = vperm.xlu0 %1006, %v1112_v19  }
  0x1b   : > { %373 = vperm.xlu1 %1007, %v1121_v21  }
  0x1c   : > { %368 = vperm.xlu0 %1006, %v1128_v22  }
  0x1f   : > { %1009 = vset.pattern.permute.xlu1 %v1031_v23 }
  0x20   : > { %409 = vperm.xlu1 %1009, %v1096_v6   ;;  %1008 = vset.pattern.permute.xlu0 %v1031_v23  ;;  %v821_v23 = vunpack.c.l.bf16 %v295_v15 }
  0x21   : > { %405 = vperm.xlu0 %1008, %v1082_v3  }
  0x24   : > { %413 = vperm.xlu1 %1009, %v1074_v0  }
  0x25   : > { %417 = vperm.xlu0 %1008, %v1088_v5  }
  0x28   : > { %421 = vperm.xlu1 %1009, %v1112_v19  }
  0x29   : > { %425 = vperm.xlu0 %1008, %v1106_v7  }
  0x2c   : > { %429 = vperm.xlu1 %1009, %v1128_v22  }
  0x2d   : > { %433 = vperm.xlu0 %1008, %v1121_v21  }
  0x30   : > { %1010 = vset.pattern.permute.xlu1 %v1032_v24 }
  0x31   : > { %482 = vperm.xlu1 %1010, %v1082_v3   ;;  %1011 = vset.pattern.permute.xlu0 %v1032_v24 }
  0x32   : > { %486 = vperm.xlu0 %1011, %v1096_v6  }
  0x35   : > { %490 = vperm.xlu1 %1010, %v1074_v0  }
  0x36   : > { %498 = vperm.xlu0 %1011, %v1112_v19  }
  0x39   : > { %494 = vperm.xlu1 %1010, %v1088_v5  }
  0x3a   : > { %506 = vperm.xlu0 %1011, %v1128_v22  }
  0x3d   : > { %502 = vperm.xlu1 %1010, %v1106_v7  }
  0x3e   : > { %1012 = vset.pattern.permute.xlu0 %v1033_v25 }
  0x3f   : > { %542 = vperm.xlu0 %1012, %v1082_v3  }
  0x41   : > { %510 = vperm.xlu1 %1010, %v1121_v21  }
  0x43   : > { %554 = vperm.xlu0 %1012, %v1088_v5  }
  0x45   : > { %1013 = vset.pattern.permute.xlu1 %v1033_v25 }
  0x46   : > { %546 = vperm.xlu1 %1013, %v1096_v6  }
  0x47   : > { %562 = vperm.xlu0 %1012, %v1106_v7  }
  0x4a   : > { %550 = vperm.xlu1 %1013, %v1074_v0  }
  0x4b   : > { %570 = vperm.xlu0 %1012, %v1121_v21  }
  0x4e   : > { %558 = vperm.xlu1 %1013, %v1112_v19  }
  0x4f   : > { %1015 = vset.pattern.permute.xlu0 %v1034_v26 }
  0x50   : > { %606 = vperm.xlu0 %1015, %v1096_v6  }
  0x52   : > { %566 = vperm.xlu1 %1013, %v1128_v22  }
  0x54   : > { %618 = vperm.xlu0 %1015, %v1112_v19  }
  0x56   : > { %1014 = vset.pattern.permute.xlu1 %v1034_v26 }
  0x57   : > { %602 = vperm.xlu1 %1014, %v1082_v3  }
  0x58   : > { %626 = vperm.xlu0 %1015, %v1128_v22  }
  0x5b   : > { %610 = vperm.xlu1 %1014, %v1074_v0  }
  0x5c   : > { %1016 = vset.pattern.permute.xlu0 %v1035_v27 }
  0x5d   : > { %662 = vperm.xlu0 %1016, %v1082_v3  }
  0x5f   : > { %614 = vperm.xlu1 %1014, %v1088_v5  }
  0x61   : > { %674 = vperm.xlu0 %1016, %v1088_v5  }
  0x63   : > { %622 = vperm.xlu1 %1014, %v1106_v7  }
  0x65   : > { %682 = vperm.xlu0 %1016, %v1106_v7  }
  0x67   : > { %630 = vperm.xlu1 %1014, %v1121_v21  }
  0x69   : > { %690 = vperm.xlu0 %1016, %v1121_v21  }
  0x6b   : > { %1017 = vset.pattern.permute.xlu1 %v1035_v27 }
  0x6c   : > { %666 = vperm.xlu1 %1017, %v1096_v6  }
  0x6d   : > { %1019 = vset.pattern.permute.xlu0 %v1036_v28 }
  0x6e   : > { %726 = vperm.xlu0 %1019, %v1096_v6  }
  0x70   : > { %670 = vperm.xlu1 %1017, %v1074_v0  }
  0x72   : > { %738 = vperm.xlu0 %1019, %v1112_v19  }
  0x74   : > { %678 = vperm.xlu1 %1017, %v1112_v19  }
  0x76   : > { %746 = vperm.xlu0 %1019, %v1128_v22  }
  0x78   : > { %686 = vperm.xlu1 %1017, %v1128_v22  }
  0x7a   : > { %1020 = vset.pattern.permute.xlu0 %v1037_v29 }
  0x7b   : > { %782 = vperm.xlu0 %1020, %v1082_v3  }
  0x7c   : > { %1018 = vset.pattern.permute.xlu1 %v1036_v28 }
  0x7d   : > { %722 = vperm.xlu1 %1018, %v1082_v3  }
  0x7f   : > { %794 = vperm.xlu0 %1020, %v1088_v5  }
  0x81   : > { %730 = vperm.xlu1 %1018, %v1074_v0  }
  0x83   : > { %802 = vperm.xlu0 %1020, %v1106_v7  }
  0x85   : > { %734 = vperm.xlu1 %1018, %v1088_v5   ;;  %v305_v5 = vlaneseq }
  0x87   : > { %810 = vperm.xlu0 %1020, %v1121_v21   ;;  %v1262_v8 = vshrl.u32 %v305_v5, 7 }
  0x89   : > { %742 = vperm.xlu1 %1018, %v1106_v7   ;;  %v307_v13 = vsub.s32 4, %v1262_v8  ;;  %v446_v14 = vsub.s32 1, %v1262_v8  ;;  %v386_v16 = vsub.s32 0, %v1262_v8  ;;  %v583_v17 = vsub.s32 3, %v1262_v8 }
  0x8a   : > { %v703_v18 = vsub.s32 6, %v1262_v8  ;;  %vm327_vm2 = vcmp.lt.s32.totalorder %v1262_v8, 1  ;;  %vm472_vm3 = vcmp.lt.s32.totalorder %v1262_v8, 7 }
  0x8b   : > { %v308_v25 = vrot.slane %v304_v12, %v307_v13  ;;  %v1286_v26 = vrot.slane %v304_v12, %v446_v14  ;;  %v1296_v9 = vrot.slane %v304_v12, %v386_v16 }
  0x8d   : > { %750 = vperm.xlu1 %1018, %v1121_v21   ;;  %v523_v21 = vsub.s32 2, %v1262_v8 }
  0x8e   : > { %v1184_v30 = vpop.permute.xlu1 %348 }
  0x8f   : > { %v1186_v31 = vpop.permute.xlu0 %338 }
  0x91   : > { %1021 = vset.pattern.permute.xlu1 %v1037_v29 }
  0x92   : > { %v1188_v32 = vpop.permute.xlu1 %353  ;;  %786 = vperm.xlu1 %1021, %v1096_v6  }
  0x93   : > { %v1191_v33 = vpop.permute.xlu0 %343 }
  0x96   : > { %v1193_v34 = vpop.permute.xlu1 %363  ;;  %790 = vperm.xlu1 %1021, %v1074_v0  }
  0x97   : > { %v1196_v35 = vpop.permute.xlu0 %358 }
  0x9a   : > { %v1198_v36 = vpop.permute.xlu1 %373  ;;  %798 = vperm.xlu1 %1021, %v1112_v19   ;;  %v763_v19 = vsub.s32 7, %v1262_v8 }
  0x9b   : > { %v1201_v37 = vpop.permute.xlu0 %368 }
  0x9e   : > { %806 = vperm.xlu1 %1021, %v1128_v22   ;;  %v643_v22 = vsub.s32 5, %v1262_v8 }
  0x9f   : > { %v410_v38 = vpop.permute.xlu1 %409 }
  0xa0   : > { %v1204_v39 = vpop.permute.xlu0 %405 }
  0xa3   : > { %v1206_v40 = vpop.permute.xlu1 %413 }
  0xa4   : > { %v418_v41 = vpop.permute.xlu0 %417 }
  0xa7   : > { %v1208_v42 = vpop.permute.xlu1 %421 }
  0xa8   : > { %v426_v43 = vpop.permute.xlu0 %425 }
  0xab   : > { %v1210_v44 = vpop.permute.xlu1 %429 }
  0xac   : > { %v434_v45 = vpop.permute.xlu0 %433 }
  0xb0   : > { %v1212_v46 = vpop.permute.xlu1 %482 }
  0xb1   : > { %1715 = vst [vmem:[#allocation2_spill] sm:$0xff] %v1212_v46  ;;  %v1214_v47 = vpop.permute.xlu0 %486 }
  0xb2   : > { %1716 = vst [vmem:[#allocation3_spill] sm:$0xff] %v1214_v47 }
  0xb4   : > { %v1216_v48 = vpop.permute.xlu1 %490 }
  0xb5   : > { %v1218_v49 = vpop.permute.xlu0 %498 }
  0xb6   : > { %1717 = vst [vmem:[#allocation4_spill] sm:$0xff] %v1218_v49 }
  0xb8   : > { %v1220_v50 = vpop.permute.xlu1 %494 }
  0xb9   : > { %1718 = vst [vmem:[#allocation5_spill] sm:$0xff] %v1220_v50  ;;  %v1222_v51 = vpop.permute.xlu0 %506 }
  0xba   : > { %1719 = vst [vmem:[#allocation6_spill] sm:$0xff] %v1222_v51 }
  0xbc   : > { %v1224_v52 = vpop.permute.xlu1 %502 }
  0xbd   : > { %1720 = vst [vmem:[#allocation7_spill] sm:$0xff] %v1224_v52 }
  0xbe   : > { %v1226_v53 = vpop.permute.xlu0 %542 }
  0xc0   : > { %v1228_v54 = vpop.permute.xlu1 %510 }
  0xc1   : > { %1721 = vst [vmem:[#allocation8_spill] sm:$0xff] %v1228_v54 }
  0xc2   : > { %v1230_v55 = vpop.permute.xlu0 %554 }
  0xc5   : > { %v1232_v56 = vpop.permute.xlu1 %546 }
  0xc6   : > { %v1234_v57 = vpop.permute.xlu0 %562 }
  0xc9   : > { %v1236_v58 = vpop.permute.xlu1 %550 }
  0xca   : > { %v1238_v59 = vpop.permute.xlu0 %570 }
  0xcd   : > { %v1240_v60 = vpop.permute.xlu1 %558 }
  0xcf   : > { %v1242_v61 = vpop.permute.xlu0 %606 }
  0xd1   : > { %v1244_v62 = vpop.permute.xlu1 %566 }
  0xd3   : > { %v1246_v63 = vpop.permute.xlu0 %618 }
  0xd4   : > { %1722 = vst [vmem:[#allocation9_spill] sm:$0xff] %v1246_v63 }
  0xd6   : > { %v1248_v0 = vpop.permute.xlu1 %602 }
  0xd7   : > { %1723 = vst [vmem:[#allocation10_spill] sm:$0xff] %v1248_v0  ;;  %v1250_v1 = vpop.permute.xlu0 %626 }
  0xd8   : > { %1724 = vst [vmem:[#allocation11_spill] sm:$0xff] %v1250_v1 }
  0xda   : > { %v1252_v2 = vpop.permute.xlu1 %610 }
  0xdb   : > { %1725 = vst [vmem:[#allocation12_spill] sm:$0xff] %v1252_v2  ;;  %v1317_v2 = vrot.slane %v304_v12, %v643_v22 }
  0xdc   : > { %v1254_v3 = vpop.permute.xlu0 %662 }
  0xdd   : > { %1733 = vst [vmem:[#allocation20_spill] sm:$0xff] %v1317_v2 }
  0xde   : > { %v1256_v4 = vpop.permute.xlu1 %614 }
  0xdf   : > { %1726 = vst [vmem:[#allocation13_spill] sm:$0xff] %v1256_v4 }
  0xe0   : > { %v1258_v6 = vpop.permute.xlu0 %674 }
  0xe2   : > { %v1260_v7 = vpop.permute.xlu1 %622 }
  0xe3   : > { %1727 = vst [vmem:[#allocation14_spill] sm:$0xff] %v1260_v7  ;;  %v1306_v7 = vrot.slane %v304_v12, %v703_v18 }
  0xe4   : > { %v1267_v10 = vpop.permute.xlu0 %682 }
  0xe6   : > { %v1269_v11 = vpop.permute.xlu1 %630 }
  0xe7   : > { %1728 = vst [vmem:[#allocation15_spill] sm:$0xff] %v1269_v11  ;;  %v1298_v11 = vrot.slane %v304_v12, %v583_v17  ;;  %v1315_v17 = vrot.slane %v304_v12, %v523_v21 }
  0xe8   : > { %v1280_v20 = vpop.permute.xlu0 %690 }
  0xe9   : > { %v1284_v24 = vpop.f32.mrb[0].mxu0  ;;  %1732 = vst [vmem:[#allocation19_spill] sm:$0xff] %v1315_v17 }
  0xea   : > { %v439_v28 = vmul.f32 %v1284_v24, %v418_v41  ;;  %v1291_v29 = vpop.f32.mrb[0].mxu1  ;;  %v1293_v5 = vpop.f32.mrb[1].mxu0  ;;  %v1308_v41 = vrot.slane %v304_v12, %v763_v19 }
  0xeb   : > { %v1288_v27 = vpop.permute.xlu1 %666  ;;  %1730 = vst [vmem:[#allocation17_spill] sm:$0xff] %v1293_v5  ;;  %v443_v15 = vmul.f32 %v1291_v29, %v434_v45  ;;  %v437_v13 = vmul.f32 %v410_v38, %v1293_v5  ;;  %v1302_v14 = vpop.f32.mrb[1].mxu1  ;;  %v1319_v45 = vrot.slane %v821_v23, %v386_v16  ;;  %v1322_v38 = vmul.f32 %v1284_v24, %v308_v25 }
  0xec   : > { %1729 = vst [vmem:[#allocation16_spill] sm:$0xff] %v1288_v27  ;;  %v1304_v46 = vpop.f32.mrb[2].mxu0  ;;  %v441_v51 = vmul.f32 %v426_v43, %v1302_v14  ;;  %v1311_v4 = vpop.f32.mrb[2].mxu1  ;;  %v319_v43 = vrot.slane %v1284_v24, 7  ;;  %v1331_v21 = vmul.f32 %v1286_v26, %v439_v28  ;;  %v1334_v12 = vmul.f32 %v1291_v29, %v308_v25 }
  0xed   : > { %1731 = vst [vmem:[#allocation18_spill] sm:$0xff] %v1304_v46  ;;  %v1313_v49 = vpop.f32.mrb[3].mxu0  ;;  %1734 = vst [vmem:[#allocation21_spill] sm:$0xff] %v1319_v45  ;;  %v440_v18 = vmul.f32 %v1304_v46, %v1208_v42  ;;  %v1326_v19 = vpop.f32.mrb[3].mxu1  ;;  %v1337_v16 = vmul.f32 %v308_v25, %v1293_v5  ;;  %v1341_v42 = vmul.f32 %v1286_v26, %v443_v15  ;;  %v324_v54 = vrot.slane %v1311_v4, 7 }
  0xee   : > { %1735 = vst [vmem:[#allocation22_spill] sm:$0xff] %v1331_v21  ;;  %v318_v22 = vrot.slane %v1313_v49, 7  ;;  %v727_v23 = vpop.permute.xlu0 %726  ;;  %v1344_v45 = vmul.f32 %v1286_v26, %v437_v13  ;;  %v313_v27 = vmul.f32 %v308_v25, %v1302_v14  ;;  %v1348_v28 = vmul.f32 %v1304_v46, %v308_v25 }
  0xef   : > { %v671_v50 = vpop.permute.xlu1 %670  ;;  %1736 = vst [vmem:[#allocation23_spill] sm:$0xff] %v1341_v42  ;;  %v1351_v21 = vmul.f32 %v1286_v26, %v441_v51  ;;  %v1354_v0 = vmul.f32 %v1311_v4, %v308_v25  ;;  %v436_v47 = vmul.f32 %v1311_v4, %v1204_v39  ;;  %v310_v15 = vmul.f32 %v308_v25, %v1313_v49 }
  0xf0   : > { %1737 = vst [vmem:[#allocation24_spill] sm:$0xff] %v1344_v45  ;;  %1738 = vst [vmem:[#allocation25_spill] sm:$0xff] %v1348_v28  ;;  %v1360_v1 = vmul.f32 %v1286_v26, %v440_v18  ;;  %v317_v13 = vrot.slane %v1293_v5, 7  ;;  %v320_v28 = vrot.slane %v1304_v46, 7  ;;  %v438_v51 = vmul.f32 %v1206_v40, %v1313_v49 }
  0xf1   : > { %1739 = vst [vmem:[#allocation26_spill] sm:$0xff] %v1354_v0  ;;  %v442_v39 = vmul.f32 %v1210_v44, %v1326_v19  ;;  %v1372_v0 = vsel %vm327_vm2, %v318_v22, %v319_v43  ;;  %v322_v18 = vrot.slane %v1326_v19, 7  ;;  %v321_v45 = vrot.slane %v1302_v14, 7 }
  0xf2   : > { %1740 = vst [vmem:[#allocation27_spill] sm:$0xff] %v1360_v1  ;;  %v334_v1 = vsel %vm327_vm2, %v317_v13, %v318_v22  ;;  %v335_v63 = vsel %vm327_vm2, %v324_v54, %v317_v13  ;;  %v332_v40 = vsel %vm327_vm2, %v319_v43, %v320_v28  ;;  %v739_v52 = vpop.permute.xlu0 %738  ;;  %v1388_v46 = vmul.f32 %v1286_v26, %v436_v47 }
  0xf3   : > { %v679_v42 = vpop.permute.xlu1 %678  ;;  %v377_v2 = vmul.f32 %v1191_v33, %v335_v63  ;;  %v573_v44 = vmul.f32 %v1226_v53, %v335_v63  ;;  %v1384_v5 = vmul.f32 %v1232_v56, %v334_v1  ;;  %v314_v22 = vmul.f32 %v308_v25, %v1326_v19 }
  0xf4   : > { %1741 = vst [vmem:[#allocation28_spill] sm:$0xff] %v1388_v46  ;;  %v380_v13 = vmul.f32 %v1196_v35, %v332_v40  ;;  %v1394_v43 = vmul.f32 %v1236_v58, %v1372_v0  ;;  %v450_v33 = vmul.f32 %v1286_v26, %v438_v51  ;;  %v1399_v53 = vmul.f32 %v1286_v26, %v442_v39 }
  0xf5   : > { %v1711_v56 = vrot.slane %v1326_v19, 1  ;;  %v389_v47 = vmul.f32 %v1296_v9, %v377_v2  ;;  %v700_v25 = vmul.f32 %v1280_v20, %v335_v63  ;;  %v1406_v35 = vmul.f32 %v1188_v32, %v1372_v0 }
  0xf6   : > { %1742 = vst [vmem:[#allocation29_spill] sm:$0xff] %v1394_v43  ;;  %v392_v58 = vmul.f32 %v1296_v9, %v380_v13  ;;  %v754_v46 = vmul.f32 %v1284_v24, %v727_v23  ;;  %v378_v43 = vmul.f32 %v1184_v30, %v334_v1  ;;  %v576_v26 = vmul.f32 %v1230_v55, %v332_v40  ;;  %v747_v23 = vpop.permute.xlu0 %746 }
  0xf7   : > { %v687_v17 = vpop.permute.xlu1 %686  ;;  %v1411_v51 = vadd.f32 %v389_v47, %v310_v15  ;;  %v330_v39 = vsel %vm327_vm2, %v321_v45, %v322_v18  ;;  %v1417_v2 = vmul.f32 %v1254_v3, %v334_v1  ;;  %v331_v32 = vsel %vm327_vm2, %v320_v28, %v321_v45 }
  0xf8   : > { %v1419_v63 = vadd.f32 %v392_v58, %v313_v27  ;;  %v382_v20 = vmul.f32 %v1201_v37, %v330_v39  ;;  %v1425_v30 = vmul.f32 %v1298_v11, %v573_v44  ;;  %v695_v15 = vmul.f32 %v671_v50, %v332_v40 }
  0xf9   : > { %1743 = vst [vmem:[#allocation30_spill] sm:$0xff] %v1417_v2  ;;  %v381_v55 = vmul.f32 %v1193_v34, %v331_v32  ;;  %v1429_v13 = vmul.f32 %v1240_v60, %v331_v32  ;;  %v1432_v1 = vmul.f32 %v1306_v7, %v700_v25  ;;  %v578_v27 = vmul.f32 %v1234_v57, %v330_v39 }
  0xfa   : > { %1744 = vst [vmem:[#allocation31_spill] sm:$0xff] %v1425_v30  ;;  %v394_v3 = vmul.f32 %v1296_v9, %v382_v20  ;;  %v323_v37 = vrot.slane %v1291_v29, 7  ;;  %v1438_v45 = vmul.f32 %v1298_v11, %v576_v26  ;;  %v1441_v50 = vmul.f32 %v1308_v41, %v754_v46 }
  0xfb   : > { %1745 = vst [vmem:[#allocation32_spill] sm:$0xff] %v1432_v1  ;;  %v393_v34 = vmul.f32 %v1296_v9, %v381_v55  ;;  %v697_v60 = vmul.f32 %v679_v42, %v330_v39  ;;  %v757_v40 = vmul.f32 %v739_v52, %v1326_v19  ;;  %v1453_v25 = vmul.f32 %v1306_v7, %v695_v15  ;;  %v1467_v39 = vpop.permute.xlu0 %782 }
  0xfc   : > { %v723_v47 = vpop.permute.xlu1 %722  ;;  %v1445_v28 = vadd.f32 %v394_v3, %v1334_v12  ;;  %v328_v44 = vsel %vm327_vm2, %v323_v37, %v324_v54  ;;  %v329_v57 = vsel %vm327_vm2, %v322_v18, %v323_v37  ;;  %v1460_v12 = vmul.f32 %v1298_v11, %v578_v27  ;;  %1746 = vst [vmem:[#allocation33_spill] sm:$0xff] %v1467_v39  ;;  %v1772_v39 = vld [vmem:[#allocation27_spill] sm:$0xff] }
  0xfd   : > { %v401_v58 = vadd.f32 %v393_v34, %v314_v22  ;;  %v376_v46 = vmul.f32 %v1186_v31, %v328_v44  ;;  %v1457_v26 = vmul.f32 %v1244_v62, %v329_v57  ;;  %v1463_v52 = vmul.f32 %v1258_v6, %v331_v32 }
  0xfe   : > { %v580_v54 = vmul.f32 %v1238_v59, %v328_v44  ;;  %v759_v18 = vmul.f32 %v1311_v4, %v747_v23  ;;  %v1470_v22 = vmul.f32 %v1306_v7, %v697_v60  ;;  %v390_v62 = vmul.f32 %v1296_v9, %v378_v43 }
  0xff   : > { %v388_v31 = vmul.f32 %v1296_v9, %v376_v46  ;;  %v1747_v20 = vrot.slane %v1284_v24, 1  ;;  %v1748_v15 = vrot.slane %v1313_v49, 1  ;;  %v1483_v59 = vmul.f32 %v1308_v41, %v757_v40  ;;  %v1752_v46 = vld [vmem:[#allocation19_spill] sm:$0xff] }
 0x100   : > { %v731_v42 = vpop.permute.xlu1 %730  ;;  %v383_v32 = vmul.f32 %v1198_v36, %v329_v57  ;;  %v1487_v23 = vmul.f32 %v723_v47, %v1313_v49  ;;  %v1495_v3 = vmul.f32 %v1267_v10, %v329_v57  ;;  %v699_v27 = vmul.f32 %v687_v17, %v328_v44  ;;  %v1753_v57 = vld [vmem:[#allocation18_spill] sm:$0xff] }
 0x101   : > { %v1480_v6 = vsel %vm472_vm3, %v1748_v15, %v1747_v20  ;;  %v1492_v43 = vadd.f32 %v388_v31, %v1337_v16  ;;  %v398_v37 = vadd.f32 %v390_v62, %v1322_v38  ;;  %v1499_v60 = vmul.f32 %v1298_v11, %v580_v54  ;;  %v1756_v15 = vld [vmem:[#allocation7_spill] sm:$0xff] }
 0x102   : > { %1749 = vst [vmem:[#allocation34_spill] sm:$0xff] %v1480_v6  ;;  %1750 = vst [vmem:[#allocation35_spill] sm:$0xff] %v1487_v23  ;;  %v515_v55 = vmul.f32 %v1216_v48, %v1480_v6  ;;  %v1502_v36 = vmul.f32 %v1308_v41, %v759_v18  ;;  %v634_v47 = vmul.f32 %v1242_v61, %v1480_v6  ;;  %v795_v48 = vpop.permute.xlu0 %794  ;;  %v468_v38 = vrot.slane %v1302_v14, 1  ;;  %v1764_v23 = vld [vmem:[#allocation11_spill] sm:$0xff] }
 0x103   : > { %v461_v16 = vadd.f32 %v1351_v21, %v401_v58  ;;  %v458_v40 = vadd.f32 %v450_v33, %v398_v37  ;;  %v755_v17 = vmul.f32 %v1753_v57, %v731_v42  ;;  %v395_v54 = vmul.f32 %v1296_v9, %v383_v32  ;;  %v1754_v33 = vld [vmem:[#allocation24_spill] sm:$0xff]  ;;  %v1755_v42 = vld [vmem:[#allocation17_spill] sm:$0xff] }
 0x104   : > { %v735_v34 = vpop.permute.xlu1 %734  ;;  %1751 = vst [vmem:[#allocation36_spill] sm:$0xff] %v1502_v36  ;;  %v527_v10 = vmul.f32 %v1752_v46, %v515_v55  ;;  %v1712_v31 = vrot.slane %v1311_v4, 1  ;;  %v475_v61 = vsel %vm472_vm3, %v468_v38, %v1711_v56  ;;  %v457_v58 = vadd.f32 %v1754_v33, %v1411_v51  ;;  %v1757_v55 = vld [vmem:[#allocation9_spill] sm:$0xff] }
 0x105   : > { %v756_v44 = vmul.f32 %v735_v34, %v1302_v14  ;;  %v1713_v20 = vrot.slane %v1755_v42, 1  ;;  %v1522_v14 = vmul.f32 %v1306_v7, %v699_v27  ;;  %v518_v32 = vmul.f32 %v1756_v15, %v475_v61 }
 0x106   : > { %v535_v62 = vadd.f32 %v527_v10, %v458_v40  ;;  %v637_v37 = vmul.f32 %v1757_v55, %v475_v61  ;;  %v816_v34 = vmul.f32 %v795_v48, %v475_v61  ;;  %v1758_v10 = vld [vmem:[#allocation26_spill] sm:$0xff]  ;;  %v1759_v56 = vrot.slane %v1291_v29, 1  ;;  %v1761_v48 = vld [vmem:[#allocation20_spill] sm:$0xff]  ;;  %v803_v55 = vpop.permute.xlu0 %802 }
 0x107   : > { %v403_v18 = vadd.f32 %v395_v54, %v1758_v10  ;;  %v1760_v33 = vrot.slane %v1313_v49, 1  ;;  %v646_v61 = vmul.f32 %v1761_v48, %v634_v47  ;;  %v1547_v54 = vmul.f32 %v1308_v41, %v756_v44  ;;  %v1763_v49 = vld [vmem:[#allocation8_spill] sm:$0xff]  ;;  %v1765_v47 = vld [vmem:[#allocation3_spill] sm:$0xff]  ;;  %v1766_v44 = vld [vmem:[#allocation10_spill] sm:$0xff] }
 0x108   : > { %v743_v21 = vpop.permute.xlu1 %742  ;;  %v473_v51 = vsel %vm472_vm3, %v1759_v56, %v1712_v31  ;;  %v530_v15 = vmul.f32 %v1752_v46, %v518_v32  ;;  %v1762_v56 = vld [vmem:[#allocation23_spill] sm:$0xff]  ;;  %v649_v32 = vmul.f32 %v1761_v48, %v637_v37 }
 0x109   : > { %v758_v40 = vmul.f32 %v1291_v29, %v743_v21  ;;  %v1540_v27 = vsel %vm472_vm3, %v1713_v20, %v1760_v33  ;;  %v1544_v21 = vmul.f32 %v1308_v41, %v755_v17  ;;  %v463_v10 = vadd.f32 %v1762_v56, %v403_v18  ;;  %v1768_v18 = vld [vmem:[#allocation21_spill] sm:$0xff] }
 0x10a   : > { %v520_v31 = vmul.f32 %v1763_v49, %v473_v51  ;;  %v639_v2 = vmul.f32 %v1764_v23, %v473_v51  ;;  %v818_v1 = vmul.f32 %v803_v55, %v473_v51  ;;  %v538_v20 = vadd.f32 %v530_v15, %v461_v16  ;;  %v1769_v49 = vld [vmem:[#allocation29_spill] sm:$0xff] }
 0x10b   : > { %v514_v36 = vmul.f32 %v1765_v47, %v1540_v27  ;;  %v586_v17 = vmul.f32 %v1298_v11, %v1384_v5  ;;  %v1559_v30 = vmul.f32 %v1766_v44, %v1540_v27  ;;  %v1563_v56 = vmul.f32 %v1768_v18, %v816_v34  ;;  %v1770_v44 = vld [vmem:[#allocation25_spill] sm:$0xff] }
 0x10c   : > { %v751_v33 = vpop.permute.xlu1 %750  ;;  %v1566_v23 = vmul.f32 %v1308_v41, %v758_v40  ;;  %v532_v16 = vmul.f32 %v1752_v46, %v520_v31  ;;  %v1570_v51 = vmul.f32 %v1761_v48, %v639_v2  ;;  %v391_v55 = vmul.f32 %v1296_v9, %v1406_v35 }
 0x10d   : > { %1767 = vst [vmem:[#allocation19_spill] sm:$0xff] %v1559_v30  ;;  %v1573_v15 = vmul.f32 %v751_v33, %v1755_v42  ;;  %v526_v5 = vmul.f32 %v1752_v46, %v514_v36  ;;  %v1581_v34 = vmul.f32 %v1768_v18, %v818_v1  ;;  %v467_v40 = vrot.slane %v1753_v57, 1  ;;  %v1771_v30 = vld [vmem:[#allocation16_spill] sm:$0xff] }
 0x10e   : > { %v1578_v37 = vadd.f32 %v532_v16, %v463_v10  ;;  %v587_v31 = vmul.f32 %v1298_v11, %v1769_v49  ;;  %v399_v33 = vadd.f32 %v391_v55, %v1770_v44  ;;  %v694_v36 = vmul.f32 %v1771_v30, %v1372_v0  ;;  %v1775_v49 = vld [vmem:[#allocation5_spill] sm:$0xff]  ;;  %v1776_v30 = vld [vmem:[#allocation12_spill] sm:$0xff] }
 0x10f   : > { %v534_v2 = vadd.f32 %v526_v5, %v457_v58  ;;  %v460_v9 = vadd.f32 %v1772_v39, %v1419_v63  ;;  %v1773_v35 = vrot.slane %v1284_v24, 1  ;;  %v476_v57 = vsel %vm472_vm3, %v467_v40, %v468_v38  ;;  %v1774_v5 = vld [vmem:[#allocation22_spill] sm:$0xff]  ;;  %v1777_v39 = vld [vmem:[#allocation4_spill] sm:$0xff] }
 0x110   : > { %v595_v10 = vadd.f32 %v587_v31, %v535_v62  ;;  %v589_v58 = vmul.f32 %v1298_v11, %v1429_v13  ;;  %v459_v55 = vadd.f32 %v1774_v5, %v399_v33  ;;  %v706_v63 = vmul.f32 %v1306_v7, %v694_v36 }
 0x111   : > { %v787_v47 = vpop.permute.xlu1 %786  ;;  %v477_v1 = vsel %vm472_vm3, %v1773_v35, %v467_v40  ;;  %v594_v16 = vadd.f32 %v586_v17, %v534_v2  ;;  %v517_v6 = vmul.f32 %v1777_v39, %v476_v57  ;;  %v1778_v35 = vld [vmem:[#allocation13_spill] sm:$0xff]  ;;  %v708_v17 = vmul.f32 %v1306_v7, %v1463_v52 }
 0x112   : > { %v516_v0 = vmul.f32 %v1775_v49, %v477_v1  ;;  %v635_v44 = vmul.f32 %v1776_v30, %v477_v1  ;;  %v814_v24 = vmul.f32 %v787_v47, %v477_v1  ;;  %v636_v62 = vmul.f32 %v1778_v35, %v476_v57 }
 0x113   : > { %v654_v40 = vadd.f32 %v646_v61, %v594_v16  ;;  %v529_v33 = vmul.f32 %v1752_v46, %v517_v6  ;;  %v1779_v52 = vrot.slane %v1291_v29, 1  ;;  %v1780_v30 = vrot.slane %v1326_v19, 1 }
 0x114   : > { %v528_v31 = vmul.f32 %v1752_v46, %v516_v0  ;;  %v647_v38 = vmul.f32 %v1761_v48, %v635_v44  ;;  %v827_v2 = vmul.f32 %v1768_v18, %v814_v24  ;;  %v648_v47 = vmul.f32 %v1761_v48, %v636_v62  ;;  %v1782_v24 = vld [vmem:[#allocation14_spill] sm:$0xff] }
 0x115   : > { %v791_v13 = vpop.permute.xlu1 %790  ;;  %v714_v49 = vadd.f32 %v706_v63, %v654_v40  ;;  %v462_v0 = vadd.f32 %v1399_v53, %v1445_v28  ;;  %v537_v61 = vadd.f32 %v529_v33, %v460_v9  ;;  %v474_v6 = vsel %vm472_vm3, %v1780_v30, %v1779_v52  ;;  %v1781_v28 = vld [vmem:[#allocation6_spill] sm:$0xff]  ;;  %v811_v33 = vpop.permute.xlu0 %810 }
 0x116   : > { %v815_v36 = vmul.f32 %v791_v13, %v476_v57  ;;  %v536_v1 = vadd.f32 %v528_v31, %v459_v55  ;;  %v655_v5 = vadd.f32 %v647_v38, %v595_v10  ;;  %v591_v57 = vmul.f32 %v1298_v11, %v1457_v26 }
 0x117   : > { %v774_v10 = vadd.f32 %v1441_v50, %v714_v49  ;;  %v519_v9 = vmul.f32 %v1781_v28, %v474_v6  ;;  %v597_v63 = vadd.f32 %v589_v58, %v537_v61  ;;  %v598_v29 = vadd.f32 %v1460_v12, %v538_v20  ;;  %v1783_v58 = vld [vmem:[#allocation28_spill] sm:$0xff]  ;;  %v1787_v61 = vld [vmem:[#allocation15_spill] sm:$0xff] }
 0x118   : > { %v828_v16 = vmul.f32 %v1768_v18, %v815_v36  ;;  %v596_v55 = vadd.f32 %v1438_v45, %v536_v1  ;;  %v715_v44 = vadd.f32 %v1453_v25, %v655_v5  ;;  %v638_v19 = vmul.f32 %v1782_v24, %v474_v6  ;;  %v1786_v5 = vld [vmem:[#allocation2_spill] sm:$0xff]  ;;  %v1790_v28 = vld [vmem:[#allocation19_spill] sm:$0xff] }
 0x119   : > { %v799_v53 = vpop.permute.xlu1 %798  ;;  %v710_v39 = vmul.f32 %v1306_v7, %v1495_v3  ;;  %v835_v35 = vadd.f32 %v827_v2, %v774_v10  ;;  %v531_v45 = vmul.f32 %v1752_v46, %v519_v9  ;;  %v657_v26 = vadd.f32 %v649_v32, %v597_v63  ;;  %v1791_v63 = vld [vmem:[#allocation31_spill] sm:$0xff] }
 0x11a   : > { %v656_v11 = vadd.f32 %v648_v47, %v596_v55  ;;  %v775_v50 = vadd.f32 %v1544_v21, %v715_v44  ;;  %v650_v25 = vmul.f32 %v1761_v48, %v638_v19  ;;  %v817_v62 = vmul.f32 %v799_v53, %v474_v6  ;;  %v1788_v44 = vld [vmem:[#allocation34_spill] sm:$0xff] }
 0x11b   : > { %v456_v31 = vadd.f32 %v1783_v58, %v1492_v43  ;;  %v964_v12 = vpack.c.bf16 %v835_v35, %v835_v35  ;;  %v539_v40 = vadd.f32 %v531_v45, %v462_v0  ;;  %v717_v21 = vadd.f32 %v1470_v22, %v657_v26 }
 0x11c   : > { %v716_v20 = vadd.f32 %v708_v17, %v656_v11  ;;  %v836_v38 = vadd.f32 %v828_v16, %v775_v50  ;;  %v658_v3 = vadd.f32 %v650_v25, %v598_v29  ;;  %v830_v32 = vmul.f32 %v1768_v18, %v817_v62  ;;  %v1792_v29 = vld [vmem:[#allocation36_spill] sm:$0xff]  ;;  %v1795_v11 = vld [vmem:[#allocation35_spill] sm:$0xff] }
 0x11d   : > { %v807_v13 = vpop.permute.xlu1 %806  ;;  %v1784_v2 = vrot.slane %v1755_v42, 1  ;;  %v1785_v43 = vrot.slane %v1311_v4, 1  ;;  %876 = vst.msk [vmem:[%s1640_s16 + $0x4] sm:$0xf] %vm874_vm4, %v964_v12  ;;  %v599_v1 = vadd.f32 %v591_v57, %v539_v40  ;;  %v777_v0 = vadd.f32 %v1483_v59, %v717_v21 }
 0x11e   : > { %v776_v47 = vadd.f32 %v1547_v54, %v716_v20  ;;  %v965_v36 = vpack.c.bf16 %v836_v38, %v836_v38  ;;  %v718_v22 = vadd.f32 %v710_v39, %v658_v3  ;;  %v600_v42 = vadd.f32 %v1499_v60, %v1578_v37  ;;  %v1794_v39 = vld [vmem:[#allocation30_spill] sm:$0xff] }
 0x11f   : > { %v480_v17 = vsel %vm472_vm3, %v1785_v43, %v1784_v2  ;;  %v659_v54 = vadd.f32 %v1570_v51, %v599_v1  ;;  %v820_v30 = vmul.f32 %v811_v33, %v1540_v27  ;;  %v838_v59 = vadd.f32 %v830_v32, %v777_v0 }
 0x120   : > { %v513_v49 = vmul.f32 %v1786_v5, %v480_v17  ;;  %v640_v4 = vmul.f32 %v1787_v61, %v480_v17  ;;  %v837_v8 = vadd.f32 %v1563_v56, %v776_v47  ;;  %877 = vst.msk [vmem:[%s1640_s16 + $0x8] sm:$0xf] %vm874_vm4, %v965_v36  ;;  %v819_v52 = vmul.f32 %v807_v13, %v480_v17 }
 0x121   : > { %v778_v6 = vadd.f32 %v1566_v23, %v718_v22  ;;  %v719_v56 = vadd.f32 %v1522_v14, %v659_v54  ;;  %v967_v55 = vpack.c.bf16 %v838_v59, %v838_v59  ;;  %v1789_v23 = vld [vmem:[#allocation33_spill] sm:$0xff]  ;;  %v645_v9 = vmul.f32 %v1761_v48, %v1790_v28 }
 0x122   : > { %v525_v16 = vmul.f32 %v1752_v46, %v513_v49  ;;  %v652_v60 = vmul.f32 %v1761_v48, %v640_v4  ;;  %v966_v37 = vpack.c.bf16 %v837_v8, %v837_v8  ;;  %v832_v10 = vmul.f32 %v1768_v18, %v819_v52 }
 0x123   : > { %v772_v46 = vmul.f32 %v1308_v41, %v1573_v15  ;;  %v839_v51 = vadd.f32 %v1581_v34, %v778_v6  ;;  %v813_v53 = vmul.f32 %v1789_v23, %v1788_v44  ;;  %v779_v24 = vadd.f32 %v1792_v29, %v719_v56  ;;  %879 = vst.msk [vmem:[%s1640_s16 + $0x10] sm:$0xf] %vm874_vm4, %v967_v55  ;;  %v1793_v15 = vld [vmem:[#allocation32_spill] sm:$0xff] }
 0x124   : > { %v533_v57 = vadd.f32 %v525_v16, %v456_v31  ;;  %v660_v27 = vadd.f32 %v652_v60, %v600_v42  ;;  %878 = vst.msk [vmem:[%s1640_s16 + $0xc] sm:$0xf] %vm874_vm4, %v966_v37  ;;  %v705_v35 = vmul.f32 %v1306_v7, %v1794_v39  ;;  %v765_v50 = vmul.f32 %v1308_v41, %v1795_v11 }
 0x125   : > { %v968_v19 = vpack.c.bf16 %v839_v51, %v839_v51  ;;  %v840_v45 = vadd.f32 %v832_v10, %v779_v24  ;;  %v833_v25 = vmul.f32 %v1768_v18, %v820_v30  ;;  %v826_v62 = vmul.f32 %v1768_v18, %v813_v53 }
 0x126   : > { %v593_v14 = vadd.f32 %v1791_v63, %v533_v57  ;;  %v720_v34 = vadd.f32 %v1793_v15, %v660_v27 }
 0x127   : > { %880 = vst.msk [vmem:[%s1640_s16 + $0x14] sm:$0xf] %vm874_vm4, %v968_v19  ;;  %v969_v31 = vpack.c.bf16 %v840_v45, %v840_v45 }
 0x128   : > { %v653_v48 = vadd.f32 %v645_v9, %v593_v14  ;;  %v780_v26 = vadd.f32 %v772_v46, %v720_v34 }
 0x129   : > { %881 = vst.msk [vmem:[%s1640_s16 + $0x18] sm:$0xf] %vm874_vm4, %v969_v31 }
 0x12a   : > { %v713_v58 = vadd.f32 %v705_v35, %v653_v48  ;;  %v841_v12 = vadd.f32 %v833_v25, %v780_v26 }
 0x12c   : > { %v773_v20 = vadd.f32 %v765_v50, %v713_v58  ;;  %v970_v7 = vpack.c.bf16 %v841_v12, %v841_v12 }
 0x12e   : > { %v834_v38 = vadd.f32 %v826_v62, %v773_v20  ;;  %882 = vst.msk [vmem:[%s1640_s16 + $0x1c] sm:$0xf] %vm874_vm4, %v970_v7 }
 0x130   : > { %v963_v41 = vpack.c.bf16 %v834_v38, %v834_v38 }
 0x132   : > { %875 = vst.msk [vmem:[%s1640_s16] sm:$0xf] %vm874_vm4, %v963_v41 }
 0x133 PF: > { %s14_s15 = sadd.s32 1, %s1028_s15  }
 0x134   : > { %p11_p4 = scmp.ge.s32.totalorder %s14_s15, 4  }
 0x136   :  { %13 = sbr.rel (!%p11_p4) target bundleno = 1 (0x1), region = 66 }

// kernel: _lambda_.3
= control target key start
LH: loop header
LB: loop body
LE: loop exit
PB: predicated region body
PF: predicated region fallthrough
CT: control target
= control target key end

     0   :  { %9 = vsyncpa [#allocation3], 0  ;;  %s1999_s0 = inlined_call_operand.hbm [shape: f32[2,64,16], index: 0, kind: input, shape index: {}]   ;;  %s2000_s1 = inlined_call_operand.vmem [shape: bf16[16,16], index: 1, kind: input, shape index: {}]   ;;  %s2001_s2 = inlined_call_operand.vmem [shape: bf16[9,16], index: 2, kind: input, shape index: {}]   ;;  %s2002_s3 = inlined_call_operand.hbm [shape: f32[64,9], index: 3, kind: input, shape index: {}]   ;;  %s2003_s4 = inlined_call_operand.vmem [shape: bf16[2,64,16], index: 4, kind: output, shape index: {}]  }
   0x1   :  { %11 = vsyncpa [#allocation3 + $0x1], 0 }
   0x2   :  { %12 = vsyncpa [#allocation5], 0  ;;  %s1264_s15 = smov 0   ;;  %s1266_s16 = smov 0  }
   0x3   :  { %s1268_s17 = smov 0   ;;  %s1270_s18 = smov 0  }
   0x4 LB: > { %s1283_s19 = sadd.s32 4294967295, %s1225_s18   ;;  %p38_p0 = scmp.ne.s32.totalorder %s1217_s16, %s1213_s15  ;;  %s1225_s18 = sphi %s1270_s18, %s2113_s18   ;;  %s1221_s17 = sphi %s1268_s17, %s2112_s17   ;;  %s1217_s16 = sphi %s1266_s16, %s2111_s16   ;;  %s1213_s15 = sphi %s1264_s15, %s2110_s15  }
   0x5   : > { %p2004_p1 = scmp.eq.s32.totalorder %s1283_s19, 0  ;;  %p999_p2 = scmp.ge.s32.totalorder %s1225_s18, 1 }
   0x6   : > { %p138_p3 = scmp.lt.s32.totalorder %s1225_s18, 3  ;;  %s1227_s22 = smov [#allocation4]  }
   0x7   : > { %p1291_p4 = por %p2004_p1, %p38_p0  ;;  %s156_s23 = sshll.u32 %s1227_s22, 4  ;;  %s157_s23 = int_to_ptr.vmem [resolvable:$true] %s156_s23 }
   0x8   : > { %p1295_p5 = pnand %p999_p2, %p138_p3  ;;  %s1308_s25 = sadd.s32 1, %s1225_s18  }
   0x9   : > { %s2020_s20 = scalar_select %p1291_p4, 1, 0 }
   0xa   : > { %s2021_s21 = scalar_select %p1295_p5, 1, 0 }
   0xb   : > { %p1058_p6 = pneg %p1295_p5  ;;  %s25_s26 = sadd.s32 1, %s1221_s17 }
   0xc   : > { %s22_s27 = ssub.s32 %s1225_s18, %s1308_s25  ;;  %s1129_s30 = scalar_lea.hbm %s2002_s3, 1024 }
   0xd   : > { %p1303_p7 = pnand %p1058_p6, %p2004_p1  ;;  %p1130_p8 = scmp.ne.s32.totalorder %s2002_s3, %s1129_s30 }
   0xe   : > { %p1136_p12 = scmp.lt.u32.totalorder %s1129_s30, %s2002_s3 }
   0xf   : > { %p1131_p9 = pneg %p1303_p7 }
  0x11   : > { %p1132_p10 = pnand %p1131_p9, %p1130_p8 }
  0x13   : > { %p1133_p11 = pneg %p1132_p10 }
  0x15   : > { %p1138_p13 = pnand %p1136_p12, %p1133_p11 }
  0x17   : > { %1141 = shalt.err (!%p1138_p13)
}
  0x18   : > { %s1142_s9 = scalar_lea.vmem %s157_s23, 1024  ;;  %p1150_p6 = scmp.lt.s32.totalorder %s157_s23, %s157_s23 }
  0x19   : > { %p1143_p0 = scmp.ne.s32.totalorder %s157_s23, %s1142_s9  ;;  %p1151_p1 = scmp.lt.s32.totalorder %s1142_s9, %s1142_s9 }
  0x1b   : > { %p1145_p2 = pnand %p1143_p0, %p1131_p9  ;;  %p1152_p4 = por %p1151_p1, %p1150_p6 }
  0x1d   : > { %p1146_p3 = pneg %p1145_p2 }
  0x1f   : > { %p1153_p5 = pnand %p1152_p4, %p1146_p3 }
  0x21   : > { %1156 = shalt.err (!%p1153_p5)
}
  0x22   : > { %s1228_s10 = smov 128   ;;  %s1229_s11 = smov 8  }
  0x23   : > { %1061 = dma.hbm_to_vmem [thread:$0]  (!%p1303_p7), %s2002_s3, 1024, %s157_s23, [#allocation5], %s1228_s10, %s1228_s10, %s1229_s11  }
  0x24   : > { %p23_p1 = scmp.eq.s32.totalorder %s22_s27, 0  ;;  %p32_p4 = scmp.ne.s32.totalorder %s1221_s17, %s1217_s16 }
  0x25   : > { %p33_p5 = scmp.eq.s32.totalorder %s1225_s18, 0  ;;  %p1067_p8 = scmp.lt.s32.totalorder %s1225_s18, 2 }
  0x26   : > { %s1337_s14 = scalar_select %p23_p1, %s1221_s17, %s25_s26  }
  0x27   : > { %p34_p9 = por %p33_p5, %p32_p4  ;;  %s170_s15 = sand.u32 1, %s1221_s17  }
  0x28   : > { %s1002_s22 = sshll.u32 %s170_s15, 6  ;;  %s1025_s28 = sshll.u32 %s1225_s18, 10 }
  0x29   : > { %s1344_s24 = scalar_lea.hbm %s1999_s0, %s1025_s28  ;;  %s174_s23 = scalar_lea.vmem [#allocation2], %s1002_s22 }
  0x2a   : > { %s181_s27 = sshll.u32 %s174_s23, 4  ;;  %p1348_p7 = pnand %p1067_p8, %p34_p9  ;;  %s1346_s27 = int_to_ptr.vmem [resolvable:$true] %s181_s27 }
  0x2b   : > { %s1352_s18 = scalar_lea.sflag [#allocation3], %s170_s15  ;;  %s1157_s5 = scalar_lea.hbm %s1344_s24, 1024 }
  0x2c   : > { %p1158_p10 = scmp.ne.s32.totalorder %s1344_s24, %s1157_s5  ;;  %p1159_p11 = pneg %p1348_p7 }
  0x2d   : > { %s1162_s8 = scalar_lea.hbm %s1999_s0, 2048  ;;  %p1163_p0 = scmp.lt.u32.totalorder %s1344_s24, %s1999_s0 }
  0x2e   : > { %p1160_p12 = pnand %p1159_p11, %p1158_p10  ;;  %p1164_p2 = scmp.lt.u32.totalorder %s1162_s8, %s1157_s5 }
  0x2f   : > { %p1166_p6 = scmp.lt.u32.totalorder %s1157_s5, %s1344_s24 }
  0x30   : > { %p1161_p13 = pneg %p1160_p12  ;;  %p1165_p3 = por %p1164_p2, %p1163_p0 }
  0x32   : > { %p1167_p1 = por %p1166_p6, %p1165_p3 }
  0x34   : > { %p1168_p4 = pnand %p1167_p1, %p1161_p13 }
  0x36   : > { %1171 = shalt.err (!%p1168_p4)
}
  0x37   : > { %s1172_s13 = scalar_lea.vmem %s1346_s27, 1024  ;;  %s1230_s15 = smov [#allocation2]  }
  0x38   : > { %p1173_p5 = scmp.ne.s32.totalorder %s1346_s27, %s1172_s13  ;;  %s1177_s22 = sshll.u32 %s1230_s15, 4  ;;  %s1178_s22 = int_to_ptr.vmem [resolvable:$false] %s1177_s22 }
  0x39   : > { %s1179_s28 = scalar_lea.vmem %s1178_s22, 2048  ;;  %p1180_p10 = scmp.lt.s32.totalorder %s1346_s27, %s1178_s22 }
  0x3a   : > { %p1175_p8 = pnand %p1173_p5, %p1159_p11  ;;  %p1181_p12 = scmp.lt.s32.totalorder %s1179_s28, %s1172_s13 }
  0x3c   : > { %p1176_p9 = pneg %p1175_p8  ;;  %p1182_p0 = por %p1181_p12, %p1180_p10 }
  0x3e   : > { %p1183_p2 = pnand %p1182_p0, %p1176_p9 }
  0x40   : > { %1186 = shalt.err (!%p1183_p2)
}
  0x41   : > { %1065 = dma.hbm_to_vmem [thread:$0]  (!%p1348_p7), %s1344_s24, 1024, %s1346_s27, %s1352_s18, %s1228_s10, %s1228_s10, %s1229_s11  }
  0x42   : > { %p2024_p11 = scmp.ne.s32.totalorder %s2021_s21, 0 }
  0x44   : > { %193 = sbr.rel (%p2024_p11) target bundleno = 373 (0x175), region = 36 }
  0x4b   : > { %s195_s29 = sand.u32 1, %s1217_s16   ;;  %p2025_p13 = scmp.ne.s32.totalorder %s2020_s20, 0 }
  0x4c   : > { %s1006_s30 = sshll.u32 %s195_s29, 6  ;;  %s196_s23 = scalar_lea.sflag [#allocation3], %s195_s29 }
  0x4d   : > { %s199_s5 = scalar_lea.vmem [#allocation2], %s1006_s30 }
  0x4e   : > { %1204 = dma.done.wait (%p2025_p13), %s196_s23, 1024  }
  0x4f   : > { %1206 = vsyncadd (%p2025_p13), %s196_s23, 4294966272  ;;  %p2026_p3 = scmp.eq.s32.totalorder %s1283_s19, 0 }
  0x51   : > { %1208 = dma.done.wait (%p2026_p3), [#allocation5], 1024   ;;  %p2027_p6 = pmov %p2026_p3 }
  0x52   : > { %v1231_v0 = vmov 0   ;;  %v1394_v1 = vld [vmem:[#allocation4 + $0x10] sm:$0xff]  ;;  %v1128_v2 = vld [vmem:[%s2000_s1] sm:$0xff]   ;;  %v1400_v3 = vld [vmem:[#allocation4 + $0x18] sm:$0xff]  ;;  %vm254_vm0 = vcmask 130048   ;;  %v1232_v22 = vmov 1  }
  0x53   : > { %1210 = vsyncadd (%p2027_p6), [#allocation5], 4294966272  ;;  %1113 = vset.pattern.permute.xlu1 %v1231_v0  ;;  %1112 = vset.pattern.permute.xlu0 %v1231_v0  ;;  %v1402_v4 = vld [vmem:[#allocation4] sm:$0xff]  ;;  %v235_v6 = vld [vmem:[%s199_s5 + $0x8] sm:$0xff]  ;;  %v1233_v23 = vmov 2   ;;  %v1234_v24 = vmov 3  }
  0x54   : > { %386 = vperm.xlu1 %1113, %v1394_v1   ;;  %376 = vperm.xlu0 %1112, %v1402_v4   ;;  %v234_v5 = vld [vmem:[%s199_s5] sm:$0xff]  ;;  %v239_v9 = vld [vmem:[%s199_s5 + $0x28] sm:$0xff]  ;;  %v236_v10 = vld [vmem:[%s199_s5 + $0x10] sm:$0xff]  ;;  %v1235_v25 = vmov 5   ;;  %v1236_v26 = vmov 6   ;;  %v1237_v27 = vmov 7  }
  0x55   : > { %v238_v7 = vld [vmem:[%s199_s5 + $0x20] sm:$0xff]  ;;  %1040 = vmatprep.subr.bf16.mxu0 %v1128_v2  ;;  %1050 = vmatprep.subr.bf16.mxu1 %v1128_v2  ;;  %v242_v8 = vpack.c.bf16 %v235_v6, %v234_v5  ;;  %v237_v11 = vld [vmem:[%s199_s5 + $0x18] sm:$0xff]  ;;  %v240_v14 = vld [vmem:[%s199_s5 + $0x30] sm:$0xff]  ;;  %v1238_v28 = vmov 8   ;;  %p228_p7 = scmp.lt.s32.totalorder %s1283_s19, 1  ;;  %vm912_vm3 = vcmask 125952  }
  0x56   : > { %1041 = vmatpush3.bf16.msra.mxu0 %v1128_v2  ;;  %1051 = vmatpush3.bf16.msra.mxu1 %v1128_v2  ;;  %v244_v12 = vpack.c.bf16 %v239_v9, %v238_v7  ;;  %v243_v13 = vpack.c.bf16 %v237_v11, %v236_v10  ;;  %v241_v15 = vld [vmem:[%s199_s5 + $0x38] sm:$0xff]  ;;  %v1407_v17 = vld [vmem:[#allocation4 + $0x8] sm:$0xff]  ;;  %v1415_v19 = vld [vmem:[#allocation4 + $0x20] sm:$0xff] }
  0x57   : > { %1042 = vmatprep.mubr.msk.bf16.mxu0 %vm254_vm0, %v242_v8  ;;  %v245_v16 = vpack.c.bf16 %v241_v15, %v240_v14  ;;  %v1410_v18 = vld [vmem:[#allocation4 + $0x28] sm:$0xff]  ;;  %v1418_v20 = vld [vmem:[#allocation4 + $0x38] sm:$0xff]  ;;  %v1421_v21 = vld [vmem:[#allocation4 + $0x30] sm:$0xff]  ;;  %s2115_s19 = smov (!%p228_p7, %s1283_s19), 1 }
  0x58   : > { %391 = vperm.xlu1 %1113, %v1400_v3   ;;  %1046 = vmatprep.mubr.msk.bf16.mxu1 %vm254_vm0, %v244_v12  ;;  %v332_v8 = vld [vmem:[%s2001_s2] sm:$0xf]  ;;  %v333_v12 = vld [vmem:[%s2001_s2 + $0x4] sm:$0x1]  ;;  %s1026_s26 = sshll.u32 %s2115_s19, 5 }
  0x59   : > { %381 = vperm.xlu0 %1112, %v1407_v17   ;;  %1043 = vmatmul.mubr.msk.bf16.vlgmr.msra.gmra.mrb[0].mxu0 %vm254_vm0, %v243_v13  ;;  %v342_v9 = vunpack.c.l.bf16 %v332_v8  ;;  %s1937_s6 = scalar_lea.vmem %s2003_s4, %s1026_s26 }
  0x5a   : > { %1047 = vmatmul.mubr.msk.bf16.vlgmr.msra.gmra.mrb[0].mxu1 %vm254_vm0, %v245_v16 }
  0x5c   : > { %401 = vperm.xlu1 %1113, %v1410_v18  }
  0x5d   : > { %396 = vperm.xlu0 %1112, %v1415_v19  }
  0x60   : > { %411 = vperm.xlu1 %1113, %v1418_v20  }
  0x61   : > { %406 = vperm.xlu0 %1112, %v1421_v21  }
  0x64   : > { %1115 = vset.pattern.permute.xlu1 %v1232_v22 }
  0x65   : > { %447 = vperm.xlu1 %1115, %v1407_v17   ;;  %1114 = vset.pattern.permute.xlu0 %v1232_v22 }
  0x66   : > { %443 = vperm.xlu0 %1114, %v1402_v4  }
  0x69   : > { %451 = vperm.xlu1 %1115, %v1394_v1  }
  0x6a   : > { %455 = vperm.xlu0 %1114, %v1400_v3  }
  0x6d   : > { %459 = vperm.xlu1 %1115, %v1415_v19  }
  0x6e   : > { %463 = vperm.xlu0 %1114, %v1410_v18  }
  0x71   : > { %467 = vperm.xlu1 %1115, %v1421_v21  }
  0x72   : > { %471 = vperm.xlu0 %1114, %v1418_v20  }
  0x75   : > { %1116 = vset.pattern.permute.xlu1 %v1233_v23 }
  0x76   : > { %520 = vperm.xlu1 %1116, %v1402_v4   ;;  %1117 = vset.pattern.permute.xlu0 %v1233_v23  ;;  %v859_v23 = vunpack.c.l.bf16 %v333_v12 }
  0x77   : > { %524 = vperm.xlu0 %1117, %v1407_v17  }
  0x7a   : > { %528 = vperm.xlu1 %1116, %v1394_v1  }
  0x7b   : > { %536 = vperm.xlu0 %1117, %v1415_v19  }
  0x7e   : > { %532 = vperm.xlu1 %1116, %v1400_v3  }
  0x7f   : > { %544 = vperm.xlu0 %1117, %v1421_v21  }
  0x82   : > { %540 = vperm.xlu1 %1116, %v1410_v18  }
  0x83   : > { %1118 = vset.pattern.permute.xlu0 %v1234_v24 }
  0x84   : > { %580 = vperm.xlu0 %1118, %v1402_v4  }
  0x86   : > { %548 = vperm.xlu1 %1116, %v1418_v20  }
  0x88   : > { %592 = vperm.xlu0 %1118, %v1400_v3  }
  0x8a   : > { %1119 = vset.pattern.permute.xlu1 %v1234_v24 }
  0x8b   : > { %584 = vperm.xlu1 %1119, %v1407_v17  }
  0x8c   : > { %600 = vperm.xlu0 %1118, %v1410_v18  }
  0x8f   : > { %588 = vperm.xlu1 %1119, %v1394_v1  }
  0x90   : > { %608 = vperm.xlu0 %1118, %v1418_v20  }
  0x93   : > { %596 = vperm.xlu1 %1119, %v1415_v19  }
  0x94   : > { %1121 = vset.pattern.permute.xlu0 %v1235_v25 }
  0x95   : > { %644 = vperm.xlu0 %1121, %v1407_v17  }
  0x97   : > { %604 = vperm.xlu1 %1119, %v1421_v21  }
  0x99   : > { %656 = vperm.xlu0 %1121, %v1415_v19  }
  0x9b   : > { %1120 = vset.pattern.permute.xlu1 %v1235_v25 }
  0x9c   : > { %640 = vperm.xlu1 %1120, %v1402_v4  }
  0x9d   : > { %664 = vperm.xlu0 %1121, %v1421_v21  }
  0xa0   : > { %648 = vperm.xlu1 %1120, %v1394_v1  }
  0xa1   : > { %1122 = vset.pattern.permute.xlu0 %v1236_v26 }
  0xa2   : > { %700 = vperm.xlu0 %1122, %v1402_v4  }
  0xa4   : > { %652 = vperm.xlu1 %1120, %v1400_v3  }
  0xa6   : > { %712 = vperm.xlu0 %1122, %v1400_v3  }
  0xa8   : > { %660 = vperm.xlu1 %1120, %v1410_v18  }
  0xaa   : > { %720 = vperm.xlu0 %1122, %v1410_v18  }
  0xac   : > { %668 = vperm.xlu1 %1120, %v1418_v20  }
  0xae   : > { %728 = vperm.xlu0 %1122, %v1418_v20  }
  0xb0   : > { %1123 = vset.pattern.permute.xlu1 %v1236_v26 }
  0xb1   : > { %704 = vperm.xlu1 %1123, %v1407_v17  }
  0xb2   : > { %1125 = vset.pattern.permute.xlu0 %v1237_v27 }
  0xb3   : > { %764 = vperm.xlu0 %1125, %v1407_v17  }
  0xb5   : > { %708 = vperm.xlu1 %1123, %v1394_v1  }
  0xb7   : > { %776 = vperm.xlu0 %1125, %v1415_v19  }
  0xb9   : > { %716 = vperm.xlu1 %1123, %v1415_v19  }
  0xbb   : > { %784 = vperm.xlu0 %1125, %v1421_v21  }
  0xbd   : > { %724 = vperm.xlu1 %1123, %v1421_v21  }
  0xbf   : > { %1126 = vset.pattern.permute.xlu0 %v1238_v28 }
  0xc0   : > { %820 = vperm.xlu0 %1126, %v1402_v4  }
  0xc1   : > { %1124 = vset.pattern.permute.xlu1 %v1237_v27 }
  0xc2   : > { %760 = vperm.xlu1 %1124, %v1402_v4  }
  0xc4   : > { %832 = vperm.xlu0 %1126, %v1400_v3  }
  0xc6   : > { %768 = vperm.xlu1 %1124, %v1394_v1  }
  0xc8   : > { %840 = vperm.xlu0 %1126, %v1410_v18  }
  0xca   : > { %772 = vperm.xlu1 %1124, %v1400_v3   ;;  %v343_v3 = vlaneseq }
  0xcc   : > { %848 = vperm.xlu0 %1126, %v1418_v20   ;;  %v1551_v6 = vshrl.u32 %v343_v3, 7 }
  0xce   : > { %780 = vperm.xlu1 %1124, %v1410_v18   ;;  %v345_v10 = vsub.s32 4, %v1551_v6  ;;  %v484_v11 = vsub.s32 1, %v1551_v6  ;;  %v424_v15 = vsub.s32 0, %v1551_v6  ;;  %v621_v16 = vsub.s32 3, %v1551_v6 }
  0xcf   : > { %v681_v22 = vsub.s32 5, %v1551_v6  ;;  %vm365_vm1 = vcmp.lt.s32.totalorder %v1551_v6, 1  ;;  %vm510_vm2 = vcmp.lt.s32.totalorder %v1551_v6, 7 }
  0xd0   : > { %v346_v24 = vrot.slane %v342_v9, %v345_v10  ;;  %v485_v25 = vrot.slane %v342_v9, %v484_v11 }
  0xd2   : > { %788 = vperm.xlu1 %1124, %v1418_v20   ;;  %v801_v20 = vsub.s32 7, %v1551_v6 }
  0xd3   : > { %v1477_v29 = vpop.permute.xlu1 %386  ;;  %v1479_v30 = vpop.permute.xlu0 %376 }
  0xd6   : > { %1127 = vset.pattern.permute.xlu1 %v1238_v28 }
  0xd7   : > { %v1481_v31 = vpop.permute.xlu1 %391  ;;  %824 = vperm.xlu1 %1127, %v1407_v17   ;;  %v741_v17 = vsub.s32 6, %v1551_v6 }
  0xd8   : > { %v1484_v32 = vpop.permute.xlu0 %381 }
  0xdb   : > { %v1486_v33 = vpop.permute.xlu1 %401  ;;  %828 = vperm.xlu1 %1127, %v1394_v1  }
  0xdc   : > { %v1489_v34 = vpop.permute.xlu0 %396 }
  0xdf   : > { %v1491_v35 = vpop.permute.xlu1 %411  ;;  %836 = vperm.xlu1 %1127, %v1415_v19  }
  0xe0   : > { %v1494_v36 = vpop.permute.xlu0 %406 }
  0xe3   : > { %844 = vperm.xlu1 %1127, %v1421_v21   ;;  %v561_v21 = vsub.s32 2, %v1551_v6 }
  0xe4   : > { %v448_v37 = vpop.permute.xlu1 %447 }
  0xe5   : > { %v1497_v38 = vpop.permute.xlu0 %443 }
  0xe8   : > { %v1499_v39 = vpop.permute.xlu1 %451 }
  0xe9   : > { %v456_v40 = vpop.permute.xlu0 %455 }
  0xec   : > { %v460_v41 = vpop.permute.xlu1 %459 }
  0xed   : > { %v464_v42 = vpop.permute.xlu0 %463 }
  0xf0   : > { %v1501_v43 = vpop.permute.xlu1 %467 }
  0xf1   : > { %v472_v44 = vpop.permute.xlu0 %471 }
  0xf5   : > { %v1503_v45 = vpop.permute.xlu1 %520 }
  0xf6   : > { %2028 = vst [vmem:[#allocation8_spill] sm:$0xff] %v1503_v45  ;;  %v1505_v46 = vpop.permute.xlu0 %524 }
  0xf7   : > { %2029 = vst [vmem:[#allocation9_spill] sm:$0xff] %v1505_v46 }
  0xf9   : > { %v1507_v47 = vpop.permute.xlu1 %528 }
  0xfa   : > { %v1509_v48 = vpop.permute.xlu0 %536 }
  0xfb   : > { %2030 = vst [vmem:[#allocation10_spill] sm:$0xff] %v1509_v48  ;;  %v1603_v48 = vrot.slane %v342_v9, %v801_v20 }
  0xfd   : > { %v1511_v49 = vpop.permute.xlu1 %532  ;;  %2045 = vst [vmem:[#allocation25_spill] sm:$0xff] %v1603_v48  ;;  %v2099_v6 = vld [vmem:[#allocation8_spill] sm:$0xff] }
  0xfe   : > { %2031 = vst [vmem:[#allocation11_spill] sm:$0xff] %v1511_v49  ;;  %v1513_v50 = vpop.permute.xlu0 %544  ;;  %v1607_v49 = vrot.slane %v342_v9, %v681_v22 }
  0xff   : > { %2032 = vst [vmem:[#allocation12_spill] sm:$0xff] %v1513_v50  ;;  %v1597_v50 = vrot.slane %v342_v9, %v621_v16 }
 0x100   : > { %2047 = vst [vmem:[#allocation27_spill] sm:$0xff] %v1607_v49 }
 0x101   : > { %v1515_v51 = vpop.permute.xlu1 %540 }
 0x102   : > { %2033 = vst [vmem:[#allocation13_spill] sm:$0xff] %v1515_v51 }
 0x103   : > { %v1517_v52 = vpop.permute.xlu0 %580 }
 0x105   : > { %v1519_v53 = vpop.permute.xlu1 %548 }
 0x106   : > { %2034 = vst [vmem:[#allocation14_spill] sm:$0xff] %v1519_v53 }
 0x107   : > { %v1521_v54 = vpop.permute.xlu0 %592 }
 0x10a   : > { %v1523_v55 = vpop.permute.xlu1 %584 }
 0x10b   : > { %v1525_v56 = vpop.permute.xlu0 %600 }
 0x10e   : > { %v1527_v57 = vpop.permute.xlu1 %588 }
 0x10f   : > { %v1529_v58 = vpop.permute.xlu0 %608 }
 0x112   : > { %v1531_v59 = vpop.permute.xlu1 %596 }
 0x114   : > { %v1533_v60 = vpop.permute.xlu0 %644 }
 0x115   : > { %2035 = vst [vmem:[#allocation15_spill] sm:$0xff] %v1533_v60 }
 0x116   : > { %v1535_v61 = vpop.permute.xlu1 %604 }
 0x118   : > { %v1537_v62 = vpop.permute.xlu0 %656 }
 0x119   : > { %2036 = vst [vmem:[#allocation16_spill] sm:$0xff] %v1537_v62 }
 0x11b   : > { %v1539_v63 = vpop.permute.xlu1 %640 }
 0x11c   : > { %2037 = vst [vmem:[#allocation17_spill] sm:$0xff] %v1539_v63  ;;  %v1541_v0 = vpop.permute.xlu0 %664 }
 0x11d   : > { %2038 = vst [vmem:[#allocation18_spill] sm:$0xff] %v1541_v0 }
 0x11f   : > { %v1543_v1 = vpop.permute.xlu1 %648 }
 0x120   : > { %2039 = vst [vmem:[#allocation19_spill] sm:$0xff] %v1543_v1  ;;  %v1605_v1 = vrot.slane %v342_v9, %v561_v21 }
 0x121   : > { %v1545_v2 = vpop.permute.xlu0 %700 }
 0x122   : > { %2046 = vst [vmem:[#allocation26_spill] sm:$0xff] %v1605_v1 }
 0x123   : > { %v1547_v4 = vpop.permute.xlu1 %652 }
 0x124   : > { %2040 = vst [vmem:[#allocation20_spill] sm:$0xff] %v1547_v4 }
 0x125   : > { %v1549_v5 = vpop.permute.xlu0 %712 }
 0x127   : > { %v1553_v7 = vpop.permute.xlu1 %660 }
 0x128   : > { %2041 = vst [vmem:[#allocation21_spill] sm:$0xff] %v1553_v7  ;;  %v1589_v7 = vrot.slane %v342_v9, %v424_v15 }
 0x129   : > { %v1565_v14 = vpop.permute.xlu0 %720 }
 0x12b   : > { %v1563_v13 = vpop.permute.xlu1 %668 }
 0x12c   : > { %2042 = vst [vmem:[#allocation22_spill] sm:$0xff] %v1563_v13  ;;  %v1570_v18 = vpop.f32.mrb[0].mxu0 }
 0x12d   : > { %v1572_v19 = vpop.f32.mrb[0].mxu1  ;;  %v1578_v27 = vpop.f32.mrb[1].mxu0  ;;  %v477_v3 = vmul.f32 %v1570_v18, %v456_v40  ;;  %v1599_v40 = vrot.slane %v342_v9, %v741_v17 }
 0x12e   : > { %v481_v26 = vmul.f32 %v1572_v19, %v472_v44  ;;  %2043 = vst [vmem:[#allocation23_spill] sm:$0xff] %v1578_v27  ;;  %v1580_v28 = vpop.f32.mrb[1].mxu1  ;;  %v1584_v13 = vpop.f32.mrb[2].mxu0  ;;  %v475_v10 = vmul.f32 %v448_v37, %v1578_v27  ;;  %v1609_v37 = vrot.slane %v859_v23, %v424_v15  ;;  %v1618_v16 = vmul.f32 %v346_v24, %v1578_v27 }
 0x12f   : > { %v479_v8 = vmul.f32 %v464_v42, %v1580_v28  ;;  %v1586_v45 = vpop.f32.mrb[2].mxu1  ;;  %v478_v44 = vmul.f32 %v1584_v13, %v460_v41  ;;  %v1595_v12 = vpop.f32.mrb[3].mxu0  ;;  %v1612_v41 = vmul.f32 %v1570_v18, %v346_v24  ;;  %v1621_v63 = vmul.f32 %v485_v25, %v477_v3 }
 0x130   : > { %v1593_v11 = vpop.permute.xlu1 %704  ;;  %v1601_v42 = vpop.f32.mrb[3].mxu1  ;;  %2048 = vst [vmem:[#allocation28_spill] sm:$0xff] %v1609_v37  ;;  %v356_v17 = vrot.slane %v1595_v12, 7  ;;  %v1623_v20 = vmul.f32 %v485_v25, %v481_v26  ;;  %v351_v9 = vmul.f32 %v346_v24, %v1580_v28  ;;  %v1627_v15 = vmul.f32 %v1584_v13, %v346_v24 }
 0x131   : > { %2044 = vst [vmem:[#allocation24_spill] sm:$0xff] %v1593_v11  ;;  %v729_v4 = vpop.permute.xlu0 %728  ;;  %v1615_v11 = vmul.f32 %v1572_v19, %v346_v24  ;;  %2049 = vst [vmem:[#allocation29_spill] sm:$0xff] %v1621_v63  ;;  %v1629_v21 = vmul.f32 %v485_v25, %v475_v10  ;;  %v1631_v22 = vmul.f32 %v485_v25, %v479_v8  ;;  %v355_v46 = vrot.slane %v1578_v27, 7 }
 0x132   : > { %2050 = vst [vmem:[#allocation30_spill] sm:$0xff] %v1623_v20  ;;  %2051 = vst [vmem:[#allocation31_spill] sm:$0xff] %v1627_v15  ;;  %v480_v23 = vmul.f32 %v1501_v43, %v1601_v42  ;;  %v474_v3 = vmul.f32 %v1586_v45, %v1497_v38  ;;  %v362_v26 = vrot.slane %v1586_v45, 7  ;;  %v357_v63 = vrot.slane %v1570_v18, 7 }
 0x133   : > { %2052 = vst [vmem:[#allocation32_spill] sm:$0xff] %v1629_v21  ;;  %v358_v0 = vrot.slane %v1584_v13, 7  ;;  %v1641_v10 = vmul.f32 %v485_v25, %v478_v44  ;;  %v1644_v8 = vmul.f32 %v1586_v45, %v346_v24  ;;  %v476_v43 = vmul.f32 %v1499_v39, %v1595_v12 }
 0x134   : > { %v709_v37 = vpop.permute.xlu1 %708  ;;  %v372_v53 = vsel %vm365_vm1, %v355_v46, %v356_v17  ;;  %v348_v38 = vmul.f32 %v346_v24, %v1595_v12  ;;  %v360_v49 = vrot.slane %v1601_v42, 7  ;;  %v373_v27 = vsel %vm365_vm1, %v362_v26, %v355_v46 }
 0x135   : > { %v765_v15 = vpop.permute.xlu0 %764  ;;  %2053 = vst [vmem:[#allocation33_spill] sm:$0xff] %v1641_v10  ;;  %2054 = vst [vmem:[#allocation34_spill] sm:$0xff] %v1644_v8  ;;  %v1655_v62 = vmul.f32 %v1523_v55, %v372_v53  ;;  %v415_v44 = vmul.f32 %v1484_v32, %v373_v27  ;;  %v1659_v10 = vmul.f32 %v1517_v52, %v373_v27  ;;  %v359_v20 = vrot.slane %v1580_v28, 7 }
 0x136   : > { %v370_v39 = vsel %vm365_vm1, %v357_v63, %v358_v0  ;;  %v1664_v51 = vmul.f32 %v485_v25, %v474_v3  ;;  %v1669_v46 = vsel %vm365_vm1, %v356_v17, %v357_v63  ;;  %v352_v52 = vmul.f32 %v346_v24, %v1601_v42 }
 0x137   : > { %2055 = vst [vmem:[#allocation35_spill] sm:$0xff] %v1655_v62  ;;  %2056 = vst [vmem:[#allocation36_spill] sm:$0xff] %v1659_v10  ;;  %v418_v55 = vmul.f32 %v1489_v34, %v370_v39  ;;  %v488_v62 = vmul.f32 %v485_v25, %v476_v43  ;;  %v427_v1 = vmul.f32 %v1589_v7, %v415_v44  ;;  %v361_v63 = vrot.slane %v1572_v19, 7 }
 0x138   : > { %v717_v21 = vpop.permute.xlu1 %716  ;;  %v1675_v8 = vmul.f32 %v485_v25, %v480_v23  ;;  %v1680_v60 = vmul.f32 %v1527_v57, %v1669_v46  ;;  %v614_v24 = vmul.f32 %v1521_v54, %v370_v39  ;;  %v368_v17 = vsel %vm365_vm1, %v359_v20, %v360_v49 }
 0x139   : > { %v777_v32 = vpop.permute.xlu0 %776  ;;  %v430_v3 = vmul.f32 %v1589_v7, %v418_v55  ;;  %v1684_v34 = vadd.f32 %v427_v1, %v348_v38  ;;  %v369_v25 = vsel %vm365_vm1, %v358_v0, %v359_v20  ;;  %v792_v57 = vmul.f32 %v1570_v18, %v765_v15 }
 0x13a   : > { %v419_v44 = vmul.f32 %v1486_v33, %v369_v25  ;;  %v420_v55 = vmul.f32 %v1494_v36, %v368_v17  ;;  %v416_v1 = vmul.f32 %v1477_v29, %v372_v53  ;;  %v1698_v38 = vmul.f32 %v1545_v2, %v372_v53 }
 0x13b   : > { %v1691_v43 = vadd.f32 %v430_v3, %v351_v9  ;;  %v1700_v54 = vmul.f32 %v729_v4, %v373_v27  ;;  %v1703_v10 = vmul.f32 %v1531_v59, %v369_v25  ;;  %v733_v20 = vmul.f32 %v709_v37, %v370_v39 }
 0x13c   : > { %v725_v23 = vpop.permute.xlu1 %724  ;;  %2057 = vst [vmem:[#allocation37_spill] sm:$0xff] %v1698_v38  ;;  %v431_v9 = vmul.f32 %v1589_v7, %v419_v44  ;;  %v432_v15 = vmul.f32 %v1589_v7, %v420_v55  ;;  %v366_v33 = vsel %vm365_vm1, %v361_v63, %v362_v26  ;;  %v417_v29 = vmul.f32 %v1481_v31, %v1669_v46  ;;  %v2072_v38 = vld [vmem:[#allocation27_spill] sm:$0xff] }
 0x13d   : > { %v785_v0 = vpop.permute.xlu0 %784  ;;  %v1712_v36 = vmul.f32 %v1597_v50, %v614_v24  ;;  %v367_v53 = vsel %vm365_vm1, %v360_v49, %v361_v63  ;;  %v414_v59 = vmul.f32 %v1479_v30, %v366_v33  ;;  %v616_v27 = vmul.f32 %v1525_v56, %v368_v17 }
 0x13e   : > { %v439_v2 = vadd.f32 %v431_v9, %v352_v52  ;;  %v1718_v4 = vadd.f32 %v432_v15, %v1615_v11  ;;  %v735_v37 = vmul.f32 %v717_v21, %v368_v17  ;;  %v1724_v26 = vmul.f32 %v1603_v48, %v792_v57 }
 0x13f   : > { %v421_v31 = vmul.f32 %v1491_v35, %v367_v53  ;;  %v426_v3 = vmul.f32 %v1589_v7, %v414_v59  ;;  %v1729_v49 = vmul.f32 %v1535_v61, %v367_v53  ;;  %v1732_v30 = vmul.f32 %v1599_v40, %v733_v20 }
 0x140   : > { %v1735_v11 = vmul.f32 %v1549_v5, %v369_v25  ;;  %v795_v56 = vmul.f32 %v777_v32, %v1601_v42  ;;  %v428_v21 = vmul.f32 %v1589_v7, %v416_v1  ;;  %v618_v35 = vmul.f32 %v1529_v58, %v366_v33 }
 0x141   : > { %v1721_v39 = vpop.permute.xlu1 %760  ;;  %v1740_v52 = vadd.f32 %v426_v3, %v1618_v16  ;;  %v1743_v63 = vpop.permute.xlu0 %820  ;;  %v2013_v61 = vrot.slane %v1570_v18, 1  ;;  %v499_v24 = vadd.f32 %v1631_v22, %v439_v2  ;;  %v1748_v17 = vmul.f32 %v1597_v50, %v616_v27  ;;  %v2063_v2 = vld [vmem:[#allocation34_spill] sm:$0xff]  ;;  %v2065_v27 = vld [vmem:[#allocation15_spill] sm:$0xff] }
 0x142   : > { %2058 = vst [vmem:[#allocation38_spill] sm:$0xff] %v1721_v39  ;;  %2059 = vst [vmem:[#allocation39_spill] sm:$0xff] %v1743_v63  ;;  %v1751_v5 = vmul.f32 %v1599_v40, %v735_v37  ;;  %v737_v32 = vmul.f32 %v725_v23, %v366_v33  ;;  %v436_v25 = vadd.f32 %v428_v21, %v1612_v41  ;;  %v2060_v58 = vrot.slane %v1595_v12, 1 }
 0x143   : > { %v797_v16 = vmul.f32 %v1586_v45, %v785_v0  ;;  %v2012_v22 = vrot.slane %v1580_v28, 1  ;;  %v433_v55 = vmul.f32 %v1589_v7, %v421_v31  ;;  %v1766_v1 = vmul.f32 %v1603_v48, %v795_v56  ;;  %v2066_v31 = vld [vmem:[#allocation13_spill] sm:$0xff] }
 0x144   : > { %v1761_v44 = vsel %vm510_vm2, %v2060_v58, %v2013_v61  ;;  %v1769_v41 = vmul.f32 %v1565_v14, %v367_v53  ;;  %v496_v23 = vadd.f32 %v488_v62, %v436_v25  ;;  %v1774_v20 = vmul.f32 %v1597_v50, %v618_v35  ;;  %v2064_v53 = vld [vmem:[#allocation26_spill] sm:$0xff] }
 0x145   : > { %v769_v57 = vpop.permute.xlu1 %768  ;;  %2061 = vst [vmem:[#allocation40_spill] sm:$0xff] %v1761_v44  ;;  %v553_v0 = vmul.f32 %v1507_v47, %v1761_v44  ;;  %v833_v15 = vpop.permute.xlu0 %832  ;;  %v2062_v33 = vrot.slane %v1601_v42, 1  ;;  %v441_v14 = vadd.f32 %v433_v55, %v2063_v2  ;;  %v672_v47 = vmul.f32 %v2065_v27, %v1761_v44  ;;  %v2069_v2 = vld [vmem:[#allocation32_spill] sm:$0xff] }
 0x146   : > { %v793_v9 = vmul.f32 %v1584_v13, %v769_v57  ;;  %v1790_v21 = vmul.f32 %v1599_v40, %v737_v32  ;;  %v1793_v35 = vmul.f32 %v1603_v48, %v797_v16  ;;  %v2068_v57 = vld [vmem:[#allocation30_spill] sm:$0xff]  ;;  %v495_v27 = vadd.f32 %v2069_v2, %v1684_v34  ;;  %v2070_v32 = vld [vmem:[#allocation16_spill] sm:$0xff]  ;;  %v2071_v16 = vld [vmem:[#allocation23_spill] sm:$0xff] }
 0x147   : > { %v513_v59 = vsel %vm510_vm2, %v2012_v22, %v2062_v33  ;;  %v565_v62 = vmul.f32 %v2064_v53, %v553_v0  ;;  %v501_v58 = vadd.f32 %v2068_v57, %v441_v14  ;;  %v2014_v33 = vrot.slane %v1586_v45, 1 }
 0x148   : > { %v556_v3 = vmul.f32 %v2066_v31, %v513_v59  ;;  %2067 = vst [vmem:[#allocation34_spill] sm:$0xff] %v1793_v35  ;;  %v1802_v31 = vmul.f32 %v1603_v48, %v793_v9  ;;  %v675_v22 = vmul.f32 %v2070_v32, %v513_v59  ;;  %v854_v61 = vmul.f32 %v833_v15, %v513_v59 }
 0x149   : > { %v773_v37 = vpop.permute.xlu1 %772  ;;  %v573_v55 = vadd.f32 %v565_v62, %v496_v23  ;;  %v2015_v56 = vrot.slane %v2071_v16, 1  ;;  %v2073_v14 = vrot.slane %v1572_v19, 1  ;;  %v429_v9 = vmul.f32 %v1589_v7, %v417_v29  ;;  %v841_v59 = vpop.permute.xlu0 %840  ;;  %v2078_v7 = vld [vmem:[#allocation31_spill] sm:$0xff] }
 0x14a   : > { %v794_v25 = vmul.f32 %v773_v37, %v1580_v28  ;;  %v568_v0 = vmul.f32 %v2064_v53, %v556_v3  ;;  %v684_v37 = vmul.f32 %v2072_v38, %v672_v47  ;;  %v2074_v3 = vld [vmem:[#allocation14_spill] sm:$0xff]  ;;  %v2076_v2 = vrot.slane %v1595_v12, 1 }
 0x14b   : > { %v511_v34 = vsel %vm510_vm2, %v2073_v14, %v2014_v33  ;;  %v437_v29 = vadd.f32 %v429_v9, %v2078_v7  ;;  %v2079_v14 = vld [vmem:[#allocation28_spill] sm:$0xff]  ;;  %v2080_v33 = vld [vmem:[#allocation9_spill] sm:$0xff] }
 0x14c   : > { %v1807_v63 = vadd.f32 %v568_v0, %v499_v24  ;;  %v1817_v62 = vmul.f32 %v1603_v48, %v794_v25  ;;  %v558_v47 = vmul.f32 %v2074_v3, %v511_v34  ;;  %v2075_v24 = vld [vmem:[#allocation18_spill] sm:$0xff]  ;;  %v856_v0 = vmul.f32 %v841_v59, %v511_v34 }
 0x14d   : > { %v781_v23 = vpop.permute.xlu1 %780  ;;  %v677_v57 = vmul.f32 %v2075_v24, %v511_v34  ;;  %v1828_v32 = vsel %vm510_vm2, %v2015_v56, %v2076_v2  ;;  %v505_v25 = vrot.slane %v1584_v13, 1  ;;  %v1836_v3 = vmul.f32 %v2079_v14, %v854_v61  ;;  %v2081_v56 = vld [vmem:[#allocation35_spill] sm:$0xff]  ;;  %v2082_v13 = vld [vmem:[#allocation17_spill] sm:$0xff] }
 0x14e   : > { %v796_v15 = vmul.f32 %v1572_v19, %v781_v23  ;;  %2077 = vst [vmem:[#allocation26_spill] sm:$0xff] %v1828_v32  ;;  %v1833_v23 = vmul.f32 %v2072_v38, %v675_v22  ;;  %v570_v34 = vmul.f32 %v2064_v53, %v558_v47  ;;  %v625_v59 = vmul.f32 %v1597_v50, %v1680_v60  ;;  %v2084_v22 = vld [vmem:[#allocation29_spill] sm:$0xff] }
 0x14f   : > { %v552_v2 = vmul.f32 %v2080_v33, %v1828_v32  ;;  %v624_v9 = vmul.f32 %v1597_v50, %v2081_v56  ;;  %v1847_v7 = vmul.f32 %v2082_v13, %v1828_v32  ;;  %v497_v44 = vadd.f32 %v2084_v22, %v437_v29  ;;  %v2086_v29 = vld [vmem:[#allocation11_spill] sm:$0xff]  ;;  %v2088_v22 = vld [vmem:[#allocation24_spill] sm:$0xff] }
 0x150   : > { %v1851_v61 = vmul.f32 %v1603_v48, %v796_v15  ;;  %v1853_v47 = vadd.f32 %v570_v34, %v501_v58  ;;  %v2085_v60 = vrot.slane %v1570_v18, 1  ;;  %v633_v33 = vadd.f32 %v625_v59, %v573_v55  ;;  %v2087_v34 = vld [vmem:[#allocation19_spill] sm:$0xff]  ;;  %v2089_v55 = vld [vmem:[#allocation33_spill] sm:$0xff]  ;;  %v2092_v48 = vld [vmem:[#allocation20_spill] sm:$0xff] }
 0x151   : > { %v789_v24 = vpop.permute.xlu1 %788  ;;  %2083 = vst [vmem:[#allocation15_spill] sm:$0xff] %v1847_v7  ;;  %v1860_v39 = vmul.f32 %v2072_v38, %v677_v57  ;;  %v1863_v56 = vmul.f32 %v2079_v14, %v856_v0  ;;  %v564_v13 = vmul.f32 %v2064_v53, %v552_v2  ;;  %v498_v57 = vadd.f32 %v2089_v55, %v1691_v43 }
 0x152   : > { %v515_v35 = vsel %vm510_vm2, %v2085_v60, %v505_v25  ;;  %v1868_v58 = vmul.f32 %v789_v24, %v2071_v16  ;;  %v732_v60 = vmul.f32 %v2088_v22, %v1669_v46  ;;  %v2090_v7 = vrot.slane %v1580_v28, 1  ;;  %v2091_v46 = vld [vmem:[#allocation10_spill] sm:$0xff] }
 0x153   : > { %v554_v15 = vmul.f32 %v2086_v29, %v515_v35  ;;  %v673_v18 = vmul.f32 %v2087_v34, %v515_v35  ;;  %v572_v59 = vadd.f32 %v564_v13, %v495_v27  ;;  %v627_v24 = vmul.f32 %v1597_v50, %v1703_v10 }
 0x154   : > { %v514_v2 = vsel %vm510_vm2, %v505_v25, %v2090_v7  ;;  %v744_v32 = vmul.f32 %v1599_v40, %v732_v60  ;;  %v746_v28 = vmul.f32 %v1599_v40, %v1735_v11 }
 0x155   : > { %v566_v0 = vmul.f32 %v2064_v53, %v554_v15  ;;  %v685_v34 = vmul.f32 %v2072_v38, %v673_v18  ;;  %v555_v22 = vmul.f32 %v2091_v46, %v514_v2  ;;  %v674_v43 = vmul.f32 %v2092_v48, %v514_v2 }
 0x156   : > { %v825_v29 = vpop.permute.xlu1 %824  ;;  %v632_v27 = vadd.f32 %v624_v9, %v572_v59  ;;  %v500_v18 = vadd.f32 %v1675_v8, %v1718_v4  ;;  %v629_v8 = vmul.f32 %v1597_v50, %v1729_v49  ;;  %v636_v4 = vadd.f32 %v1748_v17, %v1807_v63 }
 0x157   : > { %v574_v13 = vadd.f32 %v566_v0, %v497_v44  ;;  %v852_v15 = vmul.f32 %v825_v29, %v515_v35  ;;  %v693_v25 = vadd.f32 %v685_v34, %v633_v33  ;;  %v567_v10 = vmul.f32 %v2064_v53, %v555_v22  ;;  %v2095_v0 = vld [vmem:[#allocation12_spill] sm:$0xff]  ;;  %v2096_v34 = vld [vmem:[#allocation21_spill] sm:$0xff] }
 0x158   : > { %v686_v7 = vmul.f32 %v2072_v38, %v674_v43  ;;  %v692_v60 = vadd.f32 %v684_v37, %v632_v27  ;;  %v2093_v44 = vrot.slane %v1572_v19, 1  ;;  %v2094_v35 = vrot.slane %v1601_v42, 1 }
 0x159   : > { %v865_v48 = vmul.f32 %v2079_v14, %v852_v15  ;;  %v634_v9 = vadd.f32 %v1712_v36, %v574_v13  ;;  %v575_v55 = vadd.f32 %v567_v10, %v498_v57  ;;  %v753_v59 = vadd.f32 %v1732_v30, %v693_v25 }
 0x15a   : > { %v512_v11 = vsel %vm510_vm2, %v2094_v35, %v2093_v44  ;;  %v829_v33 = vpop.permute.xlu1 %828  ;;  %v752_v36 = vadd.f32 %v744_v32, %v692_v60  ;;  %v748_v32 = vmul.f32 %v1599_v40, %v1769_v41  ;;  %v494_v17 = vadd.f32 %v1664_v51, %v1740_v52 }
 0x15b   : > { %v557_v29 = vmul.f32 %v2095_v0, %v512_v11  ;;  %v694_v19 = vadd.f32 %v686_v7, %v634_v9  ;;  %v853_v42 = vmul.f32 %v829_v33, %v514_v2  ;;  %v635_v37 = vadd.f32 %v627_v24, %v575_v55  ;;  %v2100_v9 = vld [vmem:[#allocation22_spill] sm:$0xff]  ;;  %v2101_v33 = vld [vmem:[#allocation36_spill] sm:$0xff]  ;;  %v849_v55 = vpop.permute.xlu0 %848 }
 0x15c   : > { %v813_v57 = vadd.f32 %v1802_v31, %v753_v59  ;;  %v676_v46 = vmul.f32 %v2096_v34, %v512_v11  ;;  %v812_v22 = vadd.f32 %v1724_v26, %v752_v36  ;;  %v2097_v41 = vrot.slane %v2071_v16, 1 }
 0x15d   : > { %v569_v30 = vmul.f32 %v2064_v53, %v557_v29  ;;  %v754_v49 = vadd.f32 %v746_v28, %v694_v19  ;;  %v866_v43 = vmul.f32 %v2079_v14, %v853_v42  ;;  %v695_v63 = vadd.f32 %v1833_v23, %v635_v37  ;;  %v2103_v42 = vld [vmem:[#allocation25_spill] sm:$0xff] }
 0x15e   : > { %v837_v27 = vpop.permute.xlu1 %836  ;;  %v688_v13 = vmul.f32 %v2072_v38, %v676_v46  ;;  %v873_v31 = vadd.f32 %v865_v48, %v812_v22  ;;  %v2098_v7 = vrot.slane %v1586_v45, 1  ;;  %v2106_v46 = vld [vmem:[#allocation40_spill] sm:$0xff] }
 0x15f   : > { %v577_v2 = vadd.f32 %v569_v30, %v500_v18  ;;  %v814_v24 = vadd.f32 %v1817_v62, %v754_v49  ;;  %v874_v26 = vadd.f32 %v866_v43, %v813_v57  ;;  %v855_v15 = vmul.f32 %v837_v27, %v512_v11  ;;  %v2105_v30 = vld [vmem:[#allocation34_spill] sm:$0xff]  ;;  %v2108_v49 = vld [vmem:[#allocation15_spill] sm:$0xff] }
 0x160   : > { %v696_v25 = vadd.f32 %v688_v13, %v636_v4  ;;  %v755_v10 = vadd.f32 %v1751_v5, %v695_v63  ;;  %v518_v23 = vsel %vm510_vm2, %v2098_v7, %v2097_v41  ;;  %v1028_v18 = vpack.c.bf16 %v873_v31, %v873_v31  ;;  %v2104_v4 = vld [vmem:[#allocation26_spill] sm:$0xff] }
 0x161   : > { %v637_v28 = vadd.f32 %v629_v8, %v577_v2  ;;  %v875_v51 = vadd.f32 %v1836_v3, %v814_v24  ;;  %v1029_v52 = vpack.c.bf16 %v874_v26, %v874_v26  ;;  %v868_v60 = vmul.f32 %v2079_v14, %v855_v15 }
 0x162   : > { %v756_v5 = vadd.f32 %v748_v32, %v696_v25  ;;  %v815_v16 = vadd.f32 %v1766_v1, %v755_v10  ;;  %v845_v45 = vpop.permute.xlu1 %844  ;;  %v551_v62 = vmul.f32 %v2099_v6, %v518_v23  ;;  %v638_v3 = vadd.f32 %v1774_v20, %v1853_v47  ;;  %914 = vst.msk [vmem:[%s1937_s6 + $0x4] sm:$0xf] %vm912_vm3, %v1028_v18 }
 0x163   : > { %v1030_v48 = vpack.c.bf16 %v875_v51, %v875_v51  ;;  %915 = vst.msk [vmem:[%s1937_s6 + $0x8] sm:$0xf] %vm912_vm3, %v1029_v52  ;;  %v678_v44 = vmul.f32 %v2100_v9, %v518_v23  ;;  %v697_v35 = vadd.f32 %v1860_v39, %v637_v28  ;;  %v857_v11 = vmul.f32 %v845_v45, %v518_v23 }
 0x164   : > { %v623_v1 = vmul.f32 %v1597_v50, %v2101_v33  ;;  %v816_v59 = vadd.f32 %v1851_v61, %v756_v5  ;;  %v876_v0 = vadd.f32 %v868_v60, %v815_v16  ;;  %v563_v29 = vmul.f32 %v2064_v53, %v551_v62  ;;  %v2102_v50 = vld [vmem:[#allocation38_spill] sm:$0xff] }
 0x165   : > { %v750_v20 = vmul.f32 %v1599_v40, %v1700_v54  ;;  %916 = vst.msk [vmem:[%s1937_s6 + $0xc] sm:$0xf] %vm912_vm3, %v1030_v48  ;;  %v690_v47 = vmul.f32 %v2072_v38, %v678_v44  ;;  %v757_v39 = vadd.f32 %v1790_v21, %v697_v35  ;;  %v870_v8 = vmul.f32 %v2079_v14, %v857_v11  ;;  %v2107_v21 = vld [vmem:[#allocation39_spill] sm:$0xff] }
 0x166   : > { %v791_v36 = vmul.f32 %v2102_v50, %v1595_v12  ;;  %v877_v61 = vadd.f32 %v1863_v56, %v816_v59  ;;  %v1031_v19 = vpack.c.bf16 %v876_v0, %v876_v0  ;;  %v571_v53 = vadd.f32 %v563_v29, %v494_v17 }
 0x167   : > { %v810_v54 = vmul.f32 %v2103_v42, %v1868_v58  ;;  %v858_v37 = vmul.f32 %v849_v55, %v2104_v4  ;;  %v698_v57 = vadd.f32 %v690_v47, %v638_v3  ;;  %v817_v34 = vadd.f32 %v2105_v30, %v757_v39  ;;  %v2109_v58 = vld [vmem:[#allocation37_spill] sm:$0xff] }
 0x168   : > { %v851_v22 = vmul.f32 %v2107_v21, %v2106_v46  ;;  %v683_v43 = vmul.f32 %v2072_v38, %v2108_v49  ;;  %v1032_v12 = vpack.c.bf16 %v877_v61, %v877_v61  ;;  %917 = vst.msk [vmem:[%s1937_s6 + $0x10] sm:$0xf] %vm912_vm3, %v1031_v19  ;;  %v631_v56 = vadd.f32 %v623_v1, %v571_v53 }
 0x169   : > { %v758_v32 = vadd.f32 %v750_v20, %v698_v57  ;;  %v878_v27 = vadd.f32 %v870_v8, %v817_v34  ;;  %v743_v2 = vmul.f32 %v1599_v40, %v2109_v58  ;;  %v803_v13 = vmul.f32 %v2103_v42, %v791_v36 }
 0x16a   : > { %918 = vst.msk [vmem:[%s1937_s6 + $0x14] sm:$0xf] %vm912_vm3, %v1032_v12  ;;  %v691_v63 = vadd.f32 %v683_v43, %v631_v56  ;;  %v871_v17 = vmul.f32 %v2079_v14, %v858_v37  ;;  %v864_v24 = vmul.f32 %v2079_v14, %v851_v22 }
 0x16b   : > { %v818_v38 = vadd.f32 %v810_v54, %v758_v32  ;;  %v1033_v31 = vpack.c.bf16 %v878_v27, %v878_v27 }
 0x16c   : > { %v751_v26 = vadd.f32 %v743_v2, %v691_v63 }
 0x16d   : > { %v879_v15 = vadd.f32 %v871_v17, %v818_v38  ;;  %919 = vst.msk [vmem:[%s1937_s6 + $0x18] sm:$0xf] %vm912_vm3, %v1033_v31 }
 0x16e   : > { %v811_v28 = vadd.f32 %v803_v13, %v751_v26 }
 0x16f   : > { %v1034_v25 = vpack.c.bf16 %v879_v15, %v879_v15 }
 0x170   : > { %v872_v10 = vadd.f32 %v864_v24, %v811_v28 }
 0x171   : > { %920 = vst.msk [vmem:[%s1937_s6 + $0x1c] sm:$0xf] %vm912_vm3, %v1034_v25 }
 0x172   : > { %v1027_v40 = vpack.c.bf16 %v872_v10, %v872_v10 }
 0x174   : > { %913 = vst.msk [vmem:[%s1937_s6] sm:$0xf] %vm912_vm3, %v1027_v40 }
 0x175 PF: > { %p15_p1 = scmp.ge.s32.totalorder %s1308_s25, 4   ;;  %s2110_s15 = smov %s1217_s16 }
 0x176   : > { %s2111_s16 = smov %s1221_s17  ;;  %s2112_s17 = smov %s1337_s14 }
 0x177   : > { %s2113_s18 = smov %s1308_s25  ;;  %17 = sbr.rel (!%p15_p1) target bundleno = 4 (0x4), region = 80 }
 0x17e   :  { %942 = vsyncpa [#allocation3], 1 }
 0x17f   :  { %944 = vsyncpa [#allocation3 + $0x1], 1 }
 0x180   :  { %945 = vsyncpa [#allocation5], 1 }

// kernel: _lambda_.5
= control target key start
LH: loop header
LB: loop body
LE: loop exit
PB: predicated region body
PF: predicated region fallthrough
CT: control target
= control target key end

     0   :  { %9 = vsyncpa [#allocation4], 0  ;;  %s2614_s0 = inlined_call_operand.vmem [shape: f32[2], index: 0, kind: input, shape index: {}]   ;;  %s2615_s1 = inlined_call_operand.vmem [shape: bf16[2,64,16], index: 1, kind: input, shape index: {}]   ;;  %s2616_s2 = inlined_call_operand.vmem [shape: bf16[2,64,32], index: 2, kind: input, shape index: {}]   ;;  %s2617_s3 = inlined_call_operand.vmem [shape: bf16[16,16], index: 3, kind: input, shape index: {}]   ;;  %s2618_s4 = inlined_call_operand.hbm [shape: f32[2,64,16], index: 4, kind: output, shape index: {}]  }
   0x1   :  { %10 = vsyncpa [#allocation3], 0 }
   0x2   :  { %12 = vsyncpa [#allocation3 + $0x1], 0  ;;  %s2037_s15 = smov 0   ;;  %s2039_s16 = smov 0  }
   0x3   :  { %s2041_s17 = smov 0   ;;  %s2043_s18 = smov 0  }
   0x4   :  { %s2045_s19 = smov 0   ;;  %s2047_s20 = smov 0  }
   0x5 LB: > { %s1487_s21 = sadd.s32 4294967295, %s2003_s20   ;;  %s1488_s22 = sadd.s32 4294967294, %s2003_s20   ;;  %s2003_s20 = sphi %s2047_s20, %s18_s20   ;;  %s1999_s19 = sphi %s2045_s19, %s2627_s19   ;;  %s1995_s18 = sphi %s2043_s18, %s2626_s18   ;;  %s1991_s17 = sphi %s2041_s17, %s2625_s17   ;;  %s1987_s16 = sphi %s2039_s16, %s2624_s16   ;;  %s1983_s15 = sphi %s2037_s15, %s2623_s15  }
   0x6   : > { %s30_s23 = sadd.s32 1, %s1999_s19  ;;  %s135_s24 = sadd.s32 1, %s1991_s17 }
   0x7   : > { %p32_p0 = scmp.ge.s32.totalorder %s30_s23, 2  ;;  %p145_p1 = scmp.ne.s32.totalorder %s1991_s17, %s1987_s16 }
   0x8   : > { %p146_p2 = scmp.eq.s32.totalorder %s1487_s21, 1  ;;  %p151_p3 = scmp.ne.s32.totalorder %s1987_s16, %s1983_s15 }
   0x9   : > { %s2629_s23 = smov (%p32_p0, %s30_s23), 0  ;;  %p152_p5 = scmp.eq.s32.totalorder %s1488_s22, 1 }
   0xa   : > { %p2077_p4 = por %p146_p2, %p145_p1  ;;  %s130_s26 = ssub.s32 %s1999_s19, %s2629_s23 }
   0xb   : > { %p1489_p6 = scmp.ge.s32.totalorder %s2003_s20, 1  ;;  %p133_p7 = scmp.eq.s32.totalorder %s130_s26, 0 }
   0xc   : > { %p2084_p8 = por %p152_p5, %p151_p3  ;;  %p159_p9 = scmp.lt.s32.totalorder %s2003_s20, 3 }
   0xd   : > { %s2090_s28 = scalar_select %p133_p7, %s1991_s17, %s135_s24  }
   0xe   : > { %p2092_p10 = pnand %p1489_p6, %p159_p9  ;;  %p2096_p11 = scmp.eq.s32.totalorder %s1487_s21, 0 }
   0xf   : > { %s172_s7 = sshll.u32 %s2614_s0, 4  ;;  %s173_s7 = int_to_ptr.vmem [resolvable:$true] %s172_s7 }
  0x10   : > { %p1705_p12 = pneg %p2092_p10  ;;  %s1906_s8 = scalar_lea.vmem %s173_s7, 16 }
  0x11   : > { %p1907_p0 = scmp.ne.s32.totalorder %s173_s7, %s1906_s8  ;;  %p1914_p5 = scmp.lt.s32.totalorder %s173_s7, %s173_s7 }
  0x12   : > { %p1706_p13 = pnand %p2096_p11, %p1705_p12  ;;  %p1915_p6 = scmp.lt.s32.totalorder %s1906_s8, %s1906_s8 }
  0x14   : > { %p1908_p1 = pneg %p1706_p13  ;;  %p1916_p7 = por %p1915_p6, %p1914_p5 }
  0x16   : > { %p1909_p2 = pnand %p1908_p1, %p1907_p0 }
  0x18   : > { %p1910_p3 = pneg %p1909_p2 }
  0x1a   : > { %p1917_p9 = pnand %p1916_p7, %p1910_p3 }
  0x1c   : > { %1920 = shalt.err (!%p1917_p9)
}
  0x1d   : > { %s2005_s9 = smov [#allocation2]   ;;  %209 = sbr.rel (%p2092_p10) target bundleno = 1917 (0x77d), region = 36 }
  0x1e   : > { %1708 = dma.vmem_to_smem (!%p1706_p13), %s173_s7, 16, %s2005_s9, [#allocation4]  }
  0x24   : > { %1974 = dma.done.wait (%p2096_p11), [#allocation4], 16  }
  0x25   : > { %1976 = vsyncadd (%p2096_p11), [#allocation4], 4294967280 }
  0x26   : > { %215 = sfence }
  0x27   : > { %p246_p12 = scmp.lt.s32.totalorder %s1995_s18, 1  ;;  %vm302_vm0 = vcmask 64512   ;;  %s2006_s26 = smov 120   ;;  %vm514_vm1 = vcmask 523264   ;;  %vm1210_vm2 = vcmask 1043456   ;;  %vm1359_vm3 = vcmask 130048  }
  0x28   : > { %s504_s29 = sld [smem:[#allocation2]]  ;;  %s2007_s30 = smov 112  }
  0x29   : > { %s247_s10 = scalar_select %p246_p12, %s1995_s18, 1 }
  0x2a   : > { %s1515_s5 = sld [smem:[#allocation2 + $0x1]]  ;;  %s2008_s6 = smov 104  }
  0x2b   : > { %s1533_s11 = sshll.u32 %s247_s10, 5 }
  0x2c   : > { %s259_s14 = scalar_lea.vmem %s2616_s2, %s1533_s11  ;;  %s2165_s24 = scalar_lea.vmem %s2615_s1, %s1533_s11 }
  0x2d   : > { %v2118_v0 = vld [vmem:[%s259_s14] sm:$0xff]   ;;  %v2120_v1 = vld [vmem:[%s259_s14 + $0x8] sm:$0xff]   ;;  %v2122_v2 = vld [vmem:[%s259_s14 + $0x10] sm:$0xff]   ;;  %s242_s11 = sand.u32 1, %s1987_s16  }
  0x2e   : > { %v2125_v3 = vunpack.c.l.bf16 %v2118_v0  ;;  %v2128_v4 = vunpack.c.l.bf16 %v2120_v1  ;;  %v2131_v5 = vunpack.c.h.bf16 %v2118_v0  ;;  %v2134_v6 = vunpack.c.h.bf16 %v2120_v1  ;;  %v2156_v13 = vld [vmem:[%s259_s14 + $0x18] sm:$0xff]   ;;  %v1537_v22 = vld [vmem:[%s2165_s24] sm:$0xff]   ;;  %v1552_v29 = vld [vmem:[%s2165_s24 + $0x8] sm:$0xff]   ;;  %s1494_s12 = sshll.u32 %s242_s11, 6  ;;  %s1535_s14 = sshll.u32 %s1995_s18, 10 }
  0x2f   : > { %v2137_v7 = vunpack.c.h.bf16 %v2122_v2  ;;  %v2140_v8 = vunpack.c.l.bf16 %v2122_v2  ;;  %v2168_v16 = vunpack.c.h.bf16 %v2156_v13  ;;  %v2171_v17 = vunpack.c.l.bf16 %v2156_v13  ;;  %v1553_v36 = vld [vmem:[%s2165_s24 + $0x10] sm:$0xff]   ;;  %v1554_v43 = vld [vmem:[%s2165_s24 + $0x18] sm:$0xff]   ;;  %s244_s13 = scalar_lea.vmem [#allocation5], %s1494_s12  ;;  %s2568_s18 = scalar_lea.sflag [#allocation3], %s242_s11 }
  0x30   : > { %v2144_v9 = vmul.f32 %v2125_v3, %v2125_v3  ;;  %v2148_v10 = vmul.f32 %v2128_v4, %v2128_v4  ;;  %v352_v11 = vmul.f32 %v2131_v5, %v2131_v5  ;;  %v2154_v12 = vmul.f32 %v2134_v6, %v2134_v6  ;;  %s1384_s21 = sshll.u32 %s244_s13, 4  ;;  %s2563_s21 = int_to_ptr.vmem [resolvable:$true] %s1384_s21 }
  0x31   : > { %v356_v20 = vmul.f32 %v2137_v7, %v2137_v7  ;;  %v355_v21 = vmul.f32 %v2140_v8, %v2140_v8  ;;  %v358_v23 = vmul.f32 %v2168_v16, %v2168_v16  ;;  %v357_v24 = vmul.f32 %v2171_v17, %v2171_v17 }
  0x32   : > { %v359_v14 = vsel %vm302_vm0, %v2144_v9, 0.0  ;;  %v365_v15 = vsel %vm302_vm0, %v2148_v10, 0.0  ;;  %v362_v18 = vsel %vm302_vm0, %v352_v11, 0.0  ;;  %v368_v19 = vsel %vm302_vm0, %v2154_v12, 0.0 }
  0x33   : > { %360 = vadd.xlane.f32.xlu0 %v359_v14  ;;  %366 = vadd.xlane.f32.xlu1 %v365_v15  ;;  %v374_v25 = vsel %vm302_vm0, %v356_v20, 0.0  ;;  %v371_v26 = vsel %vm302_vm0, %v355_v21, 0.0  ;;  %v2187_v27 = vunpack.c.h.bf16 %v1537_v22  ;;  %v2189_v28 = vunpack.c.l.bf16 %v1537_v22 }
  0x34   : > { %v380_v30 = vsel %vm302_vm0, %v358_v23, 0.0  ;;  %v377_v31 = vsel %vm302_vm0, %v357_v24, 0.0  ;;  %v2198_v34 = vunpack.c.h.bf16 %v1552_v29  ;;  %v2200_v35 = vunpack.c.l.bf16 %v1552_v29 }
  0x35   : > { %v295_v32 = vmul.f32 %v2187_v27, %v2187_v27  ;;  %v294_v33 = vmul.f32 %v2189_v28, %v2189_v28  ;;  %v2203_v37 = vunpack.c.h.bf16 %v1553_v36  ;;  %v2205_v38 = vunpack.c.l.bf16 %v1553_v36 }
  0x36   : > { %v297_v41 = vmul.f32 %v2198_v34, %v2198_v34  ;;  %v296_v42 = vmul.f32 %v2200_v35, %v2200_v35  ;;  %v2214_v44 = vunpack.c.h.bf16 %v1554_v43  ;;  %v2216_v45 = vunpack.c.l.bf16 %v1554_v43 }
  0x37   : > { %363 = vadd.xlane.f32.xlu0 %v362_v18  ;;  %369 = vadd.xlane.f32.xlu1 %v368_v19  ;;  %v306_v39 = vsel %vm302_vm0, %v295_v32, 0.0  ;;  %v303_v40 = vsel %vm302_vm0, %v294_v33, 0.0  ;;  %v299_v48 = vmul.f32 %v2203_v37, %v2203_v37  ;;  %v298_v49 = vmul.f32 %v2205_v38, %v2205_v38 }
  0x38   : > { %v312_v46 = vsel %vm302_vm0, %v297_v41, 0.0  ;;  %v309_v47 = vsel %vm302_vm0, %v296_v42, 0.0  ;;  %v301_v52 = vmul.f32 %v2214_v44, %v2214_v44  ;;  %v300_v53 = vmul.f32 %v2216_v45, %v2216_v45 }
  0x39   : > { %v318_v50 = vsel %vm302_vm0, %v299_v48, 0.0  ;;  %v315_v51 = vsel %vm302_vm0, %v298_v49, 0.0 }
  0x3a   : > { %v324_v54 = vsel %vm302_vm0, %v301_v52, 0.0  ;;  %v321_v55 = vsel %vm302_vm0, %v300_v53, 0.0 }
  0x3b   : > { %375 = vadd.xlane.f32.xlu1 %v374_v25  ;;  %372 = vadd.xlane.f32.xlu0 %v371_v26 }
  0x3f   : > { %381 = vadd.xlane.f32.xlu1 %v380_v30  ;;  %378 = vadd.xlane.f32.xlu0 %v377_v31 }
  0x43   : > { %307 = vadd.xlane.f32.xlu1 %v306_v39  ;;  %304 = vadd.xlane.f32.xlu0 %v303_v40 }
  0x47   : > { %313 = vadd.xlane.f32.xlu1 %v312_v46  ;;  %310 = vadd.xlane.f32.xlu0 %v309_v47 }
  0x4b   : > { %319 = vadd.xlane.f32.xlu1 %v318_v50  ;;  %316 = vadd.xlane.f32.xlu0 %v315_v51 }
  0x4f   : > { %325 = vadd.xlane.f32.xlu1 %v324_v54  ;;  %322 = vadd.xlane.f32.xlu0 %v321_v55 }
  0x60   : > { %811 = vrot.lane.b32.xlu1 %v352_v11, %s2006_s26 }
  0x64   : > { %813 = vrot.lane.b32.xlu1 %v2148_v10, %s2006_s26 }
  0x65   : > { %809 = vrot.lane.b32.xlu0 %v2144_v9, %s2006_s26 }
  0x68   : > { %815 = vrot.lane.b32.xlu1 %v2154_v12, %s2006_s26 }
  0x69   : > { %817 = vrot.lane.b32.xlu0 %v355_v21, %s2006_s26 }
  0x6c   : > { %819 = vrot.lane.b32.xlu1 %v356_v20, %s2006_s26 }
  0x6d   : > { %821 = vrot.lane.b32.xlu0 %v357_v24, %s2006_s26 }
  0x70   : > { %823 = vrot.lane.b32.xlu1 %v358_v23, %s2006_s26 }
  0x71   : > { %729 = vrot.lane.b32.xlu0 %v294_v33, %s2006_s26 }
  0x74   : > { %731 = vrot.lane.b32.xlu1 %v295_v32, %s2006_s26 }
  0x75   : > { %733 = vrot.lane.b32.xlu0 %v296_v42, %s2006_s26 }
  0x78   : > { %735 = vrot.lane.b32.xlu1 %v297_v41, %s2006_s26 }
  0x79   : > { %737 = vrot.lane.b32.xlu0 %v298_v49, %s2006_s26 }
  0x7c   : > { %739 = vrot.lane.b32.xlu1 %v299_v48, %s2006_s26 }
  0x7d   : > { %741 = vrot.lane.b32.xlu0 %v300_v53, %s2006_s26 }
  0x80   : > { %743 = vrot.lane.b32.xlu1 %v301_v52, %s2006_s26 }
  0xc0   : > { %v361_v56 = vpop.xlane.xlu0 %360  ;;  %v367_v57 = vpop.xlane.xlu1 %366 }
  0xc1   : > { %v383_v58 = vmax.f32 %v361_v56, 1e-24  ;;  %v385_v59 = vmax.f32 %v367_v57, 1e-24 }
  0xc3   : > { %1778 = vrsqrt.f32 %v385_v59 }
  0xc4   : > { %v364_v60 = vpop.xlane.xlu0 %363  ;;  %v370_v61 = vpop.xlane.xlu1 %369  ;;  %1780 = vrsqrt.f32 %v383_v58 }
  0xc5   : > { %v384_v62 = vmax.f32 %v364_v60, 1e-24  ;;  %v386_v63 = vmax.f32 %v370_v61, 1e-24 }
  0xc7   : > { %1782 = vrsqrt.f32 %v384_v62 }
  0xc8   : > { %1784 = vrsqrt.f32 %v386_v63  ;;  %v376_v9 = vpop.xlane.xlu1 %375  ;;  %v373_v10 = vpop.xlane.xlu0 %372 }
  0xc9   : > { %v388_v11 = vmax.f32 %v376_v9, 1e-24  ;;  %v387_v12 = vmax.f32 %v373_v10, 1e-24 }
  0xcb   : > { %1786 = vrsqrt.f32 %v388_v11 }
  0xcc   : > { %1788 = vrsqrt.f32 %v387_v12  ;;  %v382_v14 = vpop.xlane.xlu1 %381  ;;  %v379_v15 = vpop.xlane.xlu0 %378 }
  0xcd   : > { %v390_v18 = vmax.f32 %v382_v14, 1e-24  ;;  %v1779_v19 = vpop.eup %1778  ;;  %v389_v20 = vmax.f32 %v379_v15, 1e-24 }
  0xce   : > { %v1781_v21 = vpop.eup %1780  ;;  %v401_v25 = vmul.f32 %v1779_v19, %v2128_v4 }
  0xcf   : > { %1790 = vrsqrt.f32 %v390_v18  ;;  %v399_v31 = vmul.f32 %v1781_v21, %v2125_v3 }
  0xd0   : > { %v308_v22 = vpop.xlane.xlu1 %307  ;;  %v305_v23 = vpop.xlane.xlu0 %304  ;;  %1792 = vrsqrt.f32 %v389_v20 }
  0xd1   : > { %v1783_v24 = vpop.eup %1782  ;;  %v328_v26 = vmax.f32 %v308_v22, 1e-24  ;;  %v327_v29 = vmax.f32 %v305_v23, 1e-24 }
  0xd2   : > { %v1785_v30 = vpop.eup %1784  ;;  %v400_v32 = vmul.f32 %v1783_v24, %v2131_v5 }
  0xd3   : > { %v402_v33 = vmul.f32 %v1785_v30, %v2134_v6  ;;  %1794 = vrsqrt.f32 %v328_v26 }
  0xd4   : > { %v411_v36 = vpack.c.bf16 %v400_v32, %v399_v31  ;;  %1796 = vrsqrt.f32 %v327_v29  ;;  %v314_v43 = vpop.xlane.xlu1 %313  ;;  %v311_v46 = vpop.xlane.xlu0 %310 }
  0xd5   : > { %v1787_v39 = vpop.eup %1786  ;;  %v412_v40 = vpack.c.bf16 %v402_v33, %v401_v25  ;;  %v330_v50 = vmax.f32 %v314_v43, 1e-24  ;;  %v329_v53 = vmax.f32 %v311_v46, 1e-24 }
  0xd6   : > { %v1789_v41 = vpop.eup %1788  ;;  %1689 = vmatprep.subr.msk.bf16.mxu0 %vm302_vm0, %v411_v36  ;;  %v428_v42 = vsel %vm302_vm0, %v411_v36, 0  ;;  %v404_v48 = vmul.f32 %v1787_v39, %v2137_v7 }
  0xd7   : > { %1598 = vmatpush3.bf16.xpose.msra.mxu0 %v428_v42  ;;  %v403_v47 = vmul.f32 %v1789_v41, %v2140_v8  ;;  %v431_v59 = vsel %vm302_vm0, %v412_v40, 0  ;;  %1798 = vrsqrt.f32 %v330_v50 }
  0xd8   : > { %1690 = vmatprep.subr.msk.bf16.mxu0 %vm302_vm0, %v412_v40  ;;  %v320_v51 = vpop.xlane.xlu1 %319  ;;  %v317_v55 = vpop.xlane.xlu0 %316  ;;  %1800 = vrsqrt.f32 %v329_v53 }
  0xd9   : > { %v1791_v49 = vpop.eup %1790  ;;  %v413_v54 = vpack.c.bf16 %v404_v48, %v403_v47  ;;  %v332_v57 = vmax.f32 %v320_v51, 1e-24  ;;  %v331_v60 = vmax.f32 %v317_v55, 1e-24 }
  0xda   : > { %v1793_v52 = vpop.eup %1792  ;;  %v406_v9 = vmul.f32 %v1791_v49, %v2168_v16 }
  0xdb   : > { %v405_v63 = vmul.f32 %v1793_v52, %v2171_v17  ;;  %1802 = vrsqrt.f32 %v332_v57  ;;  %v434_v14 = vsel %vm302_vm0, %v413_v54, 0 }
  0xdc   : > { %v326_v11 = vpop.xlane.xlu1 %325  ;;  %1804 = vrsqrt.f32 %v331_v60  ;;  %v323_v12 = vpop.xlane.xlu0 %322 }
  0xdd   : > { %v1795_v56 = vpop.eup %1794  ;;  %v414_v15 = vpack.c.bf16 %v406_v9, %v405_v63  ;;  %v334_v18 = vmax.f32 %v326_v11, 1e-24  ;;  %v333_v19 = vmax.f32 %v323_v12, 1e-24 }
  0xde   : > { %v1797_v58 = vpop.eup %1796  ;;  %v344_v61 = vmul.f32 %v1795_v56, %v2187_v27 }
  0xdf   : > { %1600 = vmatpush3.bf16.xpose.msra.mxu0 %v431_v59  ;;  %v343_v62 = vmul.f32 %v1797_v58, %v2189_v28  ;;  %1806 = vrsqrt.f32 %v334_v18  ;;  %v437_v24 = vsel %vm302_vm0, %v414_v15, 0 }
  0xe0   : > { %1691 = vmatprep.subr.msk.bf16.mxu0 %vm302_vm0, %v413_v54  ;;  %1808 = vrsqrt.f32 %v333_v19  ;;  %v812_v31 = vpop.permute.xlu1 %811  ;;  %v810_v32 = vpop.permute.xlu0 %809 }
  0xe1   : > { %v407_v10 = vpack.c.bf16 %v344_v61, %v343_v62  ;;  %v1799_v20 = vpop.eup %1798  ;;  %v836_v39 = vsel %vm302_vm0, %v812_v31, 0.0  ;;  %v833_v40 = vsel %vm302_vm0, %v810_v32, 0.0 }
  0xe2   : > { %v1801_v21 = vpop.eup %1800  ;;  %v346_v26 = vmul.f32 %v1799_v20, %v2198_v34  ;;  %837 = vadd.xlane.f32.xlu1 %v836_v39  ;;  %834 = vadd.xlane.f32.xlu0 %v833_v40 }
  0xe3   : > { %1605 = vmatprep.mubr.msk.bf16.mxu0 %vm302_vm0, %v407_v10  ;;  %v345_v25 = vmul.f32 %v1801_v21, %v2200_v35 }
  0xe4   : > { %v814_v43 = vpop.permute.xlu1 %813  ;;  %v818_v46 = vpop.permute.xlu0 %817 }
  0xe5   : > { %v1803_v22 = vpop.eup %1802  ;;  %v408_v36 = vpack.c.bf16 %v346_v26, %v345_v25  ;;  %v839_v49 = vsel %vm302_vm0, %v814_v43, 0.0  ;;  %v845_v50 = vsel %vm302_vm0, %v818_v46, 0.0 }
  0xe6   : > { %v1805_v23 = vpop.eup %1804  ;;  %v348_v30 = vmul.f32 %v1803_v22, %v2203_v37  ;;  %840 = vadd.xlane.f32.xlu0 %v839_v49 }
  0xe7   : > { %1602 = vmatpush3.bf16.xpose.msra.mxu0 %v434_v14  ;;  %v347_v29 = vmul.f32 %v1805_v23, %v2205_v38 }
  0xe8   : > { %1692 = vmatprep.subr.msk.bf16.mxu0 %vm302_vm0, %v414_v15  ;;  %v816_v51 = vpop.permute.xlu1 %815  ;;  %v822_v52 = vpop.permute.xlu0 %821 }
  0xe9   : > { %v1807_v33 = vpop.eup %1806  ;;  %v409_v42 = vpack.c.bf16 %v348_v30, %v347_v29  ;;  %v842_v54 = vsel %vm302_vm0, %v816_v51, 0.0  ;;  %v851_v55 = vsel %vm302_vm0, %v822_v52, 0.0 }
  0xea   : > { %v1809_v41 = vpop.eup %1808  ;;  %v350_v48 = vmul.f32 %v1807_v33, %v2214_v44  ;;  %843 = vadd.xlane.f32.xlu1 %v842_v54  ;;  %846 = vadd.xlane.f32.xlu0 %v845_v50 }
  0xeb   : > { %v349_v47 = vmul.f32 %v1809_v41, %v2216_v45 }
  0xec   : > { %v820_v56 = vpop.permute.xlu1 %819  ;;  %v730_v57 = vpop.permute.xlu0 %729 }
  0xed   : > { %v410_v53 = vpack.c.bf16 %v350_v48, %v349_v47  ;;  %v848_v58 = vsel %vm302_vm0, %v820_v56, 0.0  ;;  %v753_v59 = vsel %vm302_vm0, %v730_v57, 0.0 }
  0xee   : > { %849 = vadd.xlane.f32.xlu1 %v848_v58  ;;  %852 = vadd.xlane.f32.xlu0 %v851_v55 }
  0xef   : > { %1604 = vmatpush3.bf16.xpose.msra.mxu0 %v437_v24 }
  0xf0   : > { %v824_v60 = vpop.permute.xlu1 %823  ;;  %v734_v61 = vpop.permute.xlu0 %733 }
  0xf1   : > { %v854_v62 = vsel %vm302_vm0, %v824_v60, 0.0  ;;  %v759_v63 = vsel %vm302_vm0, %v734_v61, 0.0 }
  0xf2   : > { %855 = vadd.xlane.f32.xlu1 %v854_v62  ;;  %754 = vadd.xlane.f32.xlu0 %v753_v59 }
  0xf4   : > { %v732_v9 = vpop.permute.xlu1 %731  ;;  %v738_v20 = vpop.permute.xlu0 %737 }
  0xf5   : > { %v756_v10 = vsel %vm302_vm0, %v732_v9, 0.0  ;;  %v765_v59 = vsel %vm302_vm0, %v738_v20, 0.0 }
  0xf6   : > { %1606 = vmatmul.mubr.msk.bf16.vlgmr.msra.gmra.mrb[0].mxu0 %vm302_vm0, %v408_v36  ;;  %757 = vadd.xlane.f32.xlu1 %v756_v10 }
  0xf7   : > { %1609 = vmatprep.mubr.msk.bf16.mxu0 %vm302_vm0, %v409_v42  ;;  %760 = vadd.xlane.f32.xlu0 %v759_v63  ;;  %v505_v42 = vstv %s504_s29  ;;  %s1921_s29 = scalar_lea.vmem %s2563_s21, 1024 }
  0xf8   : > { %v736_v11 = vpop.permute.xlu1 %735  ;;  %v742_v21 = vpop.permute.xlu0 %741  ;;  %p1922_p10 = scmp.ne.s32.totalorder %s2563_s21, %s1921_s29 }
  0xf9   : > { %v762_v12 = vsel %vm302_vm0, %v736_v11, 0.0  ;;  %v771_v11 = vsel %vm302_vm0, %v742_v21, 0.0 }
  0xfa   : > { %763 = vadd.xlane.f32.xlu1 %v762_v12  ;;  %p1923_p11 = pnand %p1922_p10, %p2077_p4 }
  0xfc   : > { %v740_v14 = vpop.permute.xlu1 %739  ;;  %p1924_p13 = pneg %p1923_p11 }
  0xfd   : > { %v768_v15 = vsel %vm302_vm0, %v740_v14, 0.0 }
  0xfe   : > { %1610 = vmatmul.mubr.msk.bf16.gmra.mrb[4].mxu0 %vm302_vm0, %v410_v53  ;;  %769 = vadd.xlane.f32.xlu1 %v768_v15 }
 0x100   : > { %v744_v18 = vpop.permute.xlu1 %743 }
 0x101   : > { %v774_v19 = vsel %vm302_vm0, %v744_v18, 0.0 }
 0x102   : > { %775 = vadd.xlane.f32.xlu1 %v774_v19 }
 0x16f   : > { %v838_v22 = vpop.xlane.xlu1 %837  ;;  %v835_v23 = vpop.xlane.xlu0 %834 }
 0x170   : > { %v858_v24 = vmax.f32 %v838_v22, 1e-24  ;;  %v857_v25 = vmax.f32 %v835_v23, 1e-24 }
 0x172   : > { %1810 = vrsqrt.f32 %v858_v24 }
 0x173   : > { %v2295_v29 = vpop.xlane.xlu0 %840  ;;  %1812 = vrsqrt.f32 %v857_v25 }
 0x177   : > { %v2293_v26 = vpop.xlane.xlu1 %843  ;;  %v2299_v31 = vpop.xlane.xlu0 %846 }
 0x17b   : > { %v2297_v30 = vpop.xlane.xlu1 %849  ;;  %v853_v36 = vpop.xlane.xlu0 %852 }
 0x17c   : > { %v1811_v33 = vpop.eup %1810  ;;  %v863_v41 = vmax.f32 %v853_v36, 1e-24 }
 0x17d   : > { %v1813_v39 = vpop.eup %1812  ;;  %v2305_v46 = vmul.f32 %v1811_v33, %v2131_v5 }
 0x17e   : > { %v2302_v43 = vmul.f32 %v1813_v39, %v2125_v3 }
 0x17f   : > { %v856_v32 = vpop.xlane.xlu1 %855  ;;  %v2344_v25 = vpop.xlane.xlu0 %754 }
 0x180   : > { %v864_v40 = vmax.f32 %v856_v32, 1e-24  ;;  %v885_v48 = vpack.c.bf16 %v2305_v46, %v2302_v43 }
 0x182   : > { %1814 = vrsqrt.f32 %v864_v40 }
 0x183   : > { %1816 = vrsqrt.f32 %v863_v41  ;;  %v2340_v23 = vpop.xlane.xlu1 %757 }
 0x184   : > { %v2348_v33 = vpop.xlane.xlu0 %760 }
 0x187   : > { %v2342_v24 = vpop.xlane.xlu1 %763 }
 0x188   : > { %v780_v43 = vmax.f32 %v2342_v24, 1e-24 }
 0x18b   : > { %v2346_v32 = vpop.xlane.xlu1 %769 }
 0x18c   : > { %v1815_v61 = vpop.eup %1814 }
 0x18d   : > { %v1817_v63 = vpop.eup %1816  ;;  %v2319_v14 = vmul.f32 %v1815_v61, %v2168_v16 }
 0x18e   : > { %v2316_v12 = vmul.f32 %v1817_v63, %v2171_v17 }
 0x18f   : > { %v2350_v36 = vpop.xlane.xlu1 %775 }
 0x190   : > { %v888_v15 = vpack.c.bf16 %v2319_v14, %v2316_v12 }
 0x1c9   : > { %v1607_v47 = vpop.f32.mrb[0].mxu0 }
 0x1ca   : > { %v508_v49 = vmul.f32 %v1607_v47, %v505_v42  ;;  %v473_v50 = vpop.f32.mrb[1].mxu0 }
 0x1cb   : > { %v1608_v51 = vpop.f32.mrb[2].mxu0  ;;  %v506_v52 = vmul.f32 %v505_v42, %v473_v50 }
 0x1cc   : > { %v509_v53 = vmul.f32 %v1608_v51, %v505_v42  ;;  %v476_v54 = vpop.f32.mrb[3].mxu0  ;;  %v521_v55 = vsel %vm514_vm1, %v508_v49, -inf }
 0x1cd   : > { %522 = vmax.xlane.f32.xlu0 %v521_v55  ;;  %v507_v3 = vmul.f32 %v505_v42, %v476_v54  ;;  %v515_v56 = vsel %vm514_vm1, %v506_v52, -inf }
 0x1ce   : > { %v524_v5 = vsel %vm514_vm1, %v509_v53, -inf }
 0x1cf   : > { %525 = vmax.xlane.f32.xlu1 %v524_v5  ;;  %v518_v58 = vsel %vm514_vm1, %v507_v3, -inf }
 0x1d1   : > { %516 = vmax.xlane.f32.xlu0 %v515_v56  ;;  %v1611_v57 = vpop.f32.mrb[4].mxu0 }
 0x1d2   : > { %v489_v60 = vpop.f32.mrb[5].mxu0  ;;  %v512_v10 = vmul.f32 %v1611_v57, %v505_v42 }
 0x1d3   : > { %519 = vmax.xlane.f32.xlu1 %v518_v58  ;;  %v1612_v62 = vpop.f32.mrb[6].mxu0  ;;  %v2323_v18 = vmul.f32 %v505_v42, %v489_v60 }
 0x1d4   : > { %v492_v9 = vpop.f32.mrb[7].mxu0  ;;  %v533_v19 = vsel %vm514_vm1, %v512_v10, -inf  ;;  %v2326_v20 = vmul.f32 %v1612_v62, %v505_v42 }
 0x1d5   : > { %766 = vadd.xlane.f32.xlu0 %v765_v59  ;;  %v527_v21 = vsel %vm514_vm1, %v2323_v18, -inf  ;;  %v2335_v16 = vmul.f32 %v505_v42, %v492_v9 }
 0x1d6   : > { %v536_v17 = vsel %vm514_vm1, %v2326_v20, -inf }
 0x1d7   : > { %v530_v22 = vsel %vm514_vm1, %v2335_v16, -inf }
 0x1d9   : > { %772 = vadd.xlane.f32.xlu0 %v771_v11  ;;  %v862_v11 = vmax.f32 %v2297_v30, 1e-24 }
 0x1dd   : > { %534 = vmax.xlane.f32.xlu0 %v533_v19 }
 0x1e1   : > { %528 = vmax.xlane.f32.xlu0 %v527_v21 }
 0x1e4   : > { %629 = vrot.lane.b32.xlu1 %v2120_v1, %s2007_s30 }
 0x1e5   : > { %537 = vmax.xlane.f32.xlu0 %v536_v17 }
 0x1e8   : > { %631 = vrot.lane.b32.xlu1 %v2122_v2, %s2007_s30 }
 0x1fb   : > { %627 = vrot.lane.b32.xlu0 %v2118_v0, %s2007_s30 }
 0x20c   : > { %531 = vmax.xlane.f32.xlu1 %v530_v22 }
 0x21d   : > { %633 = vrot.lane.b32.xlu1 %v2156_v13, %s2007_s30  ;;  %s2009_s30 = smov [#allocation5]  }
 0x25a   : > { %v523_v39 = vpop.xlane.xlu0 %522 }
 0x25b   : > { %v541_v40 = vsub.f32 %v508_v49, %v523_v39  ;;  %v860_v49 = vmax.f32 %v2293_v26, 1e-24  ;;  %v861_v26 = vmax.f32 %v2299_v31, 1e-24 }
 0x25c   : > { %v526_v41 = vpop.xlane.xlu1 %525 }
 0x25d   : > { %v551_v42 = vmul.f32 1.442695, %v541_v40  ;;  %v542_v47 = vsub.f32 %v509_v53, %v526_v41  ;;  %v859_v53 = vmax.f32 %v2295_v29, 1e-24 }
 0x25e   : > { %v517_v50 = vpop.xlane.xlu0 %516 }
 0x25f   : > { %1818 = vpow2.f32 %v551_v42  ;;  %v553_v51 = vmul.f32 1.442695, %v542_v47  ;;  %v539_v54 = vsub.f32 %v506_v52, %v517_v50 }
 0x260   : > { %v520_v55 = vpop.xlane.xlu1 %519 }
 0x261   : > { %1820 = vpow2.f32 %v553_v51  ;;  %v547_v5 = vmul.f32 1.442695, %v539_v54  ;;  %v540_v56 = vsub.f32 %v507_v3, %v520_v55 }
 0x262   : > { %v2352_v57 = vpop.xlane.xlu0 %766 }
 0x263   : > { %1822 = vpow2.f32 %v547_v5  ;;  %v549_v58 = vmul.f32 1.442695, %v540_v56 }
 0x264   : > { %v630_v41 = vpop.permute.xlu1 %629 }
 0x265   : > { %1824 = vpow2.f32 %v549_v58 }
 0x266   : > { %v2354_v59 = vpop.xlane.xlu0 %772  ;;  %1826 = vrsqrt.f32 %v860_v49 }
 0x267   : > { %1828 = vrsqrt.f32 %v859_v53 }
 0x268   : > { %v632_v5 = vpop.permute.xlu1 %631 }
 0x269   : > { %v2356_v60 = vpop.eup %1818 }
 0x26a   : > { %v535_v61 = vpop.xlane.xlu0 %534  ;;  %v569_v52 = vsel %vm514_vm1, %v2356_v60, 0.0 }
 0x26b   : > { %v2362_v62 = vpop.eup %1820  ;;  %v545_v3 = vsub.f32 %v512_v10, %v535_v61  ;;  %570 = vadd.xlane.f32.xlu0 %v569_v52 }
 0x26c   : > { %v572_v63 = vsel %vm514_vm1, %v2362_v62, 0.0 }
 0x26d   : > { %v2366_v9 = vpop.eup %1822  ;;  %v559_v19 = vmul.f32 1.442695, %v545_v3  ;;  %573 = vadd.xlane.f32.xlu1 %v572_v63  ;;  %v778_v63 = vmax.f32 %v2340_v23, 1e-24 }
 0x26e   : > { %v529_v29 = vpop.xlane.xlu0 %528  ;;  %v563_v21 = vsel %vm514_vm1, %v2366_v9, 0.0 }
 0x26f   : > { %v2372_v17 = vpop.eup %1824  ;;  %1830 = vpow2.f32 %v559_v19  ;;  %v543_v10 = vsub.f32 %v2323_v18, %v529_v29  ;;  %564 = vadd.xlane.f32.xlu0 %v563_v21 }
 0x270   : > { %v566_v22 = vsel %vm514_vm1, %v2372_v17, 0.0  ;;  %1832 = vrsqrt.f32 %v862_v11  ;;  %v1827_v47 = vpop.eup %1826  ;;  %v777_v11 = vmax.f32 %v2344_v25, 1e-24 }
 0x271   : > { %v555_v30 = vmul.f32 1.442695, %v543_v10  ;;  %567 = vadd.xlane.f32.xlu1 %v566_v22  ;;  %1834 = vrsqrt.f32 %v861_v26  ;;  %v1829_v50 = vpop.eup %1828  ;;  %v876_v56 = vmul.f32 %v1827_v47, %v2134_v6 }
 0x272   : > { %v538_v39 = vpop.xlane.xlu0 %537 }
 0x273   : > { %1836 = vpow2.f32 %v555_v30  ;;  %v546_v31 = vsub.f32 %v2326_v20, %v538_v39  ;;  %v875_v20 = vmul.f32 %v1829_v50, %v2128_v4 }
 0x275   : > { %v561_v40 = vmul.f32 1.442695, %v546_v31  ;;  %v886_v53 = vpack.c.bf16 %v876_v56, %v875_v20 }
 0x276   : > { %v628_v42 = vpop.permute.xlu0 %627 }
 0x277   : > { %1838 = vpow2.f32 %v561_v40  ;;  %1613 = vmatprep.subr.bf16.mxu1 %v628_v42 }
 0x278   : > { %1614 = vmatpush3.bf16.msra.mxu1 %v628_v42  ;;  %1840 = vrsqrt.f32 %v778_v63 }
 0x279   : > { %v2378_v18 = vpop.eup %1830  ;;  %1615 = vmatprep.subr.bf16.mxu1 %v630_v41  ;;  %1842 = vrsqrt.f32 %v777_v11 }
 0x27a   : > { %v581_v51 = vsel %vm514_vm1, %v2378_v18, 0.0  ;;  %v1833_v54 = vpop.eup %1832 }
 0x27b   : > { %582 = vadd.xlane.f32.xlu0 %v581_v51  ;;  %v1835_v55 = vpop.eup %1834  ;;  %v878_v52 = vmul.f32 %v1833_v54, %v2137_v7  ;;  %v782_v7 = vmax.f32 %v2346_v32, 1e-24 }
 0x27c   : > { %1616 = vmatpush3.bf16.msra.mxu1 %v630_v41  ;;  %v877_v61 = vmul.f32 %v1835_v55, %v2140_v8  ;;  %v781_v8 = vmax.f32 %v2352_v57, 1e-24 }
 0x27d   : > { %v2384_v58 = vpop.eup %1836  ;;  %1617 = vmatprep.subr.bf16.mxu1 %v632_v5 }
 0x27e   : > { %v575_v49 = vsel %vm514_vm1, %v2384_v58, 0.0  ;;  %v887_v6 = vpack.c.bf16 %v878_v52, %v877_v61  ;;  %1844 = vrsqrt.f32 %v781_v8 }
 0x27f   : > { %576 = vadd.xlane.f32.xlu0 %v575_v49  ;;  %1846 = vrsqrt.f32 %v782_v7 }
 0x280   : > { %1618 = vmatpush3.bf16.msra.mxu1 %v632_v5 }
 0x281   : > { %v2390_v3 = vpop.eup %1838 }
 0x282   : > { %907 = vrot.lane.b32.xlu1 %v886_v53, %s2006_s26  ;;  %v584_v4 = vsel %vm514_vm1, %v2390_v3, 0.0  ;;  %v1841_v19 = vpop.eup %1840 }
 0x283   : > { %585 = vadd.xlane.f32.xlu0 %v584_v4  ;;  %v1843_v26 = vpop.eup %1842  ;;  %v794_v21 = vmul.f32 %v1841_v19, %v2187_v27 }
 0x284   : > { %v793_v29 = vmul.f32 %v1843_v26, %v2189_v28 }
 0x286   : > { %909 = vrot.lane.b32.xlu1 %v887_v6, %s2006_s26  ;;  %v881_v22 = vpack.c.bf16 %v794_v21, %v793_v29 }
 0x288   : > { %v1845_v10 = vpop.eup %1844 }
 0x289   : > { %v1847_v25 = vpop.eup %1846  ;;  %v797_v32 = vmul.f32 %v1845_v10, %v2205_v38 }
 0x28a   : > { %v798_v28 = vmul.f32 %v1847_v25, %v2203_v37  ;;  %v783_v37 = vmax.f32 %v2354_v59, 1e-24 }
 0x28c   : > { %v883_v27 = vpack.c.bf16 %v798_v28, %v797_v32 }
 0x299   : > { %v532_v23 = vpop.xlane.xlu1 %531  ;;  %905 = vrot.lane.b32.xlu0 %v885_v48, %s2006_s26  ;;  %v779_v48 = vmax.f32 %v2348_v33, 1e-24 }
 0x29a   : > { %v544_v57 = vsub.f32 %v2335_v16, %v532_v23  ;;  %v784_v16 = vmax.f32 %v2350_v36, 1e-24 }
 0x29c   : > { %v557_v30 = vmul.f32 1.442695, %v544_v57 }
 0x29d   : > { %893 = vrot.lane.b32.xlu0 %v881_v22, %s2006_s26  ;;  %v634_v39 = vpop.permute.xlu1 %633 }
 0x29e   : > { %1848 = vpow2.f32 %v557_v30  ;;  %1619 = vmatprep.subr.bf16.mxu1 %v634_v39 }
 0x29f   : > { %1620 = vmatpush3.bf16.msra.mxu1 %v634_v39  ;;  %1850 = vrsqrt.f32 %v780_v43 }
 0x2a0   : > { %1852 = vrsqrt.f32 %v779_v48 }
 0x2a1   : > { %897 = vrot.lane.b32.xlu0 %v883_v27, %s2006_s26  ;;  %1854 = vrsqrt.f32 %v783_v37 }
 0x2a2   : > { %1856 = vrsqrt.f32 %v784_v16 }
 0x2a8   : > { %v2412_v46 = vpop.eup %1848 }
 0x2a9   : > { %v578_v38 = vsel %vm514_vm1, %v2412_v46, 0.0  ;;  %v1851_v31 = vpop.eup %1850 }
 0x2aa   : > { %579 = vadd.xlane.f32.xlu1 %v578_v38  ;;  %v1853_v40 = vpop.eup %1852  ;;  %v796_v41 = vmul.f32 %v1851_v31, %v2198_v34 }
 0x2ab   : > { %v795_v24 = vmul.f32 %v1853_v40, %v2200_v35  ;;  %v1855_v42 = vpop.eup %1854 }
 0x2ac   : > { %v1857_v33 = vpop.eup %1856  ;;  %v799_v59 = vmul.f32 %v1855_v42, %v2216_v45 }
 0x2ad   : > { %v882_v47 = vpack.c.bf16 %v796_v41, %v795_v24  ;;  %v800_v36 = vmul.f32 %v1857_v33, %v2214_v44  ;;  %v1003_v24 = vstv %s1515_s5  ;;  %s1925_s5 = sshll.u32 %s2009_s30, 4  ;;  %s1926_s5 = int_to_ptr.vmem [resolvable:$false] %s1925_s5 }
 0x2ae   : > { %p1928_p0 = scmp.lt.s32.totalorder %s2563_s21, %s1926_s5 }
 0x2af   : > { %v884_v50 = vpack.c.bf16 %v800_v36, %v799_v59 }
 0x2bb   : > { %911 = vrot.lane.b32.xlu1 %v888_v15, %s2006_s26 }
 0x2bf   : > { %895 = vrot.lane.b32.xlu1 %v882_v47, %s2006_s26 }
 0x2c3   : > { %899 = vrot.lane.b32.xlu1 %v884_v50, %s2006_s26  ;;  %s2561_s26 = scalar_lea.hbm %s2618_s4, %s1535_s14 }
 0x2f8   : > { %v571_v35 = vpop.xlane.xlu0 %570 }
 0x2fa   : > { %v574_v51 = vpop.xlane.xlu1 %573 }
 0x2fb   : > { %1858 = vrcp.f32 %v574_v51 }
 0x2fc   : > { %v565_v34 = vpop.xlane.xlu0 %564 }
 0x2fd   : > { %1860 = vrcp.f32 %v565_v34 }
 0x2fe   : > { %1862 = vrcp.f32 %v571_v35  ;;  %v568_v54 = vpop.xlane.xlu1 %567 }
 0x2ff   : > { %1864 = vrcp.f32 %v568_v54 }
 0x305   : > { %v1859_v12 = vpop.eup %1858 }
 0x306   : > { %v598_v5 = vmul.f32 %v1859_v12, %v2362_v62  ;;  %v908_v62 = vpop.permute.xlu1 %907 }
 0x307   : > { %v1861_v14 = vpop.eup %1860 }
 0x308   : > { %v1863_v15 = vpop.eup %1862  ;;  %v583_v55 = vpop.xlane.xlu0 %582  ;;  %v595_v44 = vmul.f32 %v1861_v14, %v2366_v9  ;;  %v929_v9 = vsel %vm302_vm0, %v908_v62, 0 }
 0x309   : > { %v1865_v45 = vpop.eup %1864  ;;  %v597_v56 = vmul.f32 %v1863_v15, %v2356_v60 }
 0x30a   : > { %v596_v20 = vmul.f32 %v1865_v45, %v2372_v17  ;;  %v910_v60 = vpop.permute.xlu1 %909 }
 0x30b   : > { %v604_v61 = vpack.c.bf16 %v598_v5, %v597_v56  ;;  %v932_v17 = vsel %vm302_vm0, %v910_v60, 0 }
 0x30c   : > { %v577_v49 = vpop.xlane.xlu0 %576  ;;  %v603_v53 = vpack.c.bf16 %v596_v20, %v595_v44 }
 0x30e   : > { %1621 = vmatprep.mubr.msk.bf16.mxu1 %vm514_vm1, %v603_v53 }
 0x30f   : > { %1622 = vmatmul.mubr.msk.bf16.vlgmr.msra.gmra.mrb[0].mxu1 %vm514_vm1, %v604_v61 }
 0x310   : > { %v586_v52 = vpop.xlane.xlu0 %585 }
 0x311   : > { %1866 = vrcp.f32 %v586_v52 }
 0x312   : > { %1868 = vrcp.f32 %v577_v49 }
 0x313   : > { %1870 = vrcp.f32 %v583_v55 }
 0x314   : > { %v906_v4 = vpop.permute.xlu0 %905 }
 0x315   : > { %v926_v6 = vsel %vm302_vm0, %v906_v4, 0  ;;  %1693 = vmatprep.subr.msk.bf16.mxu1 %vm302_vm0, %v906_v4 }
 0x316   : > { %1630 = vmatpush3.bf16.xpose.msra.mxu1 %v926_v6 }
 0x317   : > { %1694 = vmatprep.subr.msk.bf16.mxu1 %vm302_vm0, %v908_v62 }
 0x318   : > { %v894_v32 = vpop.permute.xlu0 %893 }
 0x31b   : > { %v1867_v7 = vpop.eup %1866 }
 0x31c   : > { %v1869_v19 = vpop.eup %1868  ;;  %v602_v21 = vmul.f32 %v1867_v7, %v2390_v3  ;;  %v898_v28 = vpop.permute.xlu0 %897 }
 0x31d   : > { %v1871_v26 = vpop.eup %1870  ;;  %v599_v10 = vmul.f32 %v1869_v19, %v2384_v58 }
 0x31e   : > { %1632 = vmatpush3.bf16.xpose.msra.mxu1 %v929_v9  ;;  %v601_v25 = vmul.f32 %v1871_v26, %v2378_v18 }
 0x31f   : > { %1695 = vmatprep.subr.msk.bf16.mxu1 %vm302_vm0, %v910_v60 }
 0x320   : > { %v606_v22 = vpack.c.bf16 %v602_v21, %v601_v25 }
 0x326   : > { %1634 = vmatpush3.bf16.xpose.msra.mxu1 %v932_v17 }
 0x337   : > { %v580_v63 = vpop.xlane.xlu1 %579 }
 0x338   : > { %1872 = vrcp.f32 %v580_v63 }
 0x33b   : > { %v912_v11 = vpop.permute.xlu1 %911 }
 0x33c   : > { %v935_v8 = vsel %vm302_vm0, %v912_v11, 0  ;;  %1696 = vmatprep.subr.msk.bf16.mxu1 %vm302_vm0, %v912_v11 }
 0x33d   : > { %1636 = vmatpush3.bf16.xpose.msra.mxu1 %v935_v8 }
 0x33f   : > { %v896_v30 = vpop.permute.xlu1 %895 }
 0x342   : > { %v1873_v29 = vpop.eup %1872 }
 0x343   : > { %v600_v23 = vmul.f32 %v1873_v29, %v2412_v46  ;;  %v900_v58 = vpop.permute.xlu1 %899 }
 0x345   : > { %v605_v57 = vpack.c.bf16 %v600_v23, %v599_v10 }
 0x347   : > { %1625 = vmatprep.mubr.msk.bf16.mxu1 %vm514_vm1, %v605_v57 }
 0x348   : > { %1626 = vmatmul.mubr.msk.bf16.gmra.mrb[4].mxu1 %vm514_vm1, %v606_v22 }
 0x349   : > { %1637 = vmatprep.mubr.msk.bf16.mxu1 %vm302_vm0, %v894_v32 }
 0x350   : > { %1638 = vmatmul.mubr.msk.bf16.vlgmr.msra.gmra.mrb[8].mxu1 %vm302_vm0, %v896_v30 }
 0x351   : > { %1641 = vmatprep.mubr.msk.bf16.mxu1 %vm302_vm0, %v898_v28 }
 0x358   : > { %1642 = vmatmul.mubr.msk.bf16.gmra.mrb[12].mxu1 %vm302_vm0, %v900_v58 }
 0x3e2   : > { %v2453_v3 = vpop.f32.mrb[0].mxu1 }
 0x3e3   : > { %v2455_v18 = vpop.f32.mrb[1].mxu1 }
 0x3e4   : > { %v2457_v39 = vpop.f32.mrb[2].mxu1 }
 0x3e5   : > { %v717_v27 = vpack.c.bf16 %v2457_v39, %v2453_v3  ;;  %v2461_v43 = vpop.f32.mrb[3].mxu1 }
 0x3e6   : > { %v716_v46 = vpack.c.bf16 %v2461_v43, %v2455_v18 }
 0x41b   : > { %v2465_v48 = vpop.f32.mrb[4].mxu1 }
 0x41c   : > { %v2467_v38 = vpop.f32.mrb[5].mxu1 }
 0x41d   : > { %v2469_v37 = vpop.f32.mrb[6].mxu1 }
 0x41e   : > { %v719_v16 = vpack.c.bf16 %v2469_v37, %v2465_v48  ;;  %v2473_v31 = vpop.f32.mrb[7].mxu1 }
 0x41f   : > { %v718_v40 = vpack.c.bf16 %v2473_v31, %v2467_v38 }
 0x423   : > { %v1639_v41 = vpop.f32.mrb[8].mxu1 }
 0x424   : > { %v971_v42 = vpop.f32.mrb[9].mxu1  ;;  %v1006_v36 = vmul.f32 %v1639_v41, %v1003_v24 }
 0x425   : > { %v1004_v33 = vmul.f32 %v1003_v24, %v971_v42  ;;  %v1640_v47 = vpop.f32.mrb[10].mxu1 }
 0x426   : > { %v974_v59 = vpop.f32.mrb[11].mxu1  ;;  %v1007_v34 = vmul.f32 %v1640_v47, %v1003_v24  ;;  %v1018_v12 = vsel %vm514_vm1, %v1006_v36, -inf }
 0x427   : > { %v1005_v50 = vmul.f32 %v1003_v24, %v974_v59  ;;  %v1012_v35 = vsel %vm514_vm1, %v1004_v33, -inf }
 0x428   : > { %1013 = vmax.xlane.f32.xlu0 %v1012_v35  ;;  %v1021_v44 = vsel %vm514_vm1, %v1007_v34, -inf }
 0x429   : > { %v1015_v51 = vsel %vm514_vm1, %v1005_v50, -inf }
 0x42a   : > { %1016 = vmax.xlane.f32.xlu1 %v1015_v51 }
 0x42b   : > { %v1643_v54 = vpop.f32.mrb[12].mxu1 }
 0x42c   : > { %1019 = vmax.xlane.f32.xlu0 %v1018_v12  ;;  %v987_v14 = vpop.f32.mrb[13].mxu1  ;;  %v1010_v49 = vmul.f32 %v1643_v54, %v1003_v24 }
 0x42d   : > { %v1644_v15 = vpop.f32.mrb[14].mxu1  ;;  %v1008_v45 = vmul.f32 %v1003_v24, %v987_v14 }
 0x42e   : > { %v990_v55 = vpop.f32.mrb[15].mxu1  ;;  %v1011_v20 = vmul.f32 %v1644_v15, %v1003_v24  ;;  %v1030_v52 = vsel %vm514_vm1, %v1010_v49, -inf }
 0x42f   : > { %v2480_v5 = vmul.f32 %v1003_v24, %v990_v55  ;;  %v1024_v53 = vsel %vm514_vm1, %v1008_v45, -inf }
 0x430   : > { %1022 = vmax.xlane.f32.xlu0 %v1021_v44  ;;  %v1033_v61 = vsel %vm514_vm1, %v1011_v20, -inf }
 0x431   : > { %v1027_v56 = vsel %vm514_vm1, %v2480_v5, -inf }
 0x432   : > { %1028 = vmax.xlane.f32.xlu1 %v1027_v56 }
 0x434   : > { %1025 = vmax.xlane.f32.xlu0 %v1024_v53 }
 0x436   : > { %1034 = vmax.xlane.f32.xlu1 %v1033_v61 }
 0x438   : > { %1031 = vmax.xlane.f32.xlu0 %v1030_v52 }
 0x4b5   : > { %v1014_v4 = vpop.xlane.xlu0 %1013 }
 0x4b6   : > { %v1036_v6 = vsub.f32 %v1004_v33, %v1014_v4 }
 0x4b7   : > { %v1017_v62 = vpop.xlane.xlu1 %1016 }
 0x4b8   : > { %v1044_v17 = vmul.f32 1.442695, %v1036_v6  ;;  %v1037_v63 = vsub.f32 %v1005_v50, %v1017_v62 }
 0x4b9   : > { %v1020_v9 = vpop.xlane.xlu0 %1019 }
 0x4ba   : > { %v1038_v60 = vsub.f32 %v1006_v36, %v1020_v9  ;;  %v1046_v19 = vmul.f32 1.442695, %v1037_v63 }
 0x4bc   : > { %v1048_v11 = vmul.f32 1.442695, %v1038_v60 }
 0x4bd   : > { %v1023_v8 = vpop.xlane.xlu0 %1022 }
 0x4be   : > { %1874 = vpow2.f32 %v1048_v11  ;;  %v1039_v7 = vsub.f32 %v1007_v34, %v1023_v8 }
 0x4bf   : > { %1876 = vpow2.f32 %v1044_v17  ;;  %v1029_v50 = vpop.xlane.xlu1 %1028 }
 0x4c0   : > { %v1050_v26 = vmul.f32 1.442695, %v1039_v7  ;;  %v1041_v34 = vsub.f32 %v2480_v5, %v1029_v50 }
 0x4c1   : > { %v1026_v29 = vpop.xlane.xlu0 %1025 }
 0x4c2   : > { %1878 = vpow2.f32 %v1050_v26  ;;  %v1040_v21 = vsub.f32 %v1008_v45, %v1026_v29  ;;  %v1054_v12 = vmul.f32 1.442695, %v1041_v34 }
 0x4c3   : > { %1880 = vpow2.f32 %v1046_v19  ;;  %v1035_v35 = vpop.xlane.xlu1 %1034 }
 0x4c4   : > { %v1052_v57 = vmul.f32 1.442695, %v1040_v21  ;;  %v1043_v51 = vsub.f32 %v1011_v20, %v1035_v35 }
 0x4c5   : > { %v1032_v10 = vpop.xlane.xlu0 %1031 }
 0x4c6   : > { %v1042_v23 = vsub.f32 %v1010_v49, %v1032_v10  ;;  %v1058_v54 = vmul.f32 1.442695, %v1043_v51 }
 0x4c8   : > { %v2488_v25 = vpop.eup %1874  ;;  %v1056_v22 = vmul.f32 1.442695, %v1042_v23 }
 0x4c9   : > { %v1066_v32 = vsel %vm514_vm1, %v2488_v25, 0.0  ;;  %v1877_v30 = vpop.eup %1876 }
 0x4ca   : > { %1882 = vpow2.f32 %v1056_v22  ;;  %1067 = vadd.xlane.f32.xlu0 %v1066_v32  ;;  %v1060_v58 = vsel %vm514_vm1, %v1877_v30, 0.0 }
 0x4cb   : > { %1884 = vpow2.f32 %v1052_v57 }
 0x4cc   : > { %v2492_v28 = vpop.eup %1878  ;;  %1886 = vpow2.f32 %v1058_v54 }
 0x4cd   : > { %v1069_v24 = vsel %vm514_vm1, %v2492_v28, 0.0  ;;  %v1881_v41 = vpop.eup %1880  ;;  %1888 = vpow2.f32 %v1054_v12 }
 0x4ce   : > { %1061 = vadd.xlane.f32.xlu0 %v1060_v58  ;;  %1070 = vadd.xlane.f32.xlu1 %v1069_v24  ;;  %v1063_v42 = vsel %vm514_vm1, %v1881_v41, 0.0 }
 0x4d2   : > { %1064 = vadd.xlane.f32.xlu1 %v1063_v42 }
 0x4d4   : > { %v2498_v33 = vpop.eup %1882 }
 0x4d5   : > { %v1078_v47 = vsel %vm514_vm1, %v2498_v33, 0.0  ;;  %v2502_v59 = vpop.eup %1884 }
 0x4d6   : > { %1079 = vadd.xlane.f32.xlu0 %v1078_v47  ;;  %v1072_v36 = vsel %vm514_vm1, %v2502_v59, 0.0  ;;  %v1887_v14 = vpop.eup %1886 }
 0x4d7   : > { %v1081_v15 = vsel %vm514_vm1, %v1887_v14, 0.0  ;;  %v1889_v55 = vpop.eup %1888 }
 0x4da   : > { %1073 = vadd.xlane.f32.xlu0 %v1072_v36 }
 0x4e3   : > { %1106 = vrot.lane.b32.xlu1 %v2120_v1, %s2008_s6  ;;  %v1075_v1 = vsel %vm514_vm1, %v1889_v55, 0.0 }
 0x4e7   : > { %1108 = vrot.lane.b32.xlu1 %v2122_v2, %s2008_s6 }
 0x4f0   : > { %1104 = vrot.lane.b32.xlu0 %v2118_v0, %s2008_s6  ;;  %v1197_v0 = vld [vmem:[%s2617_s3 + $0x4] sm:$0xf] }
 0x4f1   : > { %1697 = vmatprep.subr.msk.bf16.mxu0 %vm1210_vm2, %v1197_v0  ;;  %v1212_v2 = vsel %vm1210_vm2, %v1197_v0, 0 }
 0x4f2   : > { %1662 = vmatpush3.bf16.msra.mxu0 %v1212_v2 }
 0x50b   : > { %1082 = vadd.xlane.f32.xlu1 %v1081_v15 }
 0x50f   : > { %1076 = vadd.xlane.f32.xlu1 %v1075_v1 }
 0x520   : > { %1110 = vrot.lane.b32.xlu1 %v2156_v13, %s2008_s6  ;;  %s1927_s6 = scalar_lea.vmem %s1926_s5, 2048 }
 0x521   : > { %p1929_p1 = scmp.lt.s32.totalorder %s1927_s6, %s1921_s29 }
 0x523   : > { %p1930_p2 = por %p1929_p1, %p1928_p0 }
 0x525   : > { %p1931_p3 = pnand %p1930_p2, %p1924_p13 }
 0x557   : > { %v1068_v45 = vpop.xlane.xlu0 %1067 }
 0x55b   : > { %v1071_v5 = vpop.xlane.xlu1 %1070  ;;  %v1062_v44 = vpop.xlane.xlu0 %1061 }
 0x55c   : > { %1890 = vrcp.f32 %v1062_v44 }
 0x55f   : > { %v1065_v20 = vpop.xlane.xlu1 %1064 }
 0x560   : > { %1892 = vrcp.f32 %v1065_v20 }
 0x561   : > { %1894 = vrcp.f32 %v1071_v5 }
 0x562   : > { %1896 = vrcp.f32 %v1068_v45 }
 0x563   : > { %v1080_v56 = vpop.xlane.xlu0 %1079  ;;  %v1107_v61 = vpop.permute.xlu1 %1106 }
 0x566   : > { %v1891_v53 = vpop.eup %1890 }
 0x567   : > { %v1074_v49 = vpop.xlane.xlu0 %1073  ;;  %v1092_v4 = vmul.f32 %v1891_v53, %v1877_v30  ;;  %v1109_v9 = vpop.permute.xlu1 %1108 }
 0x56a   : > { %v1893_v13 = vpop.eup %1892 }
 0x56b   : > { %v1105_v52 = vpop.permute.xlu0 %1104  ;;  %v1093_v6 = vmul.f32 %v1893_v13, %v1881_v41  ;;  %v1895_v17 = vpop.eup %1894 }
 0x56c   : > { %1645 = vmatprep.subr.bf16.mxu1 %v1105_v52  ;;  %v1897_v11 = vpop.eup %1896  ;;  %v1095_v8 = vmul.f32 %v1895_v17, %v2492_v28 }
 0x56d   : > { %1646 = vmatpush3.bf16.msra.mxu1 %v1105_v52  ;;  %v1100_v62 = vpack.c.bf16 %v1093_v6, %v1092_v4  ;;  %v1094_v19 = vmul.f32 %v1897_v11, %v2488_v25  ;;  %v720_v25 = vld [vmem:[%s2617_s3] sm:$0xf] }
 0x56e   : > { %1647 = vmatprep.subr.bf16.mxu1 %v1107_v61  ;;  %1698 = vmatprep.subr.msk.bf16.mxu0 %vm1210_vm2, %v720_v25 }
 0x56f   : > { %1653 = vmatprep.mubr.msk.bf16.mxu1 %vm514_vm1, %v1100_v62  ;;  %v1101_v26 = vpack.c.bf16 %v1095_v8, %v1094_v19 }
 0x571   : > { %1648 = vmatpush3.bf16.msra.mxu1 %v1107_v61 }
 0x572   : > { %1649 = vmatprep.subr.bf16.mxu1 %v1109_v9 }
 0x575   : > { %1650 = vmatpush3.bf16.msra.mxu1 %v1109_v9 }
 0x598   : > { %v1083_v60 = vpop.xlane.xlu1 %1082 }
 0x599   : > { %1898 = vrcp.f32 %v1083_v60 }
 0x59a   : > { %1900 = vrcp.f32 %v1074_v49 }
 0x59b   : > { %1902 = vrcp.f32 %v1080_v56 }
 0x59c   : > { %v1077_v63 = vpop.xlane.xlu1 %1076 }
 0x59d   : > { %1904 = vrcp.f32 %v1077_v63 }
 0x5a0   : > { %v1111_v7 = vpop.permute.xlu1 %1110 }
 0x5a1   : > { %1651 = vmatprep.subr.bf16.mxu1 %v1111_v7 }
 0x5a2   : > { %1652 = vmatpush3.bf16.msra.mxu1 %v1111_v7 }
 0x5a3   : > { %v1899_v29 = vpop.eup %1898 }
 0x5a4   : > { %v1901_v21 = vpop.eup %1900  ;;  %v1099_v57 = vmul.f32 %v1899_v29, %v1887_v14 }
 0x5a5   : > { %1654 = vmatmul.mubr.msk.bf16.vlgmr.msra.gmra.mrb[16].mxu1 %vm514_vm1, %v1101_v26  ;;  %v1903_v10 = vpop.eup %1902  ;;  %v1096_v22 = vmul.f32 %v1901_v21, %v2502_v59 }
 0x5a6   : > { %v1098_v30 = vmul.f32 %v1903_v10, %v2498_v33  ;;  %v1292_v33 = vsel %vm1210_vm2, %v720_v25, 0 }
 0x5a7   : > { %v1905_v23 = vpop.eup %1904 }
 0x5a8   : > { %v1097_v32 = vmul.f32 %v1905_v23, %v1889_v55  ;;  %v1103_v28 = vpack.c.bf16 %v1099_v57, %v1098_v30 }
 0x5aa   : > { %v1102_v58 = vpack.c.bf16 %v1097_v32, %v1096_v22 }
 0x5ac   : > { %1657 = vmatprep.mubr.msk.bf16.mxu1 %vm514_vm1, %v1102_v58 }
 0x5ad   : > { %1658 = vmatmul.mubr.msk.bf16.gmra.mrb[20].mxu1 %vm514_vm1, %v1103_v28 }
 0x678   : > { %v1655_v24 = vpop.f32.mrb[16].mxu1 }
 0x679   : > { %v1162_v41 = vpop.f32.mrb[17].mxu1 }
 0x67a   : > { %v1656_v42 = vpop.f32.mrb[18].mxu1 }
 0x67b   : > { %v1194_v47 = vpack.c.bf16 %v1656_v42, %v1655_v24  ;;  %v1165_v59 = vpop.f32.mrb[19].mxu1 }
 0x67c   : > { %v1193_v36 = vpack.c.bf16 %v1165_v59, %v1162_v41 }
 0x67e   : > { %1663 = vmatprep.mubr.msk.bf16.mxu0 %vm302_vm0, %v1193_v36 }
 0x67f   : > { %1664 = vmatmul.mubr.msk.bf16.vlgmr.msra.gmra.mrb[8].mxu0 %vm302_vm0, %v1194_v47 }
 0x680   : > { %v1659_v50 = vpop.f32.mrb[20].mxu1  ;;  %1672 = vmatpush3.bf16.msra.mxu0 %v1292_v33 }
 0x681   : > { %v1178_v35 = vpop.f32.mrb[21].mxu1 }
 0x682   : > { %v1660_v51 = vpop.f32.mrb[22].mxu1 }
 0x683   : > { %v1196_v34 = vpack.c.bf16 %v1660_v51, %v1659_v50  ;;  %v1181_v54 = vpop.f32.mrb[23].mxu1 }
 0x684   : > { %v1195_v12 = vpack.c.bf16 %v1181_v54, %v1178_v35 }
 0x686   : > { %1667 = vmatprep.mubr.msk.bf16.mxu0 %vm302_vm0, %v1195_v12 }
 0x687   : > { %1668 = vmatmul.mubr.msk.bf16.gmra.mrb[12].mxu0 %vm302_vm0, %v1196_v34 }
 0x688   : > { %1673 = vmatprep.mubr.msk.bf16.mxu0 %vm302_vm0, %v716_v46 }
 0x68f   : > { %1674 = vmatmul.mubr.msk.bf16.vlgmr.msra.gmra.mrb[8].mxu0 %vm302_vm0, %v717_v27 }
 0x690   : > { %1677 = vmatprep.mubr.msk.bf16.mxu0 %vm302_vm0, %v718_v40 }
 0x697   : > { %1678 = vmatmul.mubr.msk.bf16.gmra.mrb[12].mxu0 %vm302_vm0, %v719_v16 }
 0x762   : > { %v1675_v18 = vpop.f32.mrb[8].mxu0 }
 0x763   : > { %1362 = vst.msk [vmem:[%s244_s13 + $0x10] sm:$0xff] %vm1359_vm3, %v1675_v18  ;;  %v1328_v3 = vpop.f32.mrb[9].mxu0 }
 0x764   : > { %1360 = vst.msk [vmem:[%s244_s13] sm:$0xff] %vm1359_vm3, %v1328_v3  ;;  %v1676_v39 = vpop.f32.mrb[10].mxu0 }
 0x765   : > { %1363 = vst.msk [vmem:[%s244_s13 + $0x18] sm:$0xff] %vm1359_vm3, %v1676_v39  ;;  %v1331_v27 = vpop.f32.mrb[11].mxu0 }
 0x766   : > { %1361 = vst.msk [vmem:[%s244_s13 + $0x8] sm:$0xff] %vm1359_vm3, %v1331_v27 }
 0x76a   : > { %v1679_v43 = vpop.f32.mrb[12].mxu0 }
 0x76b   : > { %1366 = vst.msk [vmem:[%s244_s13 + $0x30] sm:$0xff] %vm1359_vm3, %v1679_v43  ;;  %v1344_v46 = vpop.f32.mrb[13].mxu0 }
 0x76c   : > { %1364 = vst.msk [vmem:[%s244_s13 + $0x20] sm:$0xff] %vm1359_vm3, %v1344_v46  ;;  %v1680_v48 = vpop.f32.mrb[14].mxu0 }
 0x76d   : > { %1367 = vst.msk [vmem:[%s244_s13 + $0x38] sm:$0xff] %vm1359_vm3, %v1680_v48  ;;  %v1347_v38 = vpop.f32.mrb[15].mxu0 }
 0x76e   : > { %1365 = vst.msk [vmem:[%s244_s13 + $0x28] sm:$0xff] %vm1359_vm3, %v1347_v38 }
 0x76f   : > { %1934 = shalt.err (!%p1931_p3)
}
 0x770   : > { %s1935_s7 = scalar_lea.hbm %s2561_s26, 1024  ;;  %s1939_s10 = scalar_lea.hbm %s2618_s4, 2048 }
 0x771   : > { %p1936_p5 = scmp.ne.s32.totalorder %s2561_s26, %s1935_s7  ;;  %p1940_p9 = scmp.lt.u32.totalorder %s2561_s26, %s2618_s4 }
 0x772   : > { %p1941_p12 = scmp.lt.u32.totalorder %s1939_s10, %s1935_s7  ;;  %p1943_p11 = scmp.lt.u32.totalorder %s1935_s7, %s2561_s26 }
 0x773   : > { %p1937_p6 = pnand %p1936_p5, %p2077_p4 }
 0x774   : > { %p1942_p10 = por %p1941_p12, %p1940_p9 }
 0x775   : > { %p1938_p7 = pneg %p1937_p6 }
 0x776   : > { %p1944_p13 = por %p1943_p11, %p1942_p10 }
 0x778   : > { %p1945_p0 = pnand %p1944_p13, %p1938_p7 }
 0x77a   : > { %1948 = shalt.err (!%p1945_p0)
}
 0x77b   : > { %s2010_s13 = smov 128   ;;  %s2011_s14 = smov 8  }
 0x77c   : > { %1703 = dma.vmem_to_hbm [thread:$0]  (%p2077_p4), %s2563_s21, 1024, %s2561_s26, %s2568_s18, %s2010_s13, %s2010_s13, %s2011_s14  }
 0x77d PF: > { %p1715_p1 = scmp.ge.s32.totalorder %s2003_s20, 2  ;;  %s1399_s22 = sand.u32 1, %s1983_s15  }
 0x77e   : > { %s1400_s24 = scalar_lea.sflag [#allocation3], %s1399_s22 }
 0x77f   : > { %p1710_p2 = pnand %p1715_p1, %p2084_p8 }
 0x781   : > { %1978 = dma.done.wait (!%p1710_p2), %s1400_s24, 1024  }
 0x782   : > { %1980 = vsyncadd (!%p1710_p2), %s1400_s24, 4294966272  ;;  %s18_s20 = sadd.s32 1, %s2003_s20   ;;  %s2623_s15 = smov %s1987_s16 }
 0x783   : > { %p15_p3 = scmp.ge.s32.totalorder %s18_s20, 4   ;;  %s2624_s16 = smov %s1991_s17 }
 0x784   : > { %s2625_s17 = smov %s2090_s28  ;;  %s2626_s18 = smov %s1999_s19 }
 0x785   : > { %s2627_s19 = smov %s2629_s23  ;;  %17 = sbr.rel (!%p15_p3) target bundleno = 5 (0x5), region = 79 }
 0x78c   :  { %1405 = vsyncpa [#allocation3], 1 }
 0x78d   :  { %1407 = vsyncpa [#allocation3 + $0x1], 1 }
 0x78e   :  { %1408 = vsyncpa [#allocation4], 1 }
 0x78f   :  { %1410 = vsyncpa [#allocation4 + $0x1], 1 }

</bundles_post_ra>
